<compile_context>
chip_gen: v7x
topology: tpu7x:2x2x1
jax: 0.10.0
libtpu: 0.0.40
codegen_flags: <defaults>
</compile_context>

<pallas_src>
import jax
import jax.numpy as jnp
from jax.experimental import pallas as pl
from jax.experimental.pallas import tpu as pltpu

NUM_CLASSES = 10   # dataset class count is not available in-script; fixed small value
H_IN = W_IN = 64   # fc1 expects 32*16*16 features => 64x64 input, as the module implies


def conv_stage_kernel(p1_ref, w1_ref, b1_ref, w2_ref, b2_ref, out_ref):
    """conv1+ReLU+pool1 + conv2+ReLU+(rolled)pool2 for G samples, spatial on lanes.

    p1_ref : (G, 27, 4096) bf16  conv1 im2col patches; lane m = (2dy+dx)*1024 + y2*32 + x2
    w1_ref : (16, 27)      bf16  conv1 weight, columns ordered k = ky*9 + kx*3 + ci
    b1_ref : (16, 1)       f32
    w2_ref : (9, 32, 16)   bf16  conv2 weight per tap t = ky*3 + kx, laid out (out_c, in_c)
    b2_ref : (32, 1)       f32
    out_ref: (G, 32, 1024) bf16  2x2-max map; pooled values sit at (even y, even x) lanes
    """
    G = p1_ref.shape[0]

    # Lane coordinates of the 32x32 pooled map (shared by all samples / taps).
    lane = jax.lax.broadcasted_iota(jnp.int32, (1, 1024), 1)
    xx = lane % 32                       # x coordinate of each lane

    w1 = w1_ref[...]                     # (16, 27) bf16
    b1 = b1_ref[...]                     # (16, 1)  f32
    b2 = b2_ref[...]                     # (32, 1)  f32

    PAD = 128                            # aligned zero pad around the pooled map

    for g in range(G):
        # ---- conv1: one lane-dense matmul + bias + ReLU -----------------------
        a1 = jnp.dot(w1, p1_ref[g], preferred_element_type=jnp.float32)   # (16, 4096)
        a1 = jnp.maximum(a1 + b1, 0.0)

        # ---- maxpool1: the 4 candidates are 4 aligned 1024-lane chunks --------
        h1 = jnp.maximum(jnp.maximum(a1[:, 0:1024], a1[:, 1024:2048]),
                         jnp.maximum(a1[:, 2048:3072], a1[:, 3072:4096]))  # (16, 1024)

        # ---- conv2: 9 accumulated tap matmuls (no pad scratch, no concat-144) --
        # Zero-padded copy handles the y ('SAME') boundary; only x needs a mask.
        h1b = h1.astype(jnp.bfloat16)
        zpad = jnp.zeros((16, PAD), jnp.bfloat16)
        hp = jnp.concatenate([zpad, h1b, zpad], axis=1)                    # (16, 1280)

        acc = None
        for ky in range(3):
            for kx in range(3):
                t = ky * 3 + kx
                s = (ky - 1) * 32 + (kx - 1)
                tap = hp[:, PAD + s: PAD + s + 1024]                       # (16, 1024)
                if kx == 0:
                    tap = jnp.where(xx >= 1, tap, jnp.zeros_like(tap))
                elif kx == 2:
                    tap = jnp.where(xx <= 30, tap, jnp.zeros_like(tap))
                part = jnp.dot(w2_ref[t], tap,
                               preferred_element_type=jnp.float32)         # (32, 1024)
                acc = part if acc is None else acc + part

        a2 = jnp.maximum(acc + b2, 0.0)                                    # (32, 1024)

        # ---- maxpool2 via lane shifts (values at odd y/x are ignored later) ----
        s1 = jnp.concatenate([a2[:, 1:], a2[:, :1]], axis=1)    # a2[p+1]
        m1 = jnp.maximum(a2, s1)
        s32 = jnp.concatenate([m1[:, 32:], m1[:, :32]], axis=1)  # m1[p+32]
        m2 = jnp.maximum(m1, s32)
        out_ref[g] = m2.astype(out_ref.dtype)


def mlp_kernel(feat_ref, fw1_ref, fb1_ref, fw2_ref, fb2_ref, out_ref):
    """Batched fc1 -> ReLU -> fc2 (M = B, one grid step)."""
    h = jnp.dot(feat_ref[...], fw1_ref[...], preferred_element_type=jnp.float32)
    h = jnp.maximum(h + fb1_ref[...], 0.0)
    logits = jnp.dot(h.astype(jnp.bfloat16), fw2_ref[...],
                     preferred_element_type=jnp.float32) + fb2_ref[...]
    out_ref[...] = logits.astype(out_ref.dtype)


def _conv1_patches(x_nchw):
    """(B,3,64,64) NCHW -> (B,27,4096) bf16 lane-dense conv1 im2col patches.

    Lane order: m = (2*dy+dx)*1024 + y2*32 + x2 with pixel (y,x) = (2*y2+dy, 2*x2+dx),
    so the 4 rows of each 2x2 maxpool window are 4 aligned 1024-lane chunks.
    Sublane order: k = ky*9 + kx*3 + ci (matches conv1_w.reshape(27,16)).
    """
    B = x_nchw.shape[0]
    x = jnp.transpose(x_nchw, (0, 2, 3, 1))                  # NHWC (B,64,64,3)
    xp = jnp.pad(x, ((0, 0), (1, 1), (1, 1), (0, 0)))        # (B,66,66,3)
    taps = [xp[:, ky:ky + 64, kx:kx + 64, :] for ky in range(3) for kx in range(3)]
    p = jnp.stack(taps, axis=1)                               # (b, t, y, x, ci)
    p = p.reshape(B, 9, 32, 2, 32, 2, 3)                      # (b, t, y2, dy, x2, dx, ci)
    p = p.transpose(0, 1, 6, 3, 5, 2, 4)                      # (b, t, ci, dy, dx, y2, x2)
    return p.reshape(B, 27, 4096).astype(jnp.bfloat16)


def _pick_group(batch):
    """Samples per grid step: <=8, and keep >=2 grid steps when possible (v7x 2 TCs)."""
    for g in (8, 4, 2, 1):
        if batch % g == 0 and batch // g >= 2:
            return g
    return batch


@jax.jit
def simple_cnn_forward(x_nchw, params):
    B = x_nchw.shape[0]
    nc = params["fc2_b"].shape[0]
    G = _pick_group(B)

    # ---- layout plumbing (weights reshaped once; patches are im2col) ----------
    p1 = _conv1_patches(x_nchw)                                            # (B,27,4096)
    w1t = params["conv1_w"].reshape(27, 16).T.astype(jnp.bfloat16)         # (16,27)
    b1 = params["conv1_b"].reshape(16, 1)
    w2t = (params["conv2_w"].transpose(0, 1, 3, 2)                         # HWIO->HWOI
           .reshape(9, 32, 16).astype(jnp.bfloat16))                       # (9,32,16)
    b2 = params["conv2_b"].reshape(32, 1)

    # ---- fused conv1/pool1/conv2/pool2 kernel ---------------------------------
    m2 = pl.pallas_call(
        conv_stage_kernel,
        out_shape=jax.ShapeDtypeStruct((B, 32, 1024), jnp.bfloat16),
        grid=(B // G,),
        in_specs=[
            pl.BlockSpec((G, 27, 4096), lambda b: (b, 0, 0)),   # per-step patch block
            pl.BlockSpec((16, 27), lambda b: (0, 0)),           # weights: constant maps ->
            pl.BlockSpec((16, 1), lambda b: (0, 0)),            #  DMA'd once, VMEM-resident
            pl.BlockSpec((9, 32, 16), lambda b: (0, 0, 0)),
            pl.BlockSpec((32, 1), lambda b: (0, 0)),
        ],
        out_specs=pl.BlockSpec((G, 32, 1024), lambda b: (b, 0, 0)),
        compiler_params=pltpu.CompilerParams(
            dimension_semantics=("parallel",),
            vmem_limit_bytes=32 * 1024 * 1024),
    )(p1, w1t, b1, w2t, b2)

    # Pooled values live at (even y, even x) lanes; strided slice yields NCHW-pooled
    # (B,32,16,16), so flattening gives torch.flatten's (c,y,x) order -> fc1_w as-is.
    feat = m2.reshape(B, 32, 32, 32)[:, :, ::2, ::2].reshape(B, 32 * 16 * 16)

    # ---- batched MLP head (fc1 has M = B instead of B matvecs) ---------------
    fw1 = params["fc1_w"].astype(jnp.bfloat16)                 # (8192, 64)
    fb1 = params["fc1_b"].reshape(1, 64)
    fw2 = params["fc2_w"].astype(jnp.bfloat16)                 # (64, nc)
    fb2 = params["fc2_b"].reshape(1, nc)

    logits = pl.pallas_call(
        mlp_kernel,
        out_shape=jax.ShapeDtypeStruct((B, nc), jnp.float32),
        grid=(1,),
        in_specs=[
            pl.BlockSpec((B, 32 * 16 * 16), lambda i: (0, 0)),
            pl.BlockSpec((32 * 16 * 16, 64), lambda i: (0, 0)),
            pl.BlockSpec((1, 64), lambda i: (0, 0)),
            pl.BlockSpec((64, nc), lambda i: (0, 0)),
            pl.BlockSpec((1, nc), lambda i: (0, 0)),
        ],
        out_specs=pl.BlockSpec((B, nc), lambda i: (0, 0)),
        compiler_params=pltpu.CompilerParams(
            dimension_semantics=("arbitrary",),
            vmem_limit_bytes=32 * 1024 * 1024),
    )(feat, fw1, fb1, fw2, fb2)
    return logits


def init_params(key):
    # Deterministic synthetic init (PyTorch-style uniform(-1/sqrt(fan_in), ...)).
    # conv weights stored HWIO (PyTorch uses OIHW); fc weights stored (in, out).
    ks = jax.random.split(key, 8)

    def u(k, shape, fan_in):
        bound = 1.0 / jnp.sqrt(float(fan_in))
        return jax.random.uniform(k, shape, jnp.float32, -bound, bound)

    return {
        "conv1_w": u(ks[0], (3, 3, 3, 16), 3 * 9),
        "conv1_b": u(ks[1], (16,), 3 * 9),
        "conv2_w": u(ks[2], (3, 3, 16, 32), 16 * 9),
        "conv2_b": u(ks[3], (32,), 16 * 9),
        "fc1_w":   u(ks[4], (32 * 16 * 16, 64), 32 * 16 * 16),
        "fc1_b":   u(ks[5], (64,), 32 * 16 * 16),
        "fc2_w":   u(ks[6], (64, NUM_CLASSES), 64),
        "fc2_b":   u(ks[7], (NUM_CLASSES,), 64),
    }


def reference_forward(x_nchw, p):
    # Pure-JAX f32 reference mirroring the PyTorch forward (correctness check).
    w1 = jnp.transpose(p["conv1_w"], (3, 2, 0, 1))  # HWIO -> OIHW
    w2 = jnp.transpose(p["conv2_w"], (3, 2, 0, 1))

    def conv(x, w, b):
        y = jax.lax.conv_general_dilated(
            x, w, (1, 1), "SAME", dimension_numbers=("NCHW", "OIHW", "NCHW"))
        return y + b.reshape(1, -1, 1, 1)

    def pool(x):
        return jax.lax.reduce_window(x, -jnp.inf, jax.lax.max,
                                     (1, 1, 2, 2), (1, 1, 2, 2), "VALID")

    x = pool(jax.nn.relu(conv(x_nchw, w1, p["conv1_b"])))
    x = pool(jax.nn.relu(conv(x, w2, p["conv2_b"])))
    x = x.reshape(x.shape[0], -1)                   # NCHW flatten = (c, y, x) order
    x = jax.nn.relu(x @ p["fc1_w"] + p["fc1_b"])
    return x @ p["fc2_w"] + p["fc2_b"]


if __name__ == "__main__":
    key = jax.random.PRNGKey(0)
    pkey, xkey = jax.random.split(key)
    params = init_params(pkey)

    # fc1 expects 32*16*16 features after two /2 pools => input spatial must be 64.
    x = jax.random.normal(xkey, (2, 3, H_IN, W_IN), jnp.float32)  # NCHW, like PyTorch

    out = jax.block_until_ready(simple_cnn_forward(x, params))
    assert out.shape == (2, NUM_CLASSES), out.shape

    ref = jax.block_until_ready(reference_forward(x, params))
    # bf16 matmul operands (f32 accumulation) -> compare to the f32 reference loosely.
    assert jnp.allclose(out, ref, atol=2e-2, rtol=2e-2), \
        float(jnp.max(jnp.abs(out - ref)))
    print("KERNEL_OK")
</pallas_src>

<mosaic_0001>
module attributes {stable_mosaic.version = 11 : i64} {
  func.func @conv_stage_kernel(%arg0: i32, %arg1: memref<1x27x4096xbf16, #tpu.memory_space<vmem>>, %arg2: memref<16x27xbf16, #tpu.memory_space<vmem>>, %arg3: memref<16x1xf32, #tpu.memory_space<vmem>>, %arg4: memref<9x32x16xbf16, #tpu.memory_space<vmem>>, %arg5: memref<32x1xf32, #tpu.memory_space<vmem>>, %arg6: memref<1x32x1024xbf16, #tpu.memory_space<vmem>>) attributes {dimension_semantics = [#tpu.dimension_semantics<parallel>], iteration_bounds = array<i64: 2>, scalar_prefetch = 0 : i64, scratch_operands = 0 : i64, tpu.core_type = #tpu.core_type<tc>, window_params = [{transform_indices = @transform_0, window_bounds = array<i64: 1, 27, 4096>}, {pipeline_mode = #tpu.pipeline_mode<synchronous>, transform_indices = @transform_1, window_bounds = array<i64: 16, 27>}, {pipeline_mode = #tpu.pipeline_mode<synchronous>, transform_indices = @transform_2, window_bounds = array<i64: 16, 1>}, {pipeline_mode = #tpu.pipeline_mode<synchronous>, transform_indices = @transform_3, window_bounds = array<i64: 9, 32, 16>}, {pipeline_mode = #tpu.pipeline_mode<synchronous>, transform_indices = @transform_4, window_bounds = array<i64: 32, 1>}, {transform_indices = @transform_5, window_bounds = array<i64: 1, 32, 1024>}]} {
    %0 = tpu.iota {dimensions = array<i32: 1>} : vector<1x1024xi32>
    %c32_i32 = arith.constant 32 : i32
    %c0_i32 = arith.constant 0 : i32
    %1 = arith.cmpi eq, %c32_i32, %c0_i32 : i32
    %c1_i32 = arith.constant 1 : i32
    %2 = arith.select %1, %c1_i32, %c32_i32 : i32
    %3 = vector.broadcast %2 : i32 to vector<1x1024xi32>
    %4 = arith.remsi %0, %3 : vector<1x1024xi32>
    %c0_i32_0 = arith.constant 0 : i32
    %5 = vector.broadcast %c0_i32_0 : i32 to vector<1x1024xi32>
    %6 = arith.cmpi ne, %4, %5 : vector<1x1024xi32>
    %c0_i32_1 = arith.constant 0 : i32
    %7 = vector.broadcast %c0_i32_1 : i32 to vector<1x1024xi32>
    %8 = arith.cmpi slt, %4, %7 : vector<1x1024xi32>
    %c0_i32_2 = arith.constant 0 : i32
    %9 = arith.cmpi slt, %2, %c0_i32_2 : i32
    %10 = vector.broadcast %9 : i1 to vector<1x1024xi1>
    %11 = vector.broadcast %10 : vector<1x1024xi1> to vector<1x1024xi1>
    %12 = arith.xori %8, %11 : vector<1x1024xi1>
    %13 = arith.andi %12, %6 : vector<1x1024xi1>
    %14 = vector.broadcast %2 : i32 to vector<1x1024xi32>
    %15 = arith.addi %4, %14 : vector<1x1024xi32>
    %16 = arith.select %13, %15, %4 : vector<1x1024xi1>, vector<1x1024xi32>
    %c0 = arith.constant 0 : index
    %c0_3 = arith.constant 0 : index
    %17 = vector.load %arg2[%c0, %c0_3] : memref<16x27xbf16, #tpu.memory_space<vmem>>, vector<16x27xbf16>
    %c0_4 = arith.constant 0 : index
    %c0_5 = arith.constant 0 : index
    %18 = vector.load %arg3[%c0_4, %c0_5] : memref<16x1xf32, #tpu.memory_space<vmem>>, vector<16x1xf32>
    %c0_6 = arith.constant 0 : index
    %c0_7 = arith.constant 0 : index
    %19 = vector.load %arg5[%c0_6, %c0_7] : memref<32x1xf32, #tpu.memory_space<vmem>>, vector<32x1xf32>
    %c0_8 = arith.constant 0 : index
    %c0_9 = arith.constant 0 : index
    %c0_10 = arith.constant 0 : index
    %20 = vector.load %arg1[%c0_8, %c0_9, %c0_10] : memref<1x27x4096xbf16, #tpu.memory_space<vmem>>, vector<1x27x4096xbf16>
    %21 = vector.shape_cast %20 : vector<1x27x4096xbf16> to vector<27x4096xbf16>
    %cst = arith.constant dense<0.000000e+00> : vector<16x4096xf32>
    %22 = tpu.matmul %17, %21, %cst {dimension_numbers = #tpu.dot_dimension_numbers<[1], [0], [0], [1], [0, 0, 1, 1], [], []>} : vector<16x27xbf16>, vector<27x4096xbf16>, vector<16x4096xf32> -> vector<16x4096xf32>
    %23 = vector.broadcast %18 : vector<16x1xf32> to vector<16x4096xf32>
    %24 = arith.addf %22, %23 : vector<16x4096xf32>
    %cst_11 = arith.constant 0.000000e+00 : f32
    %25 = vector.broadcast %cst_11 : f32 to vector<16x4096xf32>
    %26 = arith.maximumf %24, %25 : vector<16x4096xf32>
    %27 = vector.extract_strided_slice %26 {offsets = [0, 0], sizes = [16, 1024], strides = [1, 1]} : vector<16x4096xf32> to vector<16x1024xf32>
    %28 = vector.extract_strided_slice %26 {offsets = [0, 1024], sizes = [16, 1024], strides = [1, 1]} : vector<16x4096xf32> to vector<16x1024xf32>
    %29 = arith.maximumf %27, %28 : vector<16x1024xf32>
    %30 = vector.extract_strided_slice %26 {offsets = [0, 2048], sizes = [16, 1024], strides = [1, 1]} : vector<16x4096xf32> to vector<16x1024xf32>
    %31 = vector.extract_strided_slice %26 {offsets = [0, 3072], sizes = [16, 1024], strides = [1, 1]} : vector<16x4096xf32> to vector<16x1024xf32>
    %32 = arith.maximumf %30, %31 : vector<16x1024xf32>
    %33 = arith.maximumf %29, %32 : vector<16x1024xf32>
    %34 = arith.truncf %33 : vector<16x1024xf32> to vector<16x1024xbf16>
    %cst_12 = arith.constant 0.000000e+00 : bf16
    %35 = vector.broadcast %cst_12 : bf16 to vector<16x128xbf16>
    %36 = tpu.concatenate %35, %34, %35 in 1 : vector<16x128xbf16>, vector<16x1024xbf16>, vector<16x128xbf16> -> vector<16x1280xbf16>
    %37 = vector.extract_strided_slice %36 {offsets = [0, 95], sizes = [16, 1024], strides = [1, 1]} : vector<16x1280xbf16> to vector<16x1024xbf16>
    %c1_i32_13 = arith.constant 1 : i32
    %38 = vector.broadcast %c1_i32_13 : i32 to vector<1x1024xi32>
    %39 = arith.cmpi sge, %16, %38 : vector<1x1024xi32>
    %cst_14 = arith.constant 0.000000e+00 : bf16
    %40 = vector.broadcast %cst_14 : bf16 to vector<16x1024xbf16>
    %41 = vector.shape_cast %39 : vector<1x1024xi1> to vector<1x1024xi1>
    %42 = vector.broadcast %41 : vector<1x1024xi1> to vector<16x1024xi1>
    %43 = arith.select %42, %37, %40 : vector<16x1024xi1>, vector<16x1024xbf16>
    %c0_15 = arith.constant 0 : index
    %c0_16 = arith.constant 0 : index
    %c0_17 = arith.constant 0 : index
    %44 = vector.load %arg4[%c0_15, %c0_16, %c0_17] : memref<9x32x16xbf16, #tpu.memory_space<vmem>>, vector<1x32x16xbf16>
    %45 = vector.shape_cast %44 : vector<1x32x16xbf16> to vector<32x16xbf16>
    %cst_18 = arith.constant dense<0.000000e+00> : vector<32x1024xf32>
    %46 = tpu.matmul %45, %43, %cst_18 {dimension_numbers = #tpu.dot_dimension_numbers<[1], [0], [0], [1], [0, 0, 1, 1], [], []>} : vector<32x16xbf16>, vector<16x1024xbf16>, vector<32x1024xf32> -> vector<32x1024xf32>
    %47 = vector.extract_strided_slice %36 {offsets = [0, 96], sizes = [16, 1024], strides = [1, 1]} : vector<16x1280xbf16> to vector<16x1024xbf16>
    %c1 = arith.constant 1 : index
    %c0_19 = arith.constant 0 : index
    %c0_20 = arith.constant 0 : index
    %48 = vector.load %arg4[%c1, %c0_19, %c0_20] : memref<9x32x16xbf16, #tpu.memory_space<vmem>>, vector<1x32x16xbf16>
    %49 = vector.shape_cast %48 : vector<1x32x16xbf16> to vector<32x16xbf16>
    %cst_21 = arith.constant dense<0.000000e+00> : vector<32x1024xf32>
    %50 = tpu.matmul %49, %47, %cst_21 {dimension_numbers = #tpu.dot_dimension_numbers<[1], [0], [0], [1], [0, 0, 1, 1], [], []>} : vector<32x16xbf16>, vector<16x1024xbf16>, vector<32x1024xf32> -> vector<32x1024xf32>
    %51 = arith.addf %46, %50 : vector<32x1024xf32>
    %52 = vector.extract_strided_slice %36 {offsets = [0, 97], sizes = [16, 1024], strides = [1, 1]} : vector<16x1280xbf16> to vector<16x1024xbf16>
    %c30_i32 = arith.constant 30 : i32
    %53 = vector.broadcast %c30_i32 : i32 to vector<1x1024xi32>
    %54 = arith.cmpi sle, %16, %53 : vector<1x1024xi32>
    %cst_22 = arith.constant 0.000000e+00 : bf16
    %55 = vector.broadcast %cst_22 : bf16 to vector<16x1024xbf16>
    %56 = vector.shape_cast %54 : vector<1x1024xi1> to vector<1x1024xi1>
    %57 = vector.broadcast %56 : vector<1x1024xi1> to vector<16x1024xi1>
    %58 = arith.select %57, %52, %55 : vector<16x1024xi1>, vector<16x1024xbf16>
    %c2 = arith.constant 2 : index
    %c0_23 = arith.constant 0 : index
    %c0_24 = arith.constant 0 : index
    %59 = vector.load %arg4[%c2, %c0_23, %c0_24] : memref<9x32x16xbf16, #tpu.memory_space<vmem>>, vector<1x32x16xbf16>
    %60 = vector.shape_cast %59 : vector<1x32x16xbf16> to vector<32x16xbf16>
    %cst_25 = arith.constant dense<0.000000e+00> : vector<32x1024xf32>
    %61 = tpu.matmul %60, %58, %cst_25 {dimension_numbers = #tpu.dot_dimension_numbers<[1], [0], [0], [1], [0, 0, 1, 1], [], []>} : vector<32x16xbf16>, vector<16x1024xbf16>, vector<32x1024xf32> -> vector<32x1024xf32>
    %62 = arith.addf %51, %61 : vector<32x1024xf32>
    %63 = vector.extract_strided_slice %36 {offsets = [0, 127], sizes = [16, 1024], strides = [1, 1]} : vector<16x1280xbf16> to vector<16x1024xbf16>
    %c1_i32_26 = arith.constant 1 : i32
    %64 = vector.broadcast %c1_i32_26 : i32 to vector<1x1024xi32>
    %65 = arith.cmpi sge, %16, %64 : vector<1x1024xi32>
    %cst_27 = arith.constant 0.000000e+00 : bf16
    %66 = vector.broadcast %cst_27 : bf16 to vector<16x1024xbf16>
    %67 = vector.shape_cast %65 : vector<1x1024xi1> to vector<1x1024xi1>
    %68 = vector.broadcast %67 : vector<1x1024xi1> to vector<16x1024xi1>
    %69 = arith.select %68, %63, %66 : vector<16x1024xi1>, vector<16x1024xbf16>
    %c3 = arith.constant 3 : index
    %c0_28 = arith.constant 0 : index
    %c0_29 = arith.constant 0 : index
    %70 = vector.load %arg4[%c3, %c0_28, %c0_29] : memref<9x32x16xbf16, #tpu.memory_space<vmem>>, vector<1x32x16xbf16>
    %71 = vector.shape_cast %70 : vector<1x32x16xbf16> to vector<32x16xbf16>
    %cst_30 = arith.constant dense<0.000000e+00> : vector<32x1024xf32>
    %72 = tpu.matmul %71, %69, %cst_30 {dimension_numbers = #tpu.dot_dimension_numbers<[1], [0], [0], [1], [0, 0, 1, 1], [], []>} : vector<32x16xbf16>, vector<16x1024xbf16>, vector<32x1024xf32> -> vector<32x1024xf32>
    %73 = arith.addf %62, %72 : vector<32x1024xf32>
    %74 = vector.extract_strided_slice %36 {offsets = [0, 128], sizes = [16, 1024], strides = [1, 1]} : vector<16x1280xbf16> to vector<16x1024xbf16>
    %c4 = arith.constant 4 : index
    %c0_31 = arith.constant 0 : index
    %c0_32 = arith.constant 0 : index
    %75 = vector.load %arg4[%c4, %c0_31, %c0_32] : memref<9x32x16xbf16, #tpu.memory_space<vmem>>, vector<1x32x16xbf16>
    %76 = vector.shape_cast %75 : vector<1x32x16xbf16> to vector<32x16xbf16>
    %cst_33 = arith.constant dense<0.000000e+00> : vector<32x1024xf32>
    %77 = tpu.matmul %76, %74, %cst_33 {dimension_numbers = #tpu.dot_dimension_numbers<[1], [0], [0], [1], [0, 0, 1, 1], [], []>} : vector<32x16xbf16>, vector<16x1024xbf16>, vector<32x1024xf32> -> vector<32x1024xf32>
    %78 = arith.addf %73, %77 : vector<32x1024xf32>
    %79 = vector.extract_strided_slice %36 {offsets = [0, 129], sizes = [16, 1024], strides = [1, 1]} : vector<16x1280xbf16> to vector<16x1024xbf16>
    %c30_i32_34 = arith.constant 30 : i32
    %80 = vector.broadcast %c30_i32_34 : i32 to vector<1x1024xi32>
    %81 = arith.cmpi sle, %16, %80 : vector<1x1024xi32>
    %cst_35 = arith.constant 0.000000e+00 : bf16
    %82 = vector.broadcast %cst_35 : bf16 to vector<16x1024xbf16>
    %83 = vector.shape_cast %81 : vector<1x1024xi1> to vector<1x1024xi1>
    %84 = vector.broadcast %83 : vector<1x1024xi1> to vector<16x1024xi1>
    %85 = arith.select %84, %79, %82 : vector<16x1024xi1>, vector<16x1024xbf16>
    %c5 = arith.constant 5 : index
    %c0_36 = arith.constant 0 : index
    %c0_37 = arith.constant 0 : index
    %86 = vector.load %arg4[%c5, %c0_36, %c0_37] : memref<9x32x16xbf16, #tpu.memory_space<vmem>>, vector<1x32x16xbf16>
    %87 = vector.shape_cast %86 : vector<1x32x16xbf16> to vector<32x16xbf16>
    %cst_38 = arith.constant dense<0.000000e+00> : vector<32x1024xf32>
    %88 = tpu.matmul %87, %85, %cst_38 {dimension_numbers = #tpu.dot_dimension_numbers<[1], [0], [0], [1], [0, 0, 1, 1], [], []>} : vector<32x16xbf16>, vector<16x1024xbf16>, vector<32x1024xf32> -> vector<32x1024xf32>
    %89 = arith.addf %78, %88 : vector<32x1024xf32>
    %90 = vector.extract_strided_slice %36 {offsets = [0, 159], sizes = [16, 1024], strides = [1, 1]} : vector<16x1280xbf16> to vector<16x1024xbf16>
    %c1_i32_39 = arith.constant 1 : i32
    %91 = vector.broadcast %c1_i32_39 : i32 to vector<1x1024xi32>
    %92 = arith.cmpi sge, %16, %91 : vector<1x1024xi32>
    %cst_40 = arith.constant 0.000000e+00 : bf16
    %93 = vector.broadcast %cst_40 : bf16 to vector<16x1024xbf16>
    %94 = vector.shape_cast %92 : vector<1x1024xi1> to vector<1x1024xi1>
    %95 = vector.broadcast %94 : vector<1x1024xi1> to vector<16x1024xi1>
    %96 = arith.select %95, %90, %93 : vector<16x1024xi1>, vector<16x1024xbf16>
    %c6 = arith.constant 6 : index
    %c0_41 = arith.constant 0 : index
    %c0_42 = arith.constant 0 : index
    %97 = vector.load %arg4[%c6, %c0_41, %c0_42] : memref<9x32x16xbf16, #tpu.memory_space<vmem>>, vector<1x32x16xbf16>
    %98 = vector.shape_cast %97 : vector<1x32x16xbf16> to vector<32x16xbf16>
    %cst_43 = arith.constant dense<0.000000e+00> : vector<32x1024xf32>
    %99 = tpu.matmul %98, %96, %cst_43 {dimension_numbers = #tpu.dot_dimension_numbers<[1], [0], [0], [1], [0, 0, 1, 1], [], []>} : vector<32x16xbf16>, vector<16x1024xbf16>, vector<32x1024xf32> -> vector<32x1024xf32>
    %100 = arith.addf %89, %99 : vector<32x1024xf32>
    %101 = vector.extract_strided_slice %36 {offsets = [0, 160], sizes = [16, 1024], strides = [1, 1]} : vector<16x1280xbf16> to vector<16x1024xbf16>
    %c7 = arith.constant 7 : index
    %c0_44 = arith.constant 0 : index
    %c0_45 = arith.constant 0 : index
    %102 = vector.load %arg4[%c7, %c0_44, %c0_45] : memref<9x32x16xbf16, #tpu.memory_space<vmem>>, vector<1x32x16xbf16>
    %103 = vector.shape_cast %102 : vector<1x32x16xbf16> to vector<32x16xbf16>
    %cst_46 = arith.constant dense<0.000000e+00> : vector<32x1024xf32>
    %104 = tpu.matmul %103, %101, %cst_46 {dimension_numbers = #tpu.dot_dimension_numbers<[1], [0], [0], [1], [0, 0, 1, 1], [], []>} : vector<32x16xbf16>, vector<16x1024xbf16>, vector<32x1024xf32> -> vector<32x1024xf32>
    %105 = arith.addf %100, %104 : vector<32x1024xf32>
    %106 = vector.extract_strided_slice %36 {offsets = [0, 161], sizes = [16, 1024], strides = [1, 1]} : vector<16x1280xbf16> to vector<16x1024xbf16>
    %c30_i32_47 = arith.constant 30 : i32
    %107 = vector.broadcast %c30_i32_47 : i32 to vector<1x1024xi32>
    %108 = arith.cmpi sle, %16, %107 : vector<1x1024xi32>
    %cst_48 = arith.constant 0.000000e+00 : bf16
    %109 = vector.broadcast %cst_48 : bf16 to vector<16x1024xbf16>
    %110 = vector.shape_cast %108 : vector<1x1024xi1> to vector<1x1024xi1>
    %111 = vector.broadcast %110 : vector<1x1024xi1> to vector<16x1024xi1>
    %112 = arith.select %111, %106, %109 : vector<16x1024xi1>, vector<16x1024xbf16>
    %c8 = arith.constant 8 : index
    %c0_49 = arith.constant 0 : index
    %c0_50 = arith.constant 0 : index
    %113 = vector.load %arg4[%c8, %c0_49, %c0_50] : memref<9x32x16xbf16, #tpu.memory_space<vmem>>, vector<1x32x16xbf16>
    %114 = vector.shape_cast %113 : vector<1x32x16xbf16> to vector<32x16xbf16>
    %cst_51 = arith.constant dense<0.000000e+00> : vector<32x1024xf32>
    %115 = tpu.matmul %114, %112, %cst_51 {dimension_numbers = #tpu.dot_dimension_numbers<[1], [0], [0], [1], [0, 0, 1, 1], [], []>} : vector<32x16xbf16>, vector<16x1024xbf16>, vector<32x1024xf32> -> vector<32x1024xf32>
    %116 = arith.addf %105, %115 : vector<32x1024xf32>
    %117 = vector.broadcast %19 : vector<32x1xf32> to vector<32x1024xf32>
    %118 = arith.addf %116, %117 : vector<32x1024xf32>
    %cst_52 = arith.constant 0.000000e+00 : f32
    %119 = vector.broadcast %cst_52 : f32 to vector<32x1024xf32>
    %120 = arith.maximumf %118, %119 : vector<32x1024xf32>
    %121 = vector.extract_strided_slice %120 {offsets = [0, 1], sizes = [32, 1023], strides = [1, 1]} : vector<32x1024xf32> to vector<32x1023xf32>
    %122 = vector.extract_strided_slice %120 {offsets = [0, 0], sizes = [32, 1], strides = [1, 1]} : vector<32x1024xf32> to vector<32x1xf32>
    %123 = tpu.concatenate %121, %122 in 1 : vector<32x1023xf32>, vector<32x1xf32> -> vector<32x1024xf32>
    %124 = arith.maximumf %120, %123 : vector<32x1024xf32>
    %125 = vector.extract_strided_slice %124 {offsets = [0, 32], sizes = [32, 992], strides = [1, 1]} : vector<32x1024xf32> to vector<32x992xf32>
    %126 = vector.extract_strided_slice %124 {offsets = [0, 0], sizes = [32, 32], strides = [1, 1]} : vector<32x1024xf32> to vector<32x32xf32>
    %127 = tpu.concatenate %125, %126 in 1 : vector<32x992xf32>, vector<32x32xf32> -> vector<32x1024xf32>
    %128 = arith.maximumf %124, %127 : vector<32x1024xf32>
    %129 = arith.truncf %128 : vector<32x1024xf32> to vector<32x1024xbf16>
    %c0_53 = arith.constant 0 : index
    %c0_54 = arith.constant 0 : index
    %c0_55 = arith.constant 0 : index
    %130 = vector.load %arg6[%c0_53, %c0_54, %c0_55] : memref<1x32x1024xbf16, #tpu.memory_space<vmem>>, vector<1x32x1024xbf16>
    %131 = vector.shape_cast %130 : vector<1x32x1024xbf16> to vector<32x1024xbf16>
    %132 = vector.shape_cast %129 : vector<32x1024xbf16> to vector<1x32x1024xbf16>
    tpu.vector_store %arg6[%c0_53, %c0_54, %c0_55], %132 {strides = array<i32>} : memref<1x32x1024xbf16, #tpu.memory_space<vmem>>, vector<1x32x1024xbf16>,
    return
  }
  func.func @transform_0(%arg0: i32) -> (i32, i32, i32) {
    %c0_i32 = arith.constant 0 : i32
    %c0_i32_0 = arith.constant 0 : i32
    %c0_i32_1 = arith.constant 0 : i32
    return %arg0, %c0_i32, %c0_i32_0 : i32, i32, i32
  }
  func.func @transform_1(%arg0: i32) -> (i32, i32) {
    %c0_i32 = arith.constant 0 : i32
    %c0_i32_0 = arith.constant 0 : i32
    %c0_i32_1 = arith.constant 0 : i32
    return %c0_i32, %c0_i32_0 : i32, i32
  }
  func.func @transform_2(%arg0: i32) -> (i32, i32) {
    %c0_i32 = arith.constant 0 : i32
    %c0_i32_0 = arith.constant 0 : i32
    %c0_i32_1 = arith.constant 0 : i32
    return %c0_i32, %c0_i32_0 : i32, i32
  }
  func.func @transform_3(%arg0: i32) -> (i32, i32, i32) {
    %c0_i32 = arith.constant 0 : i32
    %c0_i32_0 = arith.constant 0 : i32
    %c0_i32_1 = arith.constant 0 : i32
    %c0_i32_2 = arith.constant 0 : i32
    return %c0_i32, %c0_i32_0, %c0_i32_1 : i32, i32, i32
  }
  func.func @transform_4(%arg0: i32) -> (i32, i32) {
    %c0_i32 = arith.constant 0 : i32
    %c0_i32_0 = arith.constant 0 : i32
    %c0_i32_1 = arith.constant 0 : i32
    return %c0_i32, %c0_i32_0 : i32, i32
  }
  func.func @transform_5(%arg0: i32) -> (i32, i32, i32) {
    %c0_i32 = arith.constant 0 : i32
    %c0_i32_0 = arith.constant 0 : i32
    %c0_i32_1 = arith.constant 0 : i32
    return %arg0, %c0_i32, %c0_i32_0 : i32, i32, i32
  }
}

module attributes {stable_mosaic.version = 11 : i64} {
  func.func @mlp_kernel(%arg0: i32, %arg1: memref<2x8192xbf16, #tpu.memory_space<vmem>>, %arg2: memref<8192x64xbf16, #tpu.memory_space<vmem>>, %arg3: memref<1x64xf32, #tpu.memory_space<vmem>>, %arg4: memref<64x10xbf16, #tpu.memory_space<vmem>>, %arg5: memref<1x10xf32, #tpu.memory_space<vmem>>, %arg6: memref<2x10xf32, #tpu.memory_space<vmem>>) attributes {dimension_semantics = [#tpu.dimension_semantics<arbitrary>], iteration_bounds = array<i64: 1>, scalar_prefetch = 0 : i64, scratch_operands = 0 : i64, tpu.core_type = #tpu.core_type<tc>, window_params = [{pipeline_mode = #tpu.pipeline_mode<synchronous>, transform_indices = @transform_0, window_bounds = array<i64: 2, 8192>}, {pipeline_mode = #tpu.pipeline_mode<synchronous>, transform_indices = @transform_1, window_bounds = array<i64: 8192, 64>}, {pipeline_mode = #tpu.pipeline_mode<synchronous>, transform_indices = @transform_2, window_bounds = array<i64: 1, 64>}, {pipeline_mode = #tpu.pipeline_mode<synchronous>, transform_indices = @transform_3, window_bounds = array<i64: 64, 10>}, {pipeline_mode = #tpu.pipeline_mode<synchronous>, transform_indices = @transform_4, window_bounds = array<i64: 1, 10>}, {pipeline_mode = #tpu.pipeline_mode<synchronous>, transform_indices = @transform_5, window_bounds = array<i64: 2, 10>}]} {
    %c0 = arith.constant 0 : index
    %c0_0 = arith.constant 0 : index
    %0 = vector.load %arg1[%c0, %c0_0] : memref<2x8192xbf16, #tpu.memory_space<vmem>>, vector<2x8192xbf16>
    %c0_1 = arith.constant 0 : index
    %c0_2 = arith.constant 0 : index
    %1 = vector.load %arg2[%c0_1, %c0_2] : memref<8192x64xbf16, #tpu.memory_space<vmem>>, vector<8192x64xbf16>
    %cst = arith.constant dense<0.000000e+00> : vector<2x64xf32>
    %2 = tpu.matmul %0, %1, %cst {dimension_numbers = #tpu.dot_dimension_numbers<[1], [0], [0], [1], [0, 0, 1, 1], [], []>} : vector<2x8192xbf16>, vector<8192x64xbf16>, vector<2x64xf32> -> vector<2x64xf32>
    %c0_3 = arith.constant 0 : index
    %c0_4 = arith.constant 0 : index
    %3 = vector.load %arg3[%c0_3, %c0_4] : memref<1x64xf32, #tpu.memory_space<vmem>>, vector<1x64xf32>
    %4 = vector.broadcast %3 : vector<1x64xf32> to vector<2x64xf32>
    %5 = arith.addf %2, %4 : vector<2x64xf32>
    %cst_5 = arith.constant 0.000000e+00 : f32
    %6 = vector.broadcast %cst_5 : f32 to vector<2x64xf32>
    %7 = arith.maximumf %5, %6 : vector<2x64xf32>
    %8 = arith.truncf %7 : vector<2x64xf32> to vector<2x64xbf16>
    %c0_6 = arith.constant 0 : index
    %c0_7 = arith.constant 0 : index
    %9 = vector.load %arg4[%c0_6, %c0_7] : memref<64x10xbf16, #tpu.memory_space<vmem>>, vector<64x10xbf16>
    %cst_8 = arith.constant dense<0.000000e+00> : vector<2x10xf32>
    %10 = tpu.matmul %8, %9, %cst_8 {dimension_numbers = #tpu.dot_dimension_numbers<[1], [0], [0], [1], [0, 0, 1, 1], [], []>} : vector<2x64xbf16>, vector<64x10xbf16>, vector<2x10xf32> -> vector<2x10xf32>
    %c0_9 = arith.constant 0 : index
    %c0_10 = arith.constant 0 : index
    %11 = vector.load %arg5[%c0_9, %c0_10] : memref<1x10xf32, #tpu.memory_space<vmem>>, vector<1x10xf32>
    %12 = vector.broadcast %11 : vector<1x10xf32> to vector<2x10xf32>
    %13 = arith.addf %10, %12 : vector<2x10xf32>
    %c0_11 = arith.constant 0 : index
    %c0_12 = arith.constant 0 : index
    %14 = vector.load %arg6[%c0_11, %c0_12] : memref<2x10xf32, #tpu.memory_space<vmem>>, vector<2x10xf32>
    tpu.vector_store %arg6[%c0_11, %c0_12], %13 {strides = array<i32>} : memref<2x10xf32, #tpu.memory_space<vmem>>, vector<2x10xf32>,
    return
  }
  func.func @transform_0(%arg0: i32) -> (i32, i32) {
    %c0_i32 = arith.constant 0 : i32
    %c0_i32_0 = arith.constant 0 : i32
    %c0_i32_1 = arith.constant 0 : i32
    return %c0_i32, %c0_i32_0 : i32, i32
  }
  func.func @transform_1(%arg0: i32) -> (i32, i32) {
    %c0_i32 = arith.constant 0 : i32
    %c0_i32_0 = arith.constant 0 : i32
    %c0_i32_1 = arith.constant 0 : i32
    return %c0_i32, %c0_i32_0 : i32, i32
  }
  func.func @transform_2(%arg0: i32) -> (i32, i32) {
    %c0_i32 = arith.constant 0 : i32
    %c0_i32_0 = arith.constant 0 : i32
    %c0_i32_1 = arith.constant 0 : i32
    return %c0_i32, %c0_i32_0 : i32, i32
  }
  func.func @transform_3(%arg0: i32) -> (i32, i32) {
    %c0_i32 = arith.constant 0 : i32
    %c0_i32_0 = arith.constant 0 : i32
    %c0_i32_1 = arith.constant 0 : i32
    return %c0_i32, %c0_i32_0 : i32, i32
  }
  func.func @transform_4(%arg0: i32) -> (i32, i32) {
    %c0_i32 = arith.constant 0 : i32
    %c0_i32_0 = arith.constant 0 : i32
    %c0_i32_1 = arith.constant 0 : i32
    return %c0_i32, %c0_i32_0 : i32, i32
  }
  func.func @transform_5(%arg0: i32) -> (i32, i32) {
    %c0_i32 = arith.constant 0 : i32
    %c0_i32_0 = arith.constant 0 : i32
    %c0_i32_1 = arith.constant 0 : i32
    return %c0_i32, %c0_i32_0 : i32, i32
  }
}

</mosaic_0001>

<bundles_post_ra>
// kernel: simple_cnn_forward.2
= control target key start
LH: loop header
LB: loop body
LE: loop exit
PB: predicated region body
PF: predicated region fallthrough
CT: control target
= control target key end

     0   :  { %s6036_s18 = smov 0   ;;  %s7812_s0 = inlined_call_operand.vmem [shape: bf16[2,27,4096], index: 0, kind: input, shape index: {}]   ;;  %s7813_s1 = inlined_call_operand.vmem [shape: bf16[16,27], index: 1, kind: input, shape index: {}]   ;;  %s7814_s2 = inlined_call_operand.vmem [shape: f32[16,1], index: 2, kind: input, shape index: {}]   ;;  %s7815_s3 = inlined_call_operand.vmem [shape: bf16[9,32,16], index: 3, kind: input, shape index: {}]   ;;  %s7816_s4 = inlined_call_operand.vmem [shape: f32[32,1], index: 4, kind: input, shape index: {}]   ;;  %s7817_s5 = inlined_call_operand.vmem [shape: bf16[2,32,1024], index: 5, kind: output, shape index: {}]  }
   0x1 LB: > { %s5285_s19 = sadd.s32 4294967295, %s5994_s18   ;;  %p5289_p0 = scmp.ge.s32.totalorder %s5994_s18, 1  ;;  %s5994_s18 = sphi %s6036_s18, %s15_s18  }
   0x2   : > { %p187_p1 = scmp.lt.s32.totalorder %s5994_s18, 3 }
   0x4   : > { %p188_p2 = pnand %p5289_p0, %p187_p1 }
   0x6   : > { %191 = sbr.rel (%p188_p2) target bundleno = 1378 (0x562), region = 40 }
   0xd   : > { %p215_p3 = scmp.lt.s32.totalorder %s5285_s19, 1  ;;  %vm712_vm0 = vcmask 1044480   ;;  %v7818_v0 = vmov 0   ;;  %v335_v1 = vld [vmem:[%s7814_s2] sm:$0xff]  ;;  %vm713_vm1 = vcmask 1045504   ;;  %v5997_v2 = vmov 65535  }
   0xe   : > { %844 = vmatprep.mubr.bf16.mxu0 %v7818_v0  ;;  %887 = vmatprep.mubr.bf16.mxu1 %v7818_v0  ;;  %v714_v3 = vsel %vm712_vm0, 4294967295, %v5997_v2  ;;  %v336_v4 = vld [vmem:[%s7814_s2 + $0x8] sm:$0xff]  ;;  %v228_v14 = vlaneseq  ;;  %v6090_v39 = vld [vmem:[%s7813_s1] sm:$0xff]   ;;  %vm708_vm2 = vcmask 220160   ;;  %s5998_s30 = smov 95   ;;  %s5999_s6 = smov 32  }
   0xf   : > { %s7953_s19 = smov (!%p215_p3, %s5285_s19), 1  ;;  %5807 = vset.pattern.permute.xlu0 %v7818_v0  ;;  %5808 = vset.pattern.permute.xlu1 %v7818_v0  ;;  %v6068_v13 = vsel %vm713_vm1, %v714_v3, 0  ;;  %s6000_s7 = smov 97  }
  0x10   : > { %407 = vperm.xlu0 %5807, %v335_v1   ;;  %s5515_s22 = sshll.u32 %s7953_s19, 9  ;;  %v6085_v38 = vand.u32 127, %v228_v14  ;;  %s6001_s8 = smov 33  }
  0x11   : > { %s6060_s27 = scalar_lea.vmem %s7812_s0, %s5515_s22  ;;  %s6002_s9 = smov 127  }
  0x12   : > { %v341_v5 = vld [vmem:[%s6060_s27] sm:$0xff]  ;;  %v342_v7 = vld [vmem:[%s6060_s27 + $0x8] sm:$0xff]  ;;  %v343_v21 = vld [vmem:[%s6060_s27 + $0x10] sm:$0xff]  ;;  %v6100_v52 = vadd.s32 128, %v6085_v38  ;;  %v6108_v56 = vadd.s32 256, %v6085_v38  ;;  %v6111_v57 = vadd.s32 384, %v6085_v38 }
  0x13   : > { %v357_v6 = vld [vmem:[%s6060_s27 + $0x80] sm:$0xff]  ;;  %v358_v9 = vld [vmem:[%s6060_s27 + $0x88] sm:$0xff]  ;;  %v359_v24 = vld [vmem:[%s6060_s27 + $0x90] sm:$0xff]  ;;  %v241_v1 = vand.u32 31, %v6085_v38  ;;  %s6003_s10 = smov 31   ;;  %s6004_s17 = smov 1  }
  0x14   : > { %v5296_v8 = vcombine.high %v341_v5, %v357_v6  ;;  %v5295_v10 = vcombine.low %v341_v5, %v357_v6  ;;  %v373_v11 = vld [vmem:[%s6060_s27 + $0x100] sm:$0xff]  ;;  %412 = vperm.xlu0 %5807, %v336_v4   ;;  %v5298_v15 = vcombine.high %v342_v7, %v358_v9  ;;  %v5297_v16 = vcombine.low %v342_v7, %v358_v9  ;;  %v374_v18 = vld [vmem:[%s6060_s27 + $0x108] sm:$0xff]  ;;  %v344_v25 = vld [vmem:[%s6060_s27 + $0x18] sm:$0xff]  ;;  %s6005_s13 = smov 96  }
  0x15   : > { %v389_v12 = vld [vmem:[%s6060_s27 + $0x180] sm:$0x33]  ;;  %v390_v19 = vld [vmem:[%s6060_s27 + $0x188] sm:$0x33]  ;;  %v360_v26 = vld [vmem:[%s6060_s27 + $0x98] sm:$0xff]  ;;  %v5300_v34 = vcombine.high %v343_v21, %v359_v24  ;;  %v5299_v41 = vcombine.low %v343_v21, %v359_v24  ;;  %v248_v2 = vand.u32 31, %v6100_v52 }
  0x16   : > { %v5328_v17 = vcombine.high %v373_v11, %v389_v12  ;;  %v5327_v20 = vcombine.low %v373_v11, %v389_v12  ;;  %812 = vmatprep.subr.bf16.mxu0 %v5296_v8  ;;  %v5330_v22 = vcombine.high %v374_v18, %v390_v19  ;;  %v5329_v23 = vcombine.low %v374_v18, %v390_v19  ;;  %v375_v29 = vld [vmem:[%s6060_s27 + $0x110] sm:$0xff]  ;;  %v376_v31 = vld [vmem:[%s6060_s27 + $0x118] sm:$0xff]  ;;  %v345_v46 = vld [vmem:[%s6060_s27 + $0x20] sm:$0xff] }
  0x17   : > { %855 = vmatprep.subr.bf16.mxu1 %v5298_v15  ;;  %813 = vmatpush1.bf16.msra.mxu0 %v5295_v10  ;;  %v391_v30 = vld [vmem:[%s6060_s27 + $0x190] sm:$0x33]  ;;  %v392_v35 = vld [vmem:[%s6060_s27 + $0x198] sm:$0x33]  ;;  %v5302_v36 = vcombine.high %v344_v25, %v360_v26  ;;  %v5301_v43 = vcombine.low %v344_v25, %v360_v26  ;;  %v361_v47 = vld [vmem:[%s6060_s27 + $0xa0] sm:$0xff]  ;;  %v255_v3 = vand.u32 31, %v6108_v56 }
  0x18   : > { %v720_v27 = vand.u32 %v5328_v17, %v6068_v13  ;;  %v717_v28 = vand.u32 %v5327_v20, %v6068_v13  ;;  %856 = vmatpush1.bf16.msra.mxu1 %v5297_v16  ;;  %v726_v32 = vand.u32 %v5330_v22, %v6068_v13  ;;  %v723_v33 = vand.u32 %v5329_v23, %v6068_v13  ;;  %v346_v49 = vld [vmem:[%s6060_s27 + $0x28] sm:$0xff]  ;;  %v377_v50 = vld [vmem:[%s6060_s27 + $0x120] sm:$0xff]  ;;  %v347_v12 = vld [vmem:[%s6060_s27 + $0x30] sm:$0xff] }
  0x19   : > { %v5332_v37 = vcombine.high %v375_v29, %v391_v30  ;;  %v5334_v40 = vcombine.high %v376_v31, %v392_v35  ;;  %v5331_v42 = vcombine.low %v375_v29, %v391_v30  ;;  %v5333_v45 = vcombine.low %v376_v31, %v392_v35  ;;  %v393_v51 = vld [vmem:[%s6060_s27 + $0x1a0] sm:$0x33]  ;;  %v362_v53 = vld [vmem:[%s6060_s27 + $0xa8] sm:$0xff]  ;;  %v363_v15 = vld [vmem:[%s6060_s27 + $0xb0] sm:$0xff] }
  0x1a   : > { %814 = vmatprep.subr.bf16.mxu0 %v720_v27  ;;  %857 = vmatprep.subr.bf16.mxu1 %v726_v32  ;;  %v378_v54 = vld [vmem:[%s6060_s27 + $0x128] sm:$0xff]  ;;  %v5304_v60 = vcombine.high %v345_v46, %v361_v47  ;;  %v5336_v61 = vcombine.high %v377_v50, %v393_v51  ;;  %v5306_v62 = vcombine.high %v346_v49, %v362_v53  ;;  %v262_v4 = vand.u32 31, %v6111_v57  ;;  %v348_v16 = vld [vmem:[%s6060_s27 + $0x38] sm:$0xff]  ;;  %v379_v20 = vld [vmem:[%s6060_s27 + $0x130] sm:$0xff] }
  0x1b   : > { %815 = vmatpush1.bf16.msra.mxu0 %v717_v28  ;;  %v732_v44 = vand.u32 %v5332_v37, %v6068_v13  ;;  %v738_v48 = vand.u32 %v5334_v40, %v6068_v13  ;;  %v394_v55 = vld [vmem:[%s6060_s27 + $0x1a8] sm:$0x33]  ;;  %v729_v58 = vand.u32 %v5331_v42, %v6068_v13  ;;  %v735_v59 = vand.u32 %v5333_v45, %v6068_v13  ;;  %v364_v19 = vld [vmem:[%s6060_s27 + $0xb8] sm:$0xff]  ;;  %v6197_v45 = vld [vmem:[%s6060_s27 + $0xc0] sm:$0xff] }
  0x1c   : > { %858 = vmatpush1.bf16.msra.mxu1 %v723_v33  ;;  %898 = vmatprep.subr.bf16.mxu0 %v5300_v34  ;;  %v5338_v63 = vcombine.high %v378_v54, %v394_v55  ;;  %v6124_v5 = vadd.s32 512, %v6085_v38  ;;  %v5303_v6 = vcombine.low %v345_v46, %v361_v47  ;;  %v5335_v7 = vcombine.low %v377_v50, %v393_v51  ;;  %v380_v23 = vld [vmem:[%s6060_s27 + $0x138] sm:$0xff]  ;;  %v6200_v46 = vld [vmem:[%s6060_s27 + $0x140] sm:$0xff]  ;;  %v6207_v50 = vld [vmem:[%s6060_s27 + $0x48] sm:$0xff] }
  0x1d   : > { %941 = vmatprep.subr.bf16.mxu1 %v5302_v36  ;;  %v1653_v8 = vshrl.u32 %v228_v14, 7  ;;  %v5305_v9 = vcombine.low %v346_v49, %v362_v53  ;;  %v744_v10 = vand.u32 %v5336_v61, %v6068_v13  ;;  %v5337_v11 = vcombine.low %v378_v54, %v394_v55  ;;  %v395_v14 = vld [vmem:[%s6060_s27 + $0x1b0] sm:$0x33]  ;;  %v396_v24 = vld [vmem:[%s6060_s27 + $0x1b8] sm:$0x33]  ;;  %v366_v51 = vld [vmem:[%s6060_s27 + $0xc8] sm:$0xff] }
  0x1e   : > { %5359 = vmatmul.mubr.msk.bf16.vlgmr.msra.gmra.mrb[0].mxu0 %vm708_vm2, %v6090_v39  ;;  %v6132_v17 = vadd.s32 640, %v6085_v38  ;;  %v750_v18 = vand.u32 %v5338_v63, %v6068_v13  ;;  %vm6140_vm3 = vcmp.ge.s32.totalorder %v241_v1, 1  ;;  %vm6146_vm4 = vcmp.ge.s32.totalorder %v248_v2, 1  ;;  %v6203_v47 = vld [vmem:[%s6060_s27 + $0x1c0] sm:$0x33]  ;;  %v6211_v53 = vld [vmem:[%s6060_s27 + $0x148] sm:$0xff] }
  0x1f   : > { %5360 = vmatmul.mubr.msk.bf16.vlgmr.msra.gmra.mrb[0].mxu1 %vm708_vm2, %v6090_v39  ;;  %899 = vmatpush1.bf16.msra.mxu0 %v5299_v41  ;;  %vm6156_vm5 = vcmp.ge.s32.totalorder %v255_v3, 1  ;;  %vm6162_vm6 = vcmp.ge.s32.totalorder %v262_v4, 1  ;;  %v269_v27 = vand.u32 31, %v6124_v5  ;;  %v741_v28 = vand.u32 %v5335_v7, %v6068_v13  ;;  %vm1644_vm7 = vmpackc.low %vm6146_vm4, %vm6140_vm3  ;;  %v6214_v54 = vld [vmem:[%s6060_s27 + $0x1c8] sm:$0x33]  ;;  %v352_v26 = vld [vmem:[%s6060_s27 + $0x58] sm:$0xff] }
  0x20   : > { %942 = vmatpush1.bf16.msra.mxu1 %v5301_v43  ;;  %900 = vmatprep.subr.bf16.mxu0 %v732_v44  ;;  %v747_v29 = vand.u32 %v5337_v11, %v6068_v13  ;;  %v5308_v30 = vcombine.high %v347_v12, %v363_v15  ;;  %v5340_v31 = vcombine.high %v379_v20, %v395_v14  ;;  %v276_v32 = vand.u32 31, %v6132_v17  ;;  %vm1645_vm8 = vmpackc.low %vm6162_vm6, %vm6156_vm5  ;;  %v6194_v44 = vld [vmem:[%s6060_s27 + $0x40] sm:$0xff] }
  0x21   : > { %943 = vmatprep.subr.bf16.mxu1 %v738_v48  ;;  %930 = vmatprep.mubr.bf16.mxu0 %v7818_v0  ;;  %v5310_v33 = vcombine.high %v348_v16, %v364_v19  ;;  %v5342_v34 = vcombine.high %v380_v23, %v396_v24  ;;  %v6177_v35 = vsub.s32 0, %v1653_v8  ;;  %v6183_v36 = vsub.s32 4, %v1653_v8 }
  0x22   : > { %973 = vmatprep.mubr.bf16.mxu1 %v7818_v0  ;;  %v1648_v37 = vsel %vm1644_vm7, 65537, %v7818_v0  ;;  %vm6189_vm9 = vcmp.ge.s32.totalorder %v269_v27, 1  ;;  %v5307_v41 = vcombine.low %v347_v12, %v363_v15  ;;  %v5309_v42 = vcombine.low %v348_v16, %v364_v19  ;;  %v6271_v19 = vld [vmem:[%s6060_s27 + $0x50] sm:$0xff] }
  0x23   : > { %901 = vmatpush1.bf16.msra.mxu0 %v729_v58  ;;  %v5339_v43 = vcombine.low %v379_v20, %v395_v14  ;;  %v756_v48 = vand.u32 %v5340_v31, %v6068_v13  ;;  %v5341_v49 = vcombine.low %v380_v23, %v396_v24  ;;  %v1649_v55 = vsel %vm1645_vm8, 65537, %v7818_v0  ;;  %v6274_v20 = vld [vmem:[%s6060_s27 + $0xd0] sm:$0xff] }
  0x24   : > { %944 = vmatpush1.bf16.msra.mxu1 %v735_v59  ;;  %984 = vmatprep.subr.bf16.mxu0 %v5304_v60  ;;  %vm6224_vm10 = vcmp.ge.s32.totalorder %v276_v32, 1  ;;  %v762_v59 = vand.u32 %v5342_v34, %v6068_v13  ;;  %v6232_v60 = vrot.slane %v1648_v37, %v6177_v35  ;;  %v5344_v7 = vcombine.high %v6200_v46, %v6203_v47  ;;  %v6277_v14 = vld [vmem:[%s6060_s27 + $0x1d0] sm:$0x33] }
  0x25   : > { %1027 = vmatprep.subr.bf16.mxu1 %v5306_v62  ;;  %v753_v61 = vand.u32 %v5339_v43, %v6068_v13  ;;  %v6238_v62 = vrot.slane %v1649_v55, %v6177_v35  ;;  %v759_v63 = vand.u32 %v5341_v49, %v6068_v13  ;;  %vm1646_vm11 = vmpackc.low %vm6224_vm10, %vm6189_vm9  ;;  %v6250_v8 = vadd.s32 768, %v6085_v38 }
  0x26   : > { %5361 = vmatmul.mubr.msk.bf16.vlgmr.msra.gmra.mrb[4].mxu0 %vm708_vm2, %v6090_v39  ;;  %7882 = vst [vmem:[#allocation2_spill] sm:$0xff] %v6232_v60  ;;  %v6257_v11 = vadd.s32 896, %v6085_v38  ;;  %1684 = vrot.lane.b32.xlu1 %v6232_v60, %s5998_s30  ;;  %v6263_v12 = vrot.slane %v1648_v37, %v6183_v36  ;;  %v5311_v16 = vcombine.low %v6194_v44, %v6197_v45  ;;  %v1650_v21 = vsel %vm1646_vm11, 65537, %v7818_v0 }
  0x27   : > { %5362 = vmatmul.mubr.msk.bf16.vlgmr.msra.gmra.mrb[4].mxu1 %vm708_vm2, %v6090_v39  ;;  %985 = vmatpush1.bf16.msra.mxu0 %v5303_v6  ;;  %7883 = vst [vmem:[#allocation3_spill] sm:$0xff] %v6238_v62  ;;  %v5312_v6 = vcombine.high %v6194_v44, %v6197_v45  ;;  %v7821_v15 = vand.u32 31, %v6250_v8  ;;  %v5313_v23 = vcombine.low %v6207_v50, %v366_v51  ;;  %vm6341_vm15 = vcmp.le.s32.totalorder %v241_v1, 30 }
  0x28   : > { %1028 = vmatpush1.bf16.msra.mxu1 %v5305_v9  ;;  %986 = vmatprep.subr.bf16.mxu0 %v744_v10  ;;  %v5314_v9 = vcombine.high %v6207_v50, %v366_v51  ;;  %v5346_v10 = vcombine.high %v6211_v53, %v6214_v54  ;;  %7884 = vst [vmem:[#allocation4_spill] sm:$0xff] %v6263_v12  ;;  %v7820_v22 = vand.u32 31, %v6257_v11  ;;  %vm6347_vm0 = vcmp.le.s32.totalorder %v248_v2, 30 }
  0x29   : > { %1029 = vmatprep.subr.bf16.mxu1 %v750_v18  ;;  %1016 = vmatprep.mubr.bf16.mxu0 %v7818_v0  ;;  %v5343_v18 = vcombine.low %v6200_v46, %v6203_v47  ;;  %v768_v24 = vand.u32 %v5344_v7, %v6068_v13  ;;  %v5345_v25 = vcombine.low %v6211_v53, %v6214_v54  ;;  %vm1626_vm12 = vcmp.ge.s32.totalorder %v7821_v15, 1  ;;  %v353_v54 = vld [vmem:[%s6060_s27 + $0x60] sm:$0xff]  ;;  %vm2301_vm1 = vmpackc.low %vm6347_vm0, %vm6341_vm15 }
  0x2a   : > { %1059 = vmatprep.mubr.bf16.mxu1 %v7818_v0  ;;  %1688 = vrot.lane.b32.xlu0 %v6238_v62, %s5998_s30  ;;  %v774_v31 = vand.u32 %v5346_v10, %v6068_v13  ;;  %vm1627_vm13 = vcmp.ge.s32.totalorder %v7820_v22, 1  ;;  %v6307_v34 = vrot.slane %v1650_v21, %v6177_v35  ;;  %v6313_v40 = vrot.slane %v1649_v55, %v6183_v36  ;;  %v369_v55 = vld [vmem:[%s6060_s27 + $0xe0] sm:$0xff]  ;;  %v386_v10 = vld [vmem:[%s6060_s27 + $0x168] sm:$0xff] }
  0x2b   : > { %987 = vmatpush1.bf16.msra.mxu0 %v741_v28  ;;  %v368_v28 = vld [vmem:[%s6060_s27 + $0xd8] sm:$0xff]  ;;  %1686 = vrot.lane.b32.xlu1 %v6263_v12, %s5998_s30  ;;  %vm1647_vm14 = vmpackc.low %vm1627_vm13, %vm1626_vm12  ;;  %v765_v37 = vand.u32 %v5343_v18, %v6068_v13  ;;  %v5316_v43 = vcombine.high %v6271_v19, %v6274_v20  ;;  %v6359_v38 = vrot.slane %v1650_v21, %v6183_v36  ;;  %vm6372_vm3 = vcmp.le.s32.totalorder %v255_v3, 30 }
  0x2c   : > { %1030 = vmatpush1.bf16.msra.mxu1 %v747_v29  ;;  %1070 = vmatprep.subr.bf16.mxu0 %v5308_v30  ;;  %v383_v29 = vld [vmem:[%s6060_s27 + $0x150] sm:$0xff]  ;;  %v400_v30 = vld [vmem:[%s6060_s27 + $0x1d8] sm:$0x33]  ;;  %7885 = vst [vmem:[#allocation5_spill] sm:$0xff] %v6307_v34  ;;  %7886 = vst [vmem:[#allocation6_spill] sm:$0xff] %v6313_v40  ;;  %v5318_v45 = vcombine.high %v352_v26, %v368_v28  ;;  %v5317_v50 = vcombine.low %v352_v26, %v368_v28  ;;  %vm6378_vm4 = vcmp.le.s32.totalorder %v262_v4, 30 }
  0x2d   : > { %1113 = vmatprep.subr.bf16.mxu1 %v5310_v33  ;;  %v384_v33 = vld [vmem:[%s6060_s27 + $0x158] sm:$0xff]  ;;  %v5348_v44 = vcombine.high %v383_v29, %v6277_v14  ;;  %v5347_v49 = vcombine.low %v383_v29, %v6277_v14  ;;  %7892 = vst [vmem:[#allocation8_spill] sm:$0xff] %v6359_v38  ;;  %v5320_v2 = vcombine.high %v353_v54, %v369_v55  ;;  %v2305_v57 = vsel %vm2301_vm1, 65537, %v7818_v0  ;;  %v355_v26 = vld [vmem:[%s6060_s27 + $0x70] sm:$0xff]  ;;  %vm2302_vm5 = vmpackc.low %vm6378_vm4, %vm6372_vm3 }
  0x2e   : > { %5363 = vmatmul.mubr.msk.bf16.vlgmr.msra.gmra.mrb[8].mxu0 %vm708_vm2, %v6090_v39  ;;  %v5350_v46 = vcombine.high %v384_v33, %v400_v30  ;;  %1692 = vrot.lane.b32.xlu0 %v6307_v34, %s5998_s30  ;;  %v5349_v53 = vcombine.low %v384_v33, %v400_v30  ;;  %v5319_v56 = vcombine.low %v353_v54, %v369_v55  ;;  %v371_v28 = vld [vmem:[%s6060_s27 + $0xf0] sm:$0xff]  ;;  %v356_v30 = vld [vmem:[%s6060_s27 + $0x78] sm:$0xff]  ;;  %vm2282_vm6 = vcmp.le.s32.totalorder %v276_v32, 30 }
  0x2f   : > { %5364 = vmatmul.mubr.msk.bf16.vlgmr.msra.gmra.mrb[8].mxu1 %vm708_vm2, %v6090_v39  ;;  %1071 = vmatpush1.bf16.msra.mxu0 %v5307_v41  ;;  %v1651_v41 = vsel %vm1647_vm14, 65537, %v7818_v0  ;;  %v780_v51 = vand.u32 %v5348_v44, %v6068_v13  ;;  %v777_v52 = vand.u32 %v5347_v49, %v6068_v13  ;;  %v403_v33 = vld [vmem:[%s6060_s27 + $0x1f0] sm:$0x33]  ;;  %v5324_v49 = vcombine.high %v355_v26, %v371_v28 }
  0x30   : > { %1114 = vmatpush1.bf16.msra.mxu1 %v5309_v42  ;;  %1072 = vmatprep.subr.bf16.mxu0 %v756_v48  ;;  %v771_v42 = vand.u32 %v5345_v25, %v6068_v13  ;;  %v6325_v47 = vrot.slane %v1651_v41, %v6177_v35  ;;  %v5315_v48 = vcombine.low %v6271_v19, %v6274_v20  ;;  %vm1700_vm11 = vcmask 777216  }
  0x31   : > { %1115 = vmatprep.subr.bf16.mxu1 %v762_v59  ;;  %1102 = vmatprep.mubr.bf16.mxu0 %v7818_v0  ;;  %v786_v58 = vand.u32 %v5350_v46, %v6068_v13  ;;  %v354_v59 = vld [vmem:[%s6060_s27 + $0x68] sm:$0xff]  ;;  %v783_v1 = vand.u32 %v5349_v53, %v6068_v13  ;;  %v2306_v46 = vsel %vm2302_vm5, 65537, %v7818_v0  ;;  %v5323_v55 = vcombine.low %v355_v26, %v371_v28 }
  0x32   : > { %1145 = vmatprep.mubr.bf16.mxu1 %v7818_v0  ;;  %7887 = vst [vmem:[#allocation7_spill] sm:$0xff] %v6325_v47  ;;  %1690 = vrot.lane.b32.xlu1 %v6313_v40, %s5998_s30  ;;  %v6430_v54 = vrot.slane %v2306_v46, %v6183_v36  ;;  %v6441_v7 = vrot.slane %v2306_v46, %v6177_v35  ;;  %vm2357_vm4 = vcmask 793600  }
  0x33   : > { %1073 = vmatpush1.bf16.msra.mxu0 %v753_v61  ;;  %v385_v61 = vld [vmem:[%s6060_s27 + $0x160] sm:$0xff]  ;;  %1696 = vrot.lane.b32.xlu0 %v6325_v47, %s5998_s30 }
  0x34   : > { %1116 = vmatpush1.bf16.msra.mxu1 %v759_v63  ;;  %1156 = vmatprep.subr.bf16.mxu0 %v5312_v6  ;;  %v401_v63 = vld [vmem:[%s6060_s27 + $0x1e0] sm:$0x33]  ;;  %7900 = vst [vmem:[#allocation12_spill] sm:$0xff] %v6430_v54  ;;  %7901 = vst [vmem:[#allocation13_spill] sm:$0xff] %v6441_v7 }
  0x35   : > { %1199 = vmatprep.subr.bf16.mxu1 %v5314_v9  ;;  %v370_v9 = vld [vmem:[%s6060_s27 + $0xe8] sm:$0xff]  ;;  %v5352_v18 = vcombine.high %v385_v61, %v401_v63  ;;  %v5351_v3 = vcombine.low %v385_v61, %v401_v63 }
  0x36   : > { %5365 = vmatmul.mubr.msk.bf16.vlgmr.msra.gmra.mrb[12].mxu0 %vm708_vm2, %v6090_v39  ;;  %v5322_v19 = vcombine.high %v354_v59, %v370_v9  ;;  %1694 = vrot.lane.b32.xlu1 %v6359_v38, %s5998_s30  ;;  %v5321_v4 = vcombine.low %v354_v59, %v370_v9 }
  0x37   : > { %5366 = vmatmul.mubr.msk.bf16.vlgmr.msra.gmra.mrb[12].mxu1 %vm708_vm2, %v6090_v39  ;;  %1157 = vmatpush1.bf16.msra.mxu0 %v5311_v16  ;;  %v402_v16 = vld [vmem:[%s6060_s27 + $0x1e8] sm:$0x33]  ;;  %v789_v44 = vand.u32 %v5351_v3, %v6068_v13 }
  0x38   : > { %1200 = vmatpush1.bf16.msra.mxu1 %v5313_v23  ;;  %1158 = vmatprep.subr.bf16.mxu0 %v768_v24  ;;  %v5354_v20 = vcombine.high %v386_v10, %v402_v16  ;;  %v6386_v23 = vrot.slane %v1651_v41, %v6183_v36  ;;  %v792_v24 = vand.u32 %v5352_v18, %v6068_v13  ;;  %v388_v41 = vld [vmem:[%s6060_s27 + $0x178] sm:$0xff] }
  0x39   : > { %1201 = vmatprep.subr.bf16.mxu1 %v774_v31  ;;  %1188 = vmatprep.mubr.bf16.mxu0 %v7818_v0  ;;  %v5353_v25 = vcombine.low %v386_v10, %v402_v16  ;;  %v387_v31 = vld [vmem:[%s6060_s27 + $0x170] sm:$0xff] }
  0x3a   : > { %1231 = vmatprep.mubr.bf16.mxu1 %v7818_v0  ;;  %7897 = vst [vmem:[#allocation9_spill] sm:$0xff] %v6386_v23  ;;  %1752 = vrot.lane.b32.xlu0 %v7818_v0, %s5999_s6  ;;  %v798_v29 = vand.u32 %v5354_v20, %v6068_v13 }
  0x3b   : > { %1159 = vmatpush1.bf16.msra.mxu0 %v765_v37  ;;  %v372_v37 = vld [vmem:[%s6060_s27 + $0xf8] sm:$0xff]  ;;  %1698 = vrot.lane.b32.xlu1 %v6386_v23, %s5998_s30 }
  0x3c   : > { %1202 = vmatpush1.bf16.msra.mxu1 %v771_v42  ;;  %1242 = vmatprep.subr.bf16.mxu0 %v5316_v43  ;;  %v404_v42 = vld [vmem:[%s6060_s27 + $0x1f8] sm:$0x33]  ;;  %v6410_v43 = vrot.slane %v2305_v57, %v6183_v36  ;;  %v5325_v59 = vcombine.low %v356_v30, %v372_v37 }
  0x3d   : > { %1285 = vmatprep.subr.bf16.mxu1 %v5318_v45  ;;  %v6416_v45 = vrot.slane %v2305_v57, %v6177_v35  ;;  %v5358_v53 = vcombine.high %v388_v41, %v404_v42  ;;  %v5357_v63 = vcombine.low %v388_v41, %v404_v42 }
  0x3e   : > { %5367 = vmatmul.mubr.msk.bf16.vlgmr.msra.gmra.mrb[16].mxu0 %vm708_vm2, %v6090_v39  ;;  %7898 = vst [vmem:[#allocation10_spill] sm:$0xff] %v6410_v43  ;;  %2343 = vrot.lane.b32.xlu0 %v6410_v43, %s6000_s7 }
  0x3f   : > { %5368 = vmatmul.mubr.msk.bf16.vlgmr.msra.gmra.mrb[16].mxu1 %vm708_vm2, %v6090_v39  ;;  %1243 = vmatpush1.bf16.msra.mxu0 %v5315_v48  ;;  %7899 = vst [vmem:[#allocation11_spill] sm:$0xff] %v6416_v45  ;;  %v795_v48 = vand.u32 %v5353_v25, %v6068_v13  ;;  %v810_v6 = vand.u32 %v5358_v53, %v6068_v13 }
  0x40   : > { %1286 = vmatpush1.bf16.msra.mxu1 %v5317_v50  ;;  %1244 = vmatprep.subr.bf16.mxu0 %v780_v51  ;;  %v5356_v50 = vcombine.high %v387_v31, %v403_v33  ;;  %v5326_v51 = vcombine.high %v356_v30, %v372_v37  ;;  %v807_v10 = vand.u32 %v5357_v63, %v6068_v13 }
  0x41   : > { %1287 = vmatprep.subr.bf16.mxu1 %v786_v58  ;;  %1274 = vmatprep.mubr.bf16.mxu0 %v7818_v0  ;;  %v5355_v58 = vcombine.low %v387_v31, %v403_v33 }
  0x42   : > { %1317 = vmatprep.mubr.bf16.mxu1 %v7818_v0  ;;  %2341 = vrot.lane.b32.xlu1 %v6416_v45, %s6000_s7  ;;  %v804_v61 = vand.u32 %v5356_v50, %v6068_v13 }
  0x43   : > { %1245 = vmatpush1.bf16.msra.mxu0 %v777_v52  ;;  %2347 = vrot.lane.b32.xlu0 %v6430_v54, %s6000_s7  ;;  %v801_v9 = vand.u32 %v5355_v58, %v6068_v13 }
  0x44   : > { %1288 = vmatpush1.bf16.msra.mxu1 %v783_v1  ;;  %1328 = vmatprep.subr.bf16.mxu0 %v5320_v2 }
  0x45   : > { %1371 = vmatprep.subr.bf16.mxu1 %v5322_v19 }
  0x46   : > { %5369 = vmatmul.mubr.msk.bf16.vlgmr.msra.gmra.mrb[20].mxu0 %vm708_vm2, %v6090_v39  ;;  %2345 = vrot.lane.b32.xlu1 %v6441_v7, %s6000_s7 }
  0x47   : > { %5370 = vmatmul.mubr.msk.bf16.vlgmr.msra.gmra.mrb[20].mxu1 %vm708_vm2, %v6090_v39  ;;  %1329 = vmatpush1.bf16.msra.mxu0 %v5319_v56 }
  0x48   : > { %1372 = vmatpush1.bf16.msra.mxu1 %v5321_v4  ;;  %1330 = vmatprep.subr.bf16.mxu0 %v792_v24 }
  0x49   : > { %1373 = vmatprep.subr.bf16.mxu1 %v798_v29  ;;  %1360 = vmatprep.mubr.bf16.mxu0 %v7818_v0 }
  0x4a   : > { %1403 = vmatprep.mubr.bf16.mxu1 %v7818_v0 }
  0x4b   : > { %1331 = vmatpush1.bf16.msra.mxu0 %v789_v44 }
  0x4c   : > { %1374 = vmatpush1.bf16.msra.mxu1 %v795_v48  ;;  %1414 = vmatprep.subr.bf16.mxu0 %v5324_v49 }
  0x4d   : > { %1457 = vmatprep.subr.bf16.mxu1 %v5326_v51 }
  0x4e   : > { %5371 = vmatmul.mubr.msk.bf16.vlgmr.msra.gmra.mrb[24].mxu0 %vm708_vm2, %v6090_v39 }
  0x4f   : > { %5372 = vmatmul.mubr.msk.bf16.vlgmr.msra.gmra.mrb[24].mxu1 %vm708_vm2, %v6090_v39  ;;  %1415 = vmatpush1.bf16.msra.mxu0 %v5323_v55 }
  0x50   : > { %1458 = vmatpush1.bf16.msra.mxu1 %v5325_v59  ;;  %1416 = vmatprep.subr.bf16.mxu0 %v804_v61 }
  0x51   : > { %1459 = vmatprep.subr.bf16.mxu1 %v810_v6  ;;  %1446 = vmatprep.mubr.bf16.mxu0 %v7818_v0 }
  0x52   : > { %1489 = vmatprep.mubr.bf16.mxu1 %v7818_v0 }
  0x53   : > { %1417 = vmatpush1.bf16.msra.mxu0 %v801_v9 }
  0x54   : > { %1460 = vmatpush1.bf16.msra.mxu1 %v807_v10 }
  0x56   : > { %5373 = vmatmul.mubr.msk.bf16.vlgmr.msra.gmra.mrb[28].mxu0 %vm708_vm2, %v6090_v39 }
  0x57   : > { %5374 = vmatmul.mubr.msk.bf16.vlgmr.msra.gmra.mrb[28].mxu1 %vm708_vm2, %v6090_v39  ;;  %1826 = vmatprep.mubr.bf16.mxu0 %v7818_v0  ;;  %vm2281_vm2 = vcmp.le.s32.totalorder %v269_v27, 30 }
  0x58   : > { %1879 = vmatprep.mubr.bf16.mxu1 %v7818_v0  ;;  %vm2303_vm7 = vmpackc.low %vm2282_vm6, %vm2281_vm2 }
  0x8f   : > { %v6457_v13 = vpop.permute.xlu0 %407 }
  0x93   : > { %v6459_v21 = vpop.permute.xlu0 %412 }
  0xf1   : > { %v846_v16 = vpop.f32.mrb[0].mxu0 }
  0xf2   : > { %v848_v52 = vpop.f32.mrb[1].mxu0  ;;  %v889_v1 = vpop.f32.mrb[0].mxu1  ;;  %v847_v24 = vadd.f32 %v846_v16, %v6457_v13 }
  0xf3   : > { %v850_v2 = vpop.f32.mrb[2].mxu0  ;;  %v891_v18 = vpop.f32.mrb[1].mxu1  ;;  %v849_v25 = vadd.f32 %v848_v52, %v6457_v13  ;;  %v890_v26 = vadd.f32 %v889_v1, %v6457_v13 }
  0xf4   : > { %v852_v19 = vpop.f32.mrb[3].mxu0  ;;  %v893_v20 = vpop.f32.mrb[2].mxu1  ;;  %v851_v28 = vadd.f32 %v850_v2, %v6459_v21  ;;  %v892_v31 = vadd.f32 %v891_v18, %v6457_v13  ;;  %v1500_v46 = vmax.f32 %v847_v24, 0.0 }
  0xf5   : > { %v895_v14 = vpop.f32.mrb[3].mxu1  ;;  %v853_v33 = vadd.f32 %v852_v19, %v6459_v21  ;;  %v894_v37 = vadd.f32 %v893_v20, %v6459_v21  ;;  %v1501_v48 = vmax.f32 %v849_v25, 0.0  ;;  %v1502_v49 = vmax.f32 %v890_v26, 0.0 }
  0xf6   : > { %v896_v41 = vadd.f32 %v895_v14, %v6459_v21  ;;  %v1532_v50 = vmax.f32 %v851_v28, 0.0  ;;  %v1503_v51 = vmax.f32 %v892_v31, 0.0 }
  0xf7   : > { %v1533_v53 = vmax.f32 %v853_v33, 0.0  ;;  %v1534_v55 = vmax.f32 %v894_v37, 0.0 }
  0xf8   : > { %v1535_v58 = vmax.f32 %v896_v41, 0.0 }
  0xf9   : > { %v932_v56 = vpop.f32.mrb[4].mxu0 }
  0xfa   : > { %v934_v3 = vpop.f32.mrb[5].mxu0  ;;  %v975_v57 = vpop.f32.mrb[4].mxu1  ;;  %v6470_v44 = vadd.f32 %v932_v56, %v6457_v13 }
  0xfb   : > { %v936_v39 = vpop.f32.mrb[6].mxu0  ;;  %v977_v4 = vpop.f32.mrb[5].mxu1  ;;  %v6474_v63 = vadd.f32 %v934_v3, %v6457_v13  ;;  %v6477_v6 = vadd.f32 %v975_v57, %v6457_v13 }
  0xfc   : > { %v938_v29 = vpop.f32.mrb[7].mxu0  ;;  %v979_v30 = vpop.f32.mrb[6].mxu1  ;;  %v1504_v61 = vmax.f32 %v6470_v44, 0.0  ;;  %v6481_v52 = vadd.f32 %v936_v39, %v6459_v21  ;;  %v6484_v1 = vadd.f32 %v977_v4, %v6457_v13 }
  0xfd   : > { %v981_v42 = vpop.f32.mrb[7].mxu1  ;;  %v6489_v14 = vadd.f32 %v938_v29, %v6459_v21 }
 0x101   : > { %v1018_v59 = vpop.f32.mrb[8].mxu0 }
 0x102   : > { %v1019_v9 = vadd.f32 %v1018_v59, %v6457_v13  ;;  %v1061_v10 = vpop.f32.mrb[8].mxu1  ;;  %v1020_v16 = vpop.f32.mrb[9].mxu0 }
 0x103   : > { %v1062_v2 = vadd.f32 %v1061_v10, %v6457_v13  ;;  %v1021_v18 = vadd.f32 %v1020_v16, %v6457_v13  ;;  %v1063_v19 = vpop.f32.mrb[9].mxu1  ;;  %v1022_v20 = vpop.f32.mrb[10].mxu0 }
 0x104   : > { %v1508_v56 = vmax.f32 %v1019_v9, 0.0  ;;  %v1064_v3 = vadd.f32 %v1063_v19, %v6457_v13  ;;  %v1023_v57 = vadd.f32 %v1022_v20, %v6459_v21  ;;  %v1065_v24 = vpop.f32.mrb[10].mxu1  ;;  %v1024_v39 = vpop.f32.mrb[11].mxu0 }
 0x105   : > { %v1510_v25 = vmax.f32 %v1062_v2, 0.0  ;;  %v1509_v26 = vmax.f32 %v1021_v18, 0.0  ;;  %v1066_v4 = vadd.f32 %v1065_v24, %v6459_v21  ;;  %v1025_v28 = vadd.f32 %v1024_v39, %v6459_v21  ;;  %v1067_v31 = vpop.f32.mrb[11].mxu1 }
 0x106   : > { %v6495_v33 = vmax.f32 %v1500_v46, %v1508_v56  ;;  %v1511_v37 = vmax.f32 %v1064_v3, 0.0  ;;  %v1540_v41 = vmax.f32 %v1023_v57, 0.0  ;;  %v1068_v29 = vadd.f32 %v1067_v31, %v6459_v21 }
 0x107   : > { %v6498_v59 = vmax.f32 %v1502_v49, %v1510_v25  ;;  %v6500_v9 = vmax.f32 %v1501_v48, %v1509_v26  ;;  %v1542_v10 = vmax.f32 %v1066_v4, 0.0  ;;  %v1541_v16 = vmax.f32 %v1025_v28, 0.0 }
 0x108   : > { %v980_v2 = vadd.f32 %v979_v30, %v6459_v21  ;;  %v6503_v18 = vmax.f32 %v1503_v51, %v1511_v37  ;;  %v6505_v19 = vmax.f32 %v1532_v50, %v1540_v41  ;;  %v1543_v20 = vmax.f32 %v1068_v29, 0.0 }
 0x109   : > { %v1505_v46 = vmax.f32 %v6474_v63, 0.0  ;;  %v1506_v56 = vmax.f32 %v6477_v6, 0.0  ;;  %v6509_v3 = vmax.f32 %v1534_v55, %v1542_v10  ;;  %v6511_v57 = vmax.f32 %v1533_v53, %v1541_v16  ;;  %v1104_v49 = vpop.f32.mrb[12].mxu0 }
 0x10a   : > { %v1536_v48 = vmax.f32 %v6481_v52, 0.0  ;;  %v1507_v24 = vmax.f32 %v6484_v1, 0.0  ;;  %v6515_v39 = vmax.f32 %v1535_v58, %v1543_v20  ;;  %v1105_v30 = vadd.f32 %v1104_v49, %v6457_v13  ;;  %v1147_v50 = vpop.f32.mrb[12].mxu1  ;;  %v1106_v51 = vpop.f32.mrb[13].mxu0 }
 0x10b   : > { %v1537_v25 = vmax.f32 %v6489_v14, 0.0  ;;  %v982_v63 = vadd.f32 %v981_v42, %v6459_v21  ;;  %v1148_v55 = vadd.f32 %v1147_v50, %v6457_v13  ;;  %v1107_v53 = vadd.f32 %v1106_v51, %v6457_v13  ;;  %v1149_v6 = vpop.f32.mrb[13].mxu1  ;;  %v1108_v26 = vpop.f32.mrb[14].mxu0 }
 0x10c   : > { %v1538_v4 = vmax.f32 %v980_v2, 0.0  ;;  %v1512_v52 = vmax.f32 %v1105_v30, 0.0  ;;  %v1150_v1 = vadd.f32 %v1149_v6, %v6457_v13  ;;  %v1109_v58 = vadd.f32 %v1108_v26, %v6459_v21  ;;  %v1151_v28 = vpop.f32.mrb[14].mxu1  ;;  %v1110_v31 = vpop.f32.mrb[15].mxu0 }
 0x10d   : > { %v1514_v37 = vmax.f32 %v1148_v55, 0.0  ;;  %v1513_v41 = vmax.f32 %v1107_v53, 0.0  ;;  %v1152_v14 = vadd.f32 %v1151_v28, %v6459_v21  ;;  %v1111_v42 = vadd.f32 %v1110_v31, %v6459_v21  ;;  %v1153_v29 = vpop.f32.mrb[15].mxu1 }
 0x10e   : > { %v6528_v10 = vmax.f32 %v1504_v61, %v1512_v52  ;;  %v1515_v16 = vmax.f32 %v1150_v1, 0.0  ;;  %v1544_v2 = vmax.f32 %v1109_v58, 0.0  ;;  %v1154_v20 = vadd.f32 %v1153_v29, %v6459_v21 }
 0x10f   : > { %v6531_v49 = vmax.f32 %v1506_v56, %v1514_v37  ;;  %v6533_v30 = vmax.f32 %v1505_v46, %v1513_v41  ;;  %v1546_v50 = vmax.f32 %v1152_v14, 0.0  ;;  %v1545_v51 = vmax.f32 %v1111_v42, 0.0 }
 0x110   : > { %v1539_v55 = vmax.f32 %v982_v63, 0.0  ;;  %v6535_v53 = vmax.f32 %v1507_v24, %v1515_v16  ;;  %v6537_v6 = vmax.f32 %v1536_v48, %v1544_v2  ;;  %v1547_v26 = vmax.f32 %v1154_v20, 0.0 }
 0x111   : > { %v6539_v28 = vmax.f32 %v1538_v4, %v1546_v50  ;;  %v6541_v44 = vmax.f32 %v1537_v25, %v1545_v51  ;;  %v1190_v61 = vpop.f32.mrb[16].mxu0  ;;  %v6555_v16 = vsel %vm2303_vm7, 65537, %v7818_v0 }
 0x112   : > { %v6543_v52 = vmax.f32 %v1539_v55, %v1547_v26  ;;  %v1192_v1 = vpop.f32.mrb[17].mxu0  ;;  %v1233_v56 = vpop.f32.mrb[16].mxu1  ;;  %v1191_v63 = vadd.f32 %v1190_v61, %v6457_v13 }
 0x113   : > { %v1194_v58 = vpop.f32.mrb[18].mxu0  ;;  %v1235_v46 = vpop.f32.mrb[17].mxu1  ;;  %v6551_v4 = vadd.f32 %v1192_v1, %v6457_v13  ;;  %v1234_v14 = vadd.f32 %v1233_v56, %v6457_v13 }
 0x114   : > { %v1196_v31 = vpop.f32.mrb[19].mxu0  ;;  %v1237_v37 = vpop.f32.mrb[18].mxu1  ;;  %v6558_v5 = vadd.f32 %v1194_v58, %v6459_v21  ;;  %v1236_v17 = vadd.f32 %v1235_v46, %v6457_v13  ;;  %v6585_v58 = vrot.slane %v6555_v16, %v6183_v36  ;;  %v1516_v46 = vmax.f32 %v1191_v63, 0.0 }
 0x115   : > { %v1239_v41 = vpop.f32.mrb[19].mxu1  ;;  %v6562_v27 = vadd.f32 %v1196_v31, %v6459_v21  ;;  %v1238_v20 = vadd.f32 %v1237_v37, %v6459_v21  ;;  %v1517_v31 = vmax.f32 %v6551_v4, 0.0  ;;  %v1518_v37 = vmax.f32 %v1234_v14, 0.0 }
 0x116   : > { %v6566_v50 = vadd.f32 %v1239_v41, %v6459_v21 }
 0x118   : > { %v1551_v0 = vmax.f32 %v6566_v50, 0.0 }
 0x119   : > { %v1276_v48 = vpop.f32.mrb[20].mxu0 }
 0x11a   : > { %v1278_v24 = vpop.f32.mrb[21].mxu0  ;;  %v1319_v25 = vpop.f32.mrb[20].mxu1  ;;  %v6569_v51 = vadd.f32 %v1276_v48, %v6457_v13  ;;  %v1548_v48 = vmax.f32 %v6558_v5, 0.0 }
 0x11b   : > { %v1280_v42 = vpop.f32.mrb[22].mxu0  ;;  %v1321_v29 = vpop.f32.mrb[21].mxu1  ;;  %v6572_v55 = vadd.f32 %v1278_v24, %v6457_v13  ;;  %v6575_v61 = vadd.f32 %v1319_v25, %v6457_v13  ;;  %v1519_v24 = vmax.f32 %v1236_v17, 0.0  ;;  %v1549_v25 = vmax.f32 %v6562_v27, 0.0 }
 0x11c   : > { %v1282_v32 = vpop.f32.mrb[23].mxu0  ;;  %v1323_v2 = vpop.f32.mrb[22].mxu1  ;;  %v6578_v1 = vadd.f32 %v1280_v42, %v6459_v21  ;;  %v6581_v56 = vadd.f32 %v1321_v29, %v6457_v13  ;;  %v1550_v29 = vmax.f32 %v1238_v20, 0.0 }
 0x11d   : > { %v1325_v26 = vpop.f32.mrb[23].mxu1  ;;  %v6589_v41 = vadd.f32 %v1282_v32, %v6459_v21  ;;  %v6594_v42 = vadd.f32 %v1323_v2, %v6459_v21 }
 0x11e   : > { %v6605_v20 = vadd.f32 %v1325_v26, %v6459_v21 }
 0x11f   : > { %v7913_v47 = vmax.f32 %v6594_v42, 0.0 }
 0x121   : > { %v1362_v4 = vpop.f32.mrb[24].mxu0 }
 0x122   : > { %v1363_v17 = vadd.f32 %v1362_v4, %v6457_v13  ;;  %v1405_v27 = vpop.f32.mrb[24].mxu1  ;;  %v1364_v15 = vpop.f32.mrb[25].mxu0 }
 0x123   : > { %v1406_v50 = vadd.f32 %v1405_v27, %v6457_v13  ;;  %v1365_v63 = vadd.f32 %v1364_v15, %v6457_v13  ;;  %v1407_v22 = vpop.f32.mrb[25].mxu1  ;;  %v1366_v54 = vpop.f32.mrb[26].mxu0  ;;  %v7902_v15 = vand.u32 31, %v6250_v8 }
 0x124   : > { %v1524_v32 = vmax.f32 %v1363_v17, 0.0  ;;  %v1408_v5 = vadd.f32 %v1407_v22, %v6457_v13  ;;  %v1367_v4 = vadd.f32 %v1366_v54, %v6459_v21  ;;  %v1409_v43 = vpop.f32.mrb[26].mxu1  ;;  %v1368_v7 = vpop.f32.mrb[27].mxu0  ;;  %v7905_v17 = vand.u32 31, %v6257_v11 }
 0x125   : > { %v1526_v45 = vmax.f32 %v1406_v50, 0.0  ;;  %v1525_v2 = vmax.f32 %v1365_v63, 0.0  ;;  %v1410_v26 = vadd.f32 %v1409_v43, %v6459_v21  ;;  %v1369_v23 = vadd.f32 %v1368_v7, %v6459_v21  ;;  %v1411_v27 = vpop.f32.mrb[27].mxu1 }
 0x126   : > { %vm6616_vm8 = vcmp.le.s32.totalorder %v7902_v15, 30  ;;  %vm6622_vm9 = vcmp.le.s32.totalorder %v7905_v17, 30  ;;  %v1580_v54 = vmax.f32 %v1516_v46, %v1524_v32  ;;  %v1527_v50 = vmax.f32 %v1408_v5, 0.0 }
 0x127   : > { %v1556_v63 = vmax.f32 %v1367_v4, 0.0  ;;  %v1412_v43 = vadd.f32 %v1411_v27, %v6459_v21  ;;  %v1582_v14 = vmax.f32 %v1518_v37, %v1526_v45  ;;  %v1581_v7 = vmax.f32 %v1517_v31, %v1525_v2  ;;  %vm2304_vm10 = vmpackc.low %vm6622_vm9, %vm6616_vm8 }
 0x128   : > { %v1558_v38 = vmax.f32 %v1410_v26, 0.0  ;;  %v1557_v40 = vmax.f32 %v1369_v23, 0.0  ;;  %v1596_v8 = vmax.f32 %v6495_v33, %v1580_v54  ;;  %v1583_v15 = vmax.f32 %v1519_v24, %v1527_v50 }
 0x129   : > { %v1588_v34 = vmax.f32 %v1548_v48, %v1556_v63  ;;  %v1559_v12 = vmax.f32 %v1412_v43, 0.0  ;;  %v1598_v11 = vmax.f32 %v6498_v59, %v1582_v14  ;;  %v1597_v17 = vmax.f32 %v6500_v9, %v1581_v7  ;;  %v1448_v46 = vpop.f32.mrb[28].mxu0 }
 0x12a   : > { %v1590_v62 = vmax.f32 %v1550_v29, %v1558_v38  ;;  %v1589_v60 = vmax.f32 %v1549_v25, %v1557_v40  ;;  %v1599_v32 = vmax.f32 %v6503_v18, %v1583_v15  ;;  %v1449_v31 = vadd.f32 %v1448_v46, %v6457_v13  ;;  %v1491_v23 = vpop.f32.mrb[28].mxu1  ;;  %v1450_v37 = vpop.f32.mrb[29].mxu0 }
 0x12b   : > { %v1604_v5 = vmax.f32 %v6505_v19, %v1588_v34  ;;  %v1591_v45 = vmax.f32 %v1551_v0, %v1559_v12  ;;  %v1492_v59 = vadd.f32 %v1491_v23, %v6457_v13  ;;  %v1451_v9 = vadd.f32 %v1450_v37, %v6457_v13  ;;  %v1493_v38 = vpop.f32.mrb[29].mxu1  ;;  %v1452_v40 = vpop.f32.mrb[30].mxu0 }
 0x12c   : > { %v1606_v33 = vmax.f32 %v6509_v3, %v1590_v62  ;;  %v1605_v48 = vmax.f32 %v6511_v57, %v1589_v60  ;;  %v1528_v34 = vmax.f32 %v1449_v31, 0.0  ;;  %v1494_v0 = vadd.f32 %v1493_v38, %v6457_v13  ;;  %v1495_v12 = vpop.f32.mrb[30].mxu1  ;;  %v1454_v19 = vpop.f32.mrb[31].mxu0 }
 0x12d   : > { %v6637_v24 = vpack.c.bf16 %v1604_v5, %v1596_v8  ;;  %v1607_v18 = vmax.f32 %v6515_v39, %v1591_v45  ;;  %v1530_v60 = vmax.f32 %v1492_v59, 0.0  ;;  %v1529_v3 = vmax.f32 %v1451_v9, 0.0  ;;  %v1497_v57 = vpop.f32.mrb[31].mxu1  ;;  %v1685_v23 = vpop.permute.xlu1 %1684 }
 0x12e   : > { %v6641_v25 = vpack.c.bf16 %v1606_v33, %v1598_v11  ;;  %v6643_v62 = vpack.c.bf16 %v1605_v48, %v1597_v17  ;;  %v7908_v14 = vmax.f32 %v6569_v51, 0.0  ;;  %v1531_v4 = vmax.f32 %v1494_v0, 0.0 }
 0x12f   : > { %v6645_v29 = vpack.c.bf16 %v1607_v18, %v1599_v32  ;;  %v1453_v39 = vadd.f32 %v1452_v40, %v6459_v21  ;;  %1754 = vrot.lane.b32.xlu0 %v6637_v24, %s5999_s6  ;;  %v7909_v13 = vmax.f32 %v6575_v61, 0.0  ;;  %v7910_v27 = vmax.f32 %v6572_v55, 0.0 }
 0x130   : > { %v1584_v2 = vmax.f32 %v7908_v14, %v1528_v34  ;;  %v1496_v50 = vadd.f32 %v1495_v12, %v6459_v21  ;;  %v1455_v63 = vadd.f32 %v1454_v19, %v6459_v21  ;;  %1756 = vrot.lane.b32.xlu1 %v6643_v62, %s5999_s6  ;;  %v7911_v43 = vmax.f32 %v6581_v56, 0.0  ;;  %v7918_v14 = vld [vmem:[#allocation4_spill] sm:$0xff] }
 0x131   : > { %v1586_v26 = vmax.f32 %v7909_v13, %v1530_v60  ;;  %v1585_v54 = vmax.f32 %v7910_v27, %v1529_v3  ;;  %v1560_v8 = vmax.f32 %v1453_v39, 0.0  ;;  %v1498_v15 = vadd.f32 %v1497_v57, %v6459_v21  ;;  %v7916_v3 = vld [vmem:[#allocation2_spill] sm:$0xff]  ;;  %v7917_v57 = vld [vmem:[#allocation3_spill] sm:$0xff]  ;;  %v7919_v13 = vld [vmem:[#allocation5_spill] sm:$0xff] }
 0x132   : > { %v1600_v51 = vmax.f32 %v6528_v10, %v1584_v2  ;;  %v1587_v7 = vmax.f32 %v7911_v43, %v1531_v4  ;;  %v1562_v11 = vmax.f32 %v1496_v50, 0.0  ;;  %v1561_v17 = vmax.f32 %v1455_v63, 0.0 }
 0x133   : > { %v1602_v55 = vmax.f32 %v6531_v49, %v1586_v26  ;;  %v1601_v61 = vmax.f32 %v6533_v30, %v1585_v54  ;;  %v1555_v46 = vmax.f32 %v6605_v20, 0.0  ;;  %v7912_v56 = vmax.f32 %v6578_v1, 0.0  ;;  %1758 = vrot.lane.b32.xlu0 %v6641_v25, %s5999_s6  ;;  %v7920_v26 = vld [vmem:[#allocation6_spill] sm:$0xff] }
 0x134   : > { %v1603_v10 = vmax.f32 %v6535_v53, %v1587_v7  ;;  %v1563_v5 = vmax.f32 %v1498_v15, 0.0  ;;  %v1594_v21 = vmax.f32 %v7913_v47, %v1562_v11  ;;  %v7914_v49 = vmax.f32 %v6589_v41, 0.0  ;;  %1760 = vrot.lane.b32.xlu1 %v6645_v29, %s5999_s6  ;;  %v7922_v11 = vld [vmem:[#allocation7_spill] sm:$0xff] }
 0x135   : > { %v1592_v32 = vmax.f32 %v7912_v56, %v1560_v8  ;;  %v6684_v30 = vrot.slane %v6555_v16, %v6177_v35  ;;  %v7915_v53 = vmov 0   ;;  %vm1770_vm8 = vcmask 261120  }
 0x136   : > { %v1593_v22 = vmax.f32 %v7914_v49, %v1561_v17  ;;  %v2308_v1 = vsel %vm2304_vm10, 65537, %v7915_v53  ;;  %v1595_v45 = vmax.f32 %v1555_v46, %v1563_v5  ;;  %v1610_v31 = vmax.f32 %v6539_v28, %v1594_v21 }
 0x137   : > { %v1608_v20 = vmax.f32 %v6537_v6, %v1592_v32  ;;  %2351 = vrot.lane.b32.xlu0 %v6585_v58, %s6000_s7  ;;  %v6696_v16 = vrot.slane %v2308_v1, %v6183_v36  ;;  %v6705_v6 = vrot.slane %v2308_v1, %v6177_v35  ;;  %v1689_v36 = vpop.permute.xlu0 %1688  ;;  %v7923_v32 = vld [vmem:[#allocation9_spill] sm:$0xff]  ;;  %vm1787_vm9 = vcmask 130048  }
 0x138   : > { %v1609_v42 = vmax.f32 %v6541_v44, %v1593_v22  ;;  %v1611_v41 = vmax.f32 %v6543_v52, %v1595_v45  ;;  %v6698_v33 = vpack.c.bf16 %v1610_v31, %v1602_v55  ;;  %2349 = vrot.lane.b32.xlu1 %v6684_v30, %s6000_s7  ;;  %v1687_v44 = vpop.permute.xlu1 %1686  ;;  %v5970_v31 = vld [vmem:[%s7815_s3 + $0x10] sm:$0xff]  }
 0x139   : > { %v6690_v37 = vpack.c.bf16 %v1608_v20, %v1600_v51  ;;  %v1702_v35 = vsel %vm1700_vm11, %v1687_v44, %v1689_v36  ;;  %v1701_v52 = vsel %vm1700_vm11, %v1685_v23, %v1687_v44  ;;  %v7921_v51 = vld [vmem:[#allocation8_spill] sm:$0xff] }
 0x13a   : > { %v6700_v48 = vpack.c.bf16 %v1609_v42, %v1601_v61  ;;  %v6707_v28 = vpack.c.bf16 %v1611_v41, %v1603_v10  ;;  %vm1709_vm12 = vcmp.ne.s16.totalorder %v1702_v35, 0  ;;  %vm1708_vm13 = vcmp.ne.s16.totalorder %v1701_v52, 0 }
 0x13b   : > { %2355 = vrot.lane.b32.xlu0 %v6696_v16, %s6000_s7  ;;  %v1693_v59 = vpop.permute.xlu0 %1692  ;;  %v1717_v18 = vsel %vm1709_vm12, %v6643_v62, 0  ;;  %v1716_v34 = vsel %vm1708_vm13, %v6637_v24, 0 }
 0x13c   : > { %2353 = vrot.lane.b32.xlu1 %v6705_v6, %s6000_s7  ;;  %v1691_v9 = vpop.permute.xlu1 %1690 }
 0x13d   : > { %v1704_v38 = vsel %vm1700_vm11, %v1691_v9, %v1693_v59  ;;  %v1703_v40 = vsel %vm1700_vm11, %v1689_v36, %v1691_v9 }
 0x13e   : > { %vm1711_vm14 = vcmp.ne.s16.totalorder %v1704_v38, 0  ;;  %vm1710_vm15 = vcmp.ne.s16.totalorder %v1703_v40, 0  ;;  %v5971_v38 = vld [vmem:[%s7815_s3 + $0x18] sm:$0xff]  }
 0x13f   : > { %1762 = vrot.lane.b32.xlu0 %v6690_v37, %s5999_s6  ;;  %v1719_v0 = vsel %vm1711_vm14, %v6645_v29, 0  ;;  %v1718_v12 = vsel %vm1710_vm15, %v6641_v25, 0  ;;  %v1697_v19 = vpop.permute.xlu0 %1696 }
 0x140   : > { %1764 = vrot.lane.b32.xlu1 %v6700_v48, %s5999_s6  ;;  %v1695_v60 = vpop.permute.xlu1 %1694 }
 0x141   : > { %v1706_v2 = vsel %vm1700_vm11, %v1695_v60, %v1697_v19  ;;  %v1705_v27 = vsel %vm1700_vm11, %v1693_v59, %v1695_v60 }
 0x142   : > { %vm1713_vm0 = vcmp.ne.s16.totalorder %v1706_v2, 0  ;;  %vm1712_vm3 = vcmp.ne.s16.totalorder %v1705_v27, 0 }
 0x143   : > { %1766 = vrot.lane.b32.xlu0 %v6698_v33, %s5999_s6  ;;  %v1753_v4 = vpop.permute.xlu0 %1752  ;;  %v1721_v54 = vsel %vm1713_vm0, %v6700_v48, 0  ;;  %v1720_v8 = vsel %vm1712_vm3, %v6690_v37, 0  ;;  %vm2042_vm0 = vcmask 269312  }
 0x144   : > { %1768 = vrot.lane.b32.xlu1 %v6707_v28, %s5999_s6  ;;  %v1699_v39 = vpop.permute.xlu1 %1698 }
 0x145   : > { %vm1715_vm1 = vcmp.ne.s16.totalorder %v1699_v39, 0  ;;  %v1707_v43 = vsel %vm1700_vm11, %v1697_v19, %v1699_v39 }
 0x146   : > { %v1723_v7 = vsel %vm1715_vm1, %v6707_v28, 0  ;;  %vm1714_vm5 = vcmp.ne.s16.totalorder %v1707_v43, 0  ;;  %vm2705_vm1 = vcmask 1039360  }
 0x147   : > { %2028 = vrot.lane.b32.xlu0 %v1717_v18, %s6001_s8  ;;  %v2344_v50 = vpop.permute.xlu0 %2343  ;;  %v1722_v17 = vsel %vm1714_vm5, %v6698_v33, 0 }
 0x148   : > { %2026 = vrot.lane.b32.xlu1 %v1716_v34, %s6001_s8  ;;  %v2342_v63 = vpop.permute.xlu1 %2341 }
 0x149   : > { %v2358_v15 = vsel %vm2357_vm4, %v2342_v63, %v2344_v50 }
 0x14a   : > { %vm2365_vm2 = vcmp.ne.s16.totalorder %v2358_v15, 0 }
 0x14b   : > { %2032 = vrot.lane.b32.xlu0 %v1719_v0, %s6001_s8  ;;  %v2348_v55 = vpop.permute.xlu0 %2347  ;;  %v2373_v56 = vsel %vm2365_vm2, %v6637_v24, 0 }
 0x14c   : > { %2030 = vrot.lane.b32.xlu1 %v1718_v12, %s6001_s8  ;;  %v2346_v61 = vpop.permute.xlu1 %2345 }
 0x14d   : > { %v2360_v46 = vsel %vm2357_vm4, %v2346_v61, %v2348_v55  ;;  %v2359_v10 = vsel %vm2357_vm4, %v2344_v50, %v2346_v61 }
 0x14e   : > { %vm2367_vm6 = vcmp.ne.s16.totalorder %v2360_v46, 0  ;;  %vm2366_vm7 = vcmp.ne.s16.totalorder %v2359_v10, 0 }
 0x14f   : > { %2689 = vrot.lane.b32.xlu0 %v7916_v3, %s6002_s9  ;;  %v2375_v5 = vsel %vm2367_vm6, %v6641_v25, 0  ;;  %v2374_v47 = vsel %vm2366_vm7, %v6643_v62, 0 }
 0x150   : > { %2024 = vrot.lane.b32.xlu1 %v7915_v53, %s6001_s8 }
 0x153   : > { %2693 = vrot.lane.b32.xlu0 %v7917_v57, %s6002_s9 }
 0x154   : > { %2691 = vrot.lane.b32.xlu1 %v7918_v14, %s6002_s9 }
 0x157   : > { %2697 = vrot.lane.b32.xlu0 %v7919_v13, %s6002_s9 }
 0x158   : > { %2695 = vrot.lane.b32.xlu1 %v7920_v26, %s6002_s9 }
 0x15b   : > { %2036 = vrot.lane.b32.xlu0 %v1721_v54, %s6001_s8 }
 0x15c   : > { %2699 = vrot.lane.b32.xlu1 %v7921_v51, %s6002_s9 }
 0x15f   : > { %2040 = vrot.lane.b32.xlu0 %v1723_v7, %s6001_s8 }
 0x160   : > { %2034 = vrot.lane.b32.xlu1 %v1720_v8, %s6001_s8 }
 0x163   : > { %2701 = vrot.lane.b32.xlu0 %v7922_v11, %s6002_s9 }
 0x164   : > { %2038 = vrot.lane.b32.xlu1 %v1722_v17, %s6001_s8 }
 0x167   : > { %2406 = vrot.lane.b32.xlu0 %v2373_v56, %s6003_s10 }
 0x168   : > { %2703 = vrot.lane.b32.xlu1 %v7923_v32, %s6002_s9 }
 0x16b   : > { %2410 = vrot.lane.b32.xlu0 %v2375_v5, %s6003_s10  ;;  %v5972_v5 = vld [vmem:[%s7815_s3] sm:$0xff]  }
 0x16c   : > { %2408 = vrot.lane.b32.xlu1 %v2374_v47, %s6003_s10 }
 0x16f   : > { %2404 = vrot.lane.b32.xlu0 %v7915_v53, %s6003_s10 }
 0x1a1   : > { %v1755_v21 = vpop.permute.xlu0 %1754 }
 0x1a2   : > { %v1757_v49 = vpop.permute.xlu1 %1756  ;;  %v1771_v1 = vsel %vm1770_vm8, %v1753_v4, %v1755_v21 }
 0x1a3   : > { %v1772_v22 = vsel %vm1770_vm8, %v1755_v21, %v1757_v49 }
 0x1a4   : > { %1794 = vmatprep.subr.bf16.mxu0 %v1772_v22 }
 0x1a5   : > { %1795 = vmatpush1.bf16.msra.mxu0 %v1771_v1  ;;  %v1759_v20 = vpop.permute.xlu0 %1758 }
 0x1a6   : > { %v1761_v45 = vpop.permute.xlu1 %1760  ;;  %v1773_v23 = vsel %vm1770_vm8, %v1757_v49, %v1759_v20 }
 0x1a7   : > { %v1774_v42 = vsel %vm1770_vm8, %v1759_v20, %v1761_v45 }
 0x1a8   : > { %1847 = vmatprep.subr.bf16.mxu1 %v1774_v42  ;;  %5381 = vmatmul.mubr.msk.bf16.vlgmr.msra.gmra.mrb[32].mxu0 %vm1787_vm9, %v5970_v31 }
 0x1a9   : > { %1848 = vmatpush1.bf16.msra.mxu1 %v1773_v23  ;;  %v2352_v41 = vpop.permute.xlu0 %2351  ;;  %1836 = vmatprep.mubr.bf16.mxu0 %v7915_v53 }
 0x1aa   : > { %v2350_v36 = vpop.permute.xlu1 %2349 }
 0x1ab   : > { %v2361_v44 = vsel %vm2357_vm4, %v2348_v55, %v2350_v36  ;;  %v2362_v35 = vsel %vm2357_vm4, %v2350_v36, %v2352_v41 }
 0x1ac   : > { %vm2368_vm10 = vcmp.ne.s16.totalorder %v2361_v44, 0  ;;  %5383 = vmatmul.mubr.msk.bf16.vlgmr.msra.gmra.mrb[32].mxu1 %vm1787_vm9, %v5970_v31  ;;  %vm2369_vm12 = vcmp.ne.s16.totalorder %v2362_v35, 0 }
 0x1ad   : > { %v2356_v52 = vpop.permute.xlu0 %2355  ;;  %v2376_v59 = vsel %vm2368_vm10, %v6645_v29, 0  ;;  %1889 = vmatprep.mubr.bf16.mxu1 %v7915_v53  ;;  %v2377_v12 = vsel %vm2369_vm12, %v6690_v37, 0  ;;  %vm2422_vm10 = vcmask 252928  }
 0x1ae   : > { %v2354_v9 = vpop.permute.xlu1 %2353  ;;  %2412 = vrot.lane.b32.xlu1 %v2376_v59, %s6003_s10  ;;  %vm2372_vm14 = vcmp.ne.s16.totalorder %v2356_v52, 0 }
 0x1af   : > { %v2363_v40 = vsel %vm2357_vm4, %v2352_v41, %v2354_v9  ;;  %v2364_v18 = vsel %vm2357_vm4, %v2354_v9, %v2356_v52  ;;  %v2380_v39 = vsel %vm2372_vm14, %v6707_v28, 0  ;;  %v5973_v41 = vld [vmem:[%s7815_s3 + $0x8] sm:$0xff]   ;;  %vm2770_vm14 = vcmask 7168  }
 0x1b0   : > { %vm2370_vm13 = vcmp.ne.s16.totalorder %v2363_v40, 0  ;;  %5382 = vmatmul.mubr.msk.bf16.gmra.mrb[36].mxu0 %vm1787_vm9, %v5971_v38  ;;  %vm2371_vm15 = vcmp.ne.s16.totalorder %v2364_v18, 0  ;;  %v7924_v9 = vld [vmem:[#allocation11_spill] sm:$0xff] }
 0x1b1   : > { %v1763_v34 = vpop.permute.xlu0 %1762  ;;  %v2378_v0 = vsel %vm2370_vm13, %v6700_v48, 0  ;;  %1932 = vmatprep.mubr.bf16.mxu0 %v7915_v53  ;;  %v2379_v27 = vsel %vm2371_vm15, %v6698_v33, 0 }
 0x1b2   : > { %v1765_v19 = vpop.permute.xlu1 %1764  ;;  %2416 = vrot.lane.b32.xlu0 %v2378_v0, %s6003_s10  ;;  %2414 = vrot.lane.b32.xlu1 %v2377_v12, %s6003_s10  ;;  %v1775_v2 = vsel %vm1770_vm8, %v1761_v45, %v1763_v34  ;;  %v7925_v0 = vld [vmem:[#allocation13_spill] sm:$0xff]  ;;  %v7926_v12 = vld [vmem:[#allocation10_spill] sm:$0xff] }
 0x1b3   : > { %v1776_v60 = vsel %vm1770_vm8, %v1763_v34, %v1765_v19 }
 0x1b4   : > { %1900 = vmatprep.subr.bf16.mxu0 %v1776_v60  ;;  %5384 = vmatmul.mubr.msk.bf16.gmra.mrb[36].mxu1 %vm1787_vm9, %v5971_v38 }
 0x1b5   : > { %1901 = vmatpush1.bf16.msra.mxu0 %v1775_v2  ;;  %v1767_v4 = vpop.permute.xlu0 %1766  ;;  %1985 = vmatprep.mubr.bf16.mxu1 %v7915_v53 }
 0x1b6   : > { %v1769_v54 = vpop.permute.xlu1 %1768  ;;  %2420 = vrot.lane.b32.xlu0 %v2380_v39, %s6003_s10  ;;  %2418 = vrot.lane.b32.xlu1 %v2379_v27, %s6003_s10  ;;  %v1777_v63 = vsel %vm1770_vm8, %v1765_v19, %v1767_v4 }
 0x1b7   : > { %v1778_v50 = vsel %vm1770_vm8, %v1767_v4, %v1769_v54  ;;  %v7927_v54 = vld [vmem:[#allocation12_spill] sm:$0xff] }
 0x1b8   : > { %1953 = vmatprep.subr.bf16.mxu1 %v1778_v50  ;;  %5385 = vmatmul.mubr.msk.bf16.vlgmr.msra.gmra.mrb[40].mxu0 %vm1787_vm9, %v5970_v31 }
 0x1b9   : > { %1954 = vmatpush1.bf16.msra.mxu1 %v1777_v63  ;;  %v2029_v43 = vpop.permute.xlu0 %2028  ;;  %1942 = vmatprep.mubr.bf16.mxu0 %v7915_v53 }
 0x1ba   : > { %v2027_v7 = vpop.permute.xlu1 %2026 }
 0x1bb   : > { %v2044_v8 = vsel %vm2042_vm0, %v2027_v7, %v2029_v43 }
 0x1bc   : > { %2065 = vmatprep.subr.bf16.mxu0 %v2044_v8  ;;  %5387 = vmatmul.mubr.msk.bf16.vlgmr.msra.gmra.mrb[40].mxu1 %vm1787_vm9, %v5970_v31 }
 0x1bd   : > { %v2033_v15 = vpop.permute.xlu0 %2032  ;;  %1995 = vmatprep.mubr.bf16.mxu1 %v7915_v53 }
 0x1be   : > { %v2031_v55 = vpop.permute.xlu1 %2030 }
 0x1bf   : > { %v2046_v61 = vsel %vm2042_vm0, %v2031_v55, %v2033_v15  ;;  %v2045_v17 = vsel %vm2042_vm0, %v2029_v43, %v2031_v55 }
 0x1c0   : > { %2118 = vmatprep.subr.bf16.mxu1 %v2046_v61  ;;  %5386 = vmatmul.mubr.msk.bf16.gmra.mrb[44].mxu0 %vm1787_vm9, %v5971_v38 }
 0x1c1   : > { %v2690_v46 = vpop.permute.xlu0 %2689  ;;  %2119 = vmatpush1.bf16.msra.mxu1 %v2045_v17  ;;  %2097 = vmatprep.mubr.bf16.mxu0 %v7915_v53 }
 0x1c2   : > { %v2025_v10 = vpop.permute.xlu1 %2024 }
 0x1c3   : > { %v2043_v56 = vsel %vm2042_vm0, %v2025_v10, %v2027_v7 }
 0x1c4   : > { %2066 = vmatpush1.bf16.msra.mxu0 %v2043_v56  ;;  %5388 = vmatmul.mubr.msk.bf16.gmra.mrb[44].mxu1 %vm1787_vm9, %v5971_v38  ;;  %v5974_v56 = vld [vmem:[%s7815_s3 + $0x20] sm:$0xff]  }
 0x1c5   : > { %v2694_v47 = vpop.permute.xlu0 %2693  ;;  %2150 = vmatprep.mubr.bf16.mxu1 %v7915_v53 }
 0x1c6   : > { %v2692_v21 = vpop.permute.xlu1 %2691 }
 0x1c7   : > { %v2707_v49 = vsel %vm2705_vm1, %v2692_v21, %v2694_v47  ;;  %v2706_v22 = vsel %vm2705_vm1, %v2690_v46, %v2692_v21 }
 0x1c8   : > { %vm2714_vm3 = vcmp.ne.s16.totalorder %v2707_v49, 0  ;;  %vm2713_vm5 = vcmp.ne.s16.totalorder %v2706_v22, 0  ;;  %5391 = vmatmul.mubr.msk.bf16.vlgmr.msra.gmra.mrb[32].mxu0 %vm1787_vm9, %v5972_v5 }
 0x1c9   : > { %v2698_v1 = vpop.permute.xlu0 %2697  ;;  %v2722_v20 = vsel %vm2714_vm3, %v6643_v62, 0  ;;  %v2721_v45 = vsel %vm2713_vm5, %v6637_v24, 0  ;;  %2107 = vmatprep.mubr.bf16.mxu0 %v7915_v53 }
 0x1ca   : > { %2756 = vrot.lane.b32.xlu0 %v2722_v20, %s6004_s17  ;;  %2754 = vrot.lane.b32.xlu1 %v2721_v45, %s6004_s17  ;;  %v2696_v31 = vpop.permute.xlu1 %2695 }
 0x1cb   : > { %v2709_v42 = vsel %vm2705_vm1, %v2696_v31, %v2698_v1  ;;  %v2708_v23 = vsel %vm2705_vm1, %v2694_v47, %v2696_v31 }
 0x1cc   : > { %vm2716_vm2 = vcmp.ne.s16.totalorder %v2709_v42, 0  ;;  %vm2715_vm6 = vcmp.ne.s16.totalorder %v2708_v23, 0  ;;  %5393 = vmatmul.mubr.msk.bf16.vlgmr.msra.gmra.mrb[32].mxu1 %vm1787_vm9, %v5972_v5 }
 0x1cd   : > { %v2037_v36 = vpop.permute.xlu0 %2036  ;;  %v2724_v44 = vsel %vm2716_vm2, %v6645_v29, 0  ;;  %v2723_v35 = vsel %vm2715_vm6, %v6641_v25, 0  ;;  %2160 = vmatprep.mubr.bf16.mxu1 %v7915_v53 }
 0x1ce   : > { %2760 = vrot.lane.b32.xlu0 %v2724_v44, %s6004_s17  ;;  %2758 = vrot.lane.b32.xlu1 %v2723_v35, %s6004_s17  ;;  %v2700_v52 = vpop.permute.xlu1 %2699 }
 0x1cf   : > { %v2710_v39 = vsel %vm2705_vm1, %v2698_v1, %v2700_v52 }
 0x1d0   : > { %5392 = vmatmul.mubr.msk.bf16.gmra.mrb[36].mxu0 %vm1787_vm9, %v5973_v41  ;;  %vm2717_vm8 = vcmp.ne.s16.totalorder %v2710_v39, 0 }
 0x1d1   : > { %v2041_v59 = vpop.permute.xlu0 %2040  ;;  %2203 = vmatprep.mubr.bf16.mxu0 %v7915_v53  ;;  %v2725_v8 = vsel %vm2717_vm8, %v6690_v37, 0 }
 0x1d2   : > { %3302 = vrot.lane.b32.xlu0 %v7924_v9, %s6004_s17  ;;  %2752 = vrot.lane.b32.xlu1 %v7915_v53, %s6004_s17  ;;  %v2035_v38 = vpop.permute.xlu1 %2034 }
 0x1d3   : > { %v2048_v40 = vsel %vm2042_vm0, %v2035_v38, %v2037_v36  ;;  %v2047_v18 = vsel %vm2042_vm0, %v2033_v15, %v2035_v38 }
 0x1d4   : > { %2171 = vmatprep.subr.bf16.mxu0 %v2048_v40  ;;  %5394 = vmatmul.mubr.msk.bf16.gmra.mrb[36].mxu1 %vm1787_vm9, %v5973_v41 }
 0x1d5   : > { %v2702_v34 = vpop.permute.xlu0 %2701  ;;  %2172 = vmatpush1.bf16.msra.mxu0 %v2047_v18  ;;  %2256 = vmatprep.mubr.bf16.mxu1 %v7915_v53  ;;  %v6950_v18 = vld [vmem:[%s7815_s3 + $0x38] sm:$0xff]  }
 0x1d6   : > { %3306 = vrot.lane.b32.xlu0 %v7925_v0, %s6004_s17  ;;  %3304 = vrot.lane.b32.xlu1 %v7926_v12, %s6004_s17  ;;  %v2039_v19 = vpop.permute.xlu1 %2038  ;;  %v2711_v4 = vsel %vm2705_vm1, %v2700_v52, %v2702_v34 }
 0x1d7   : > { %v2050_v60 = vsel %vm2042_vm0, %v2039_v19, %v2041_v59  ;;  %v2049_v2 = vsel %vm2042_vm0, %v2037_v36, %v2039_v19  ;;  %vm2718_vm7 = vcmp.ne.s16.totalorder %v2711_v4, 0 }
 0x1d8   : > { %2224 = vmatprep.subr.bf16.mxu1 %v2050_v60  ;;  %5395 = vmatmul.mubr.msk.bf16.vlgmr.msra.gmra.mrb[40].mxu0 %vm1787_vm9, %v5972_v5  ;;  %v2726_v7 = vsel %vm2718_vm7, %v6700_v48, 0 }
 0x1d9   : > { %v2407_v27 = vpop.permute.xlu0 %2406  ;;  %2225 = vmatpush1.bf16.msra.mxu1 %v2049_v2  ;;  %2213 = vmatprep.mubr.bf16.mxu0 %v7915_v53 }
 0x1da   : > { %3310 = vrot.lane.b32.xlu0 %v6684_v30, %s6004_s17  ;;  %3308 = vrot.lane.b32.xlu1 %v7927_v54, %s6004_s17  ;;  %v2704_v50 = vpop.permute.xlu1 %2703 }
 0x1db   : > { %v2712_v63 = vsel %vm2705_vm1, %v2702_v34, %v2704_v50  ;;  %vm2720_vm12 = vcmp.ne.s16.totalorder %v2704_v50, 0 }
 0x1dc   : > { %5397 = vmatmul.mubr.msk.bf16.vlgmr.msra.gmra.mrb[40].mxu1 %vm1787_vm9, %v5972_v5  ;;  %vm2719_vm13 = vcmp.ne.s16.totalorder %v2712_v63, 0  ;;  %v2728_v17 = vsel %vm2720_vm12, %v6707_v28, 0  ;;  %v5975_v5 = vld [vmem:[%s7815_s3 + $0x28] sm:$0xff]  }
 0x1dd   : > { %v2411_v43 = vpop.permute.xlu0 %2410  ;;  %2266 = vmatprep.mubr.bf16.mxu1 %v7915_v53  ;;  %v2727_v46 = vsel %vm2719_vm13, %v6698_v33, 0 }
 0x1de   : > { %2764 = vrot.lane.b32.xlu0 %v2726_v7, %s6004_s17  ;;  %2762 = vrot.lane.b32.xlu1 %v2725_v8, %s6004_s17  ;;  %v2409_v15 = vpop.permute.xlu1 %2408 }
 0x1df   : > { %v2424_v55 = vsel %vm2422_vm10, %v2407_v27, %v2409_v15 }
 0x1e0   : > { %2445 = vmatprep.subr.bf16.mxu0 %v2424_v55  ;;  %5396 = vmatmul.mubr.msk.bf16.gmra.mrb[44].mxu0 %vm1787_vm9, %v5973_v41 }
 0x1e1   : > { %v2405_v61 = vpop.permute.xlu0 %2404  ;;  %2477 = vmatprep.mubr.bf16.mxu0 %v7915_v53 }
 0x1e2   : > { %v2423_v10 = vsel %vm2422_vm10, %v2405_v61, %v2407_v27  ;;  %2768 = vrot.lane.b32.xlu0 %v2728_v17, %s6004_s17  ;;  %2766 = vrot.lane.b32.xlu1 %v2727_v46, %s6004_s17 }
 0x1e3   : > { %2446 = vmatpush1.bf16.msra.mxu0 %v2423_v10 }
 0x1e4   : > { %5398 = vmatmul.mubr.msk.bf16.gmra.mrb[44].mxu1 %vm1787_vm9, %v5973_v41  ;;  %v5976_v41 = vld [vmem:[%s7815_s3 + $0x30] sm:$0xff]  }
 0x1e5   : > { %2530 = vmatprep.mubr.bf16.mxu1 %v7915_v53 }
 0x1e6   : > { %3314 = vrot.lane.b32.xlu0 %v6705_v6, %s6004_s17  ;;  %3312 = vrot.lane.b32.xlu1 %v6585_v58, %s6004_s17 }
 0x1e8   : > { %5405 = vmatmul.mubr.msk.bf16.vlgmr.msra.gmra.mrb[32].mxu0 %vm1787_vm9, %v5974_v56 }
 0x1e9   : > { %2487 = vmatprep.mubr.bf16.mxu0 %v7915_v53 }
 0x1ea   : > { %3648 = vrot.lane.b32.xlu0 %v7916_v3, %s6003_s10  ;;  %3316 = vrot.lane.b32.xlu1 %v6696_v16, %s6004_s17 }
 0x1ee   : > { %3652 = vrot.lane.b32.xlu0 %v7917_v57, %s6003_s10  ;;  %3650 = vrot.lane.b32.xlu1 %v7918_v14, %s6003_s10  ;;  %v2425_v14 = vsel %vm2422_vm10, %v2409_v15, %v2411_v43 }
 0x1f0   : > { %5406 = vmatmul.mubr.msk.bf16.gmra.mrb[36].mxu0 %vm1787_vm9, %v5975_v5 }
 0x1f1   : > { %2583 = vmatprep.mubr.bf16.mxu0 %v7915_v53 }
 0x1f2   : > { %3656 = vrot.lane.b32.xlu0 %v7919_v13, %s6003_s10  ;;  %3654 = vrot.lane.b32.xlu1 %v7920_v26, %s6003_s10 }
 0x1f6   : > { %3660 = vrot.lane.b32.xlu0 %v7922_v11, %s6003_s10  ;;  %3658 = vrot.lane.b32.xlu1 %v7921_v51, %s6003_s10 }
 0x1fa   : > { %3662 = vrot.lane.b32.xlu1 %v7923_v32, %s6003_s10 }
 0x220   : > { %v2413_v3 = vpop.permute.xlu1 %2412 }
 0x221   : > { %v2426_v57 = vsel %vm2422_vm10, %v2411_v43, %v2413_v3 }
 0x222   : > { %2498 = vmatprep.subr.bf16.mxu1 %v2426_v57 }
 0x223   : > { %2499 = vmatpush1.bf16.msra.mxu1 %v2425_v14 }
 0x224   : > { %v2417_v13 = vpop.permute.xlu0 %2416  ;;  %v2415_v47 = vpop.permute.xlu1 %2414 }
 0x225   : > { %v2428_v26 = vsel %vm2422_vm10, %v2415_v47, %v2417_v13  ;;  %v2427_v21 = vsel %vm2422_vm10, %v2413_v3, %v2415_v47 }
 0x226   : > { %2551 = vmatprep.subr.bf16.mxu0 %v2428_v26  ;;  %5407 = vmatmul.mubr.msk.bf16.vlgmr.msra.gmra.mrb[32].mxu1 %vm1787_vm9, %v5974_v56 }
 0x227   : > { %2552 = vmatpush1.bf16.msra.mxu0 %v2427_v21  ;;  %2540 = vmatprep.mubr.bf16.mxu1 %v7915_v53 }
 0x228   : > { %v2421_v51 = vpop.permute.xlu0 %2420  ;;  %v2419_v11 = vpop.permute.xlu1 %2418 }
 0x229   : > { %v2430_v32 = vsel %vm2422_vm10, %v2419_v11, %v2421_v51  ;;  %v2429_v49 = vsel %vm2422_vm10, %v2417_v13, %v2419_v11 }
 0x22a   : > { %2604 = vmatprep.subr.bf16.mxu1 %v2430_v32  ;;  %5409 = vmatmul.mubr.msk.bf16.vlgmr.msra.gmra.mrb[40].mxu0 %vm1787_vm9, %v5974_v56 }
 0x22b   : > { %2605 = vmatpush1.bf16.msra.mxu1 %v2429_v49  ;;  %2593 = vmatprep.mubr.bf16.mxu0 %v7915_v53 }
 0x22e   : > { %5408 = vmatmul.mubr.msk.bf16.gmra.mrb[36].mxu1 %vm1787_vm9, %v5975_v5 }
 0x22f   : > { %2636 = vmatprep.mubr.bf16.mxu1 %v7915_v53 }
 0x232   : > { %5410 = vmatmul.mubr.msk.bf16.gmra.mrb[44].mxu0 %vm1787_vm9, %v5975_v5 }
 0x233   : > { %2825 = vmatprep.mubr.bf16.mxu0 %v7915_v53 }
 0x236   : > { %5411 = vmatmul.mubr.msk.bf16.vlgmr.msra.gmra.mrb[40].mxu1 %vm1787_vm9, %v5974_v56 }
 0x237   : > { %2646 = vmatprep.mubr.bf16.mxu1 %v7915_v53 }
 0x23c   : > { %v2757_v22 = vpop.permute.xlu0 %2756  ;;  %v2755_v1 = vpop.permute.xlu1 %2754 }
 0x23d   : > { %v2772_v20 = vsel %vm2770_vm14, %v2755_v1, %v2757_v22 }
 0x23e   : > { %2793 = vmatprep.subr.bf16.mxu0 %v2772_v20  ;;  %5412 = vmatmul.mubr.msk.bf16.gmra.mrb[44].mxu1 %vm1787_vm9, %v5975_v5 }
 0x23f   : > { %2878 = vmatprep.mubr.bf16.mxu1 %v7915_v53 }
 0x240   : > { %v2761_v45 = vpop.permute.xlu0 %2760  ;;  %v2759_v31 = vpop.permute.xlu1 %2758 }
 0x241   : > { %v2774_v42 = vsel %vm2770_vm14, %v2759_v31, %v2761_v45  ;;  %v2773_v23 = vsel %vm2770_vm14, %v2757_v22, %v2759_v31 }
 0x242   : > { %2846 = vmatprep.subr.bf16.mxu1 %v2774_v42 }
 0x243   : > { %2847 = vmatpush1.bf16.msra.mxu1 %v2773_v23  ;;  %v5978_v23 = vld [vmem:[%s7815_s3 + $0x40] sm:$0xff]  }
 0x244   : > { %v3303_v36 = vpop.permute.xlu0 %3302  ;;  %v2753_v44 = vpop.permute.xlu1 %2752 }
 0x245   : > { %v2771_v35 = vsel %vm2770_vm14, %v2753_v44, %v2755_v1  ;;  %vm3325_vm6 = vcmp.ne.s16.totalorder %v3303_v36, 0 }
 0x246   : > { %2794 = vmatpush1.bf16.msra.mxu0 %v2771_v35  ;;  %5421 = vmatmul.mubr.msk.bf16.vlgmr.msra.gmra.mrb[32].mxu1 %vm1787_vm9, %v5976_v41  ;;  %v3333_v15 = vsel %vm3325_vm6, %v6637_v24, 0 }
 0x247   : > { %2888 = vmatprep.mubr.bf16.mxu1 %v7915_v53 }
 0x248   : > { %v3307_v52 = vpop.permute.xlu0 %3306  ;;  %v3305_v59 = vpop.permute.xlu1 %3304 }
 0x249   : > { %5419 = vmatmul.mubr.msk.bf16.vlgmr.msra.gmra.mrb[32].mxu0 %vm1787_vm9, %v5976_v41  ;;  %v3319_v38 = vsel %vm2770_vm14, %v3305_v59, %v3307_v52  ;;  %v3318_v40 = vsel %vm2770_vm14, %v3303_v36, %v3305_v59  ;;  %v5979_v59 = vld [vmem:[%s7815_s3 + $0x48] sm:$0xff]  }
 0x24a   : > { %vm3327_vm15 = vcmp.ne.s16.totalorder %v3319_v38, 0  ;;  %vm3326_vm3 = vcmp.ne.s16.totalorder %v3318_v40, 0  ;;  %2835 = vmatprep.mubr.bf16.mxu0 %v7915_v53 }
 0x24b   : > { %v3335_v34 = vsel %vm3327_vm15, %v6641_v25, 0  ;;  %v3334_v19 = vsel %vm3326_vm3, %v6643_v62, 0 }
 0x24c   : > { %v3311_v60 = vpop.permute.xlu0 %3310  ;;  %3368 = vrot.lane.b32.xlu1 %v3335_v34, %s6002_s9  ;;  %3366 = vrot.lane.b32.xlu0 %v3334_v19, %s6002_s9  ;;  %v3309_v2 = vpop.permute.xlu1 %3308 }
 0x24d   : > { %v3320_v4 = vsel %vm2770_vm14, %v3307_v52, %v3309_v2  ;;  %v3321_v39 = vsel %vm2770_vm14, %v3309_v2, %v3311_v60  ;;  %v5980_v2 = vld [vmem:[%s7815_s3 + $0x50] sm:$0xff]  }
 0x24e   : > { %vm3328_vm5 = vcmp.ne.s16.totalorder %v3320_v4, 0  ;;  %vm3329_vm2 = vcmp.ne.s16.totalorder %v3321_v39, 0  ;;  %5422 = vmatmul.mubr.msk.bf16.gmra.mrb[36].mxu1 %vm1787_vm9, %v6950_v18 }
 0x24f   : > { %v3337_v27 = vsel %vm3329_vm2, %v6690_v37, 0  ;;  %v3336_v50 = vsel %vm3328_vm5, %v6645_v29, 0  ;;  %2984 = vmatprep.mubr.bf16.mxu1 %v7915_v53 }
 0x250   : > { %v2765_v63 = vpop.permute.xlu0 %2764  ;;  %3372 = vrot.lane.b32.xlu1 %v3337_v27, %s6002_s9  ;;  %3370 = vrot.lane.b32.xlu0 %v3336_v50, %s6002_s9  ;;  %v2763_v43 = vpop.permute.xlu1 %2762  ;;  %v5981_v27 = vld [vmem:[%s7815_s3 + $0x58] sm:$0xff]  }
 0x251   : > { %v2775_v7 = vsel %vm2770_vm14, %v2761_v45, %v2763_v43  ;;  %5420 = vmatmul.mubr.msk.bf16.gmra.mrb[36].mxu0 %vm1787_vm9, %v6950_v18  ;;  %v2776_v8 = vsel %vm2770_vm14, %v2763_v43, %v2765_v63 }
 0x252   : > { %2899 = vmatprep.subr.bf16.mxu0 %v2776_v8  ;;  %2931 = vmatprep.mubr.bf16.mxu0 %v7915_v53 }
 0x253   : > { %2900 = vmatpush1.bf16.msra.mxu0 %v2775_v7 }
 0x254   : > { %v2769_v55 = vpop.permute.xlu0 %2768  ;;  %3364 = vrot.lane.b32.xlu0 %v3333_v15, %s6002_s9  ;;  %3058 = vmatprep.subr.bf16.mxu0 %v6643_v62  ;;  %v2767_v61 = vpop.permute.xlu1 %2766 }
 0x255   : > { %v2777_v17 = vsel %vm2770_vm14, %v2765_v63, %v2767_v61  ;;  %v2778_v46 = vsel %vm2770_vm14, %v2767_v61, %v2769_v55 }
 0x256   : > { %2952 = vmatprep.subr.bf16.mxu1 %v2778_v46 }
 0x257   : > { %2953 = vmatpush1.bf16.msra.mxu1 %v2777_v17 }
 0x258   : > { %v3315_v10 = vpop.permute.xlu0 %3314  ;;  %3111 = vmatprep.subr.bf16.mxu1 %v6645_v29  ;;  %v3313_v56 = vpop.permute.xlu1 %3312 }
 0x259   : > { %v3322_v5 = vsel %vm2770_vm14, %v3311_v60, %v3313_v56  ;;  %v3323_v3 = vsel %vm2770_vm14, %v3313_v56, %v3315_v10  ;;  %5423 = vmatmul.mubr.msk.bf16.vlgmr.msra.gmra.mrb[40].mxu0 %vm1787_vm9, %v5976_v41 }
 0x25a   : > { %vm3330_vm7 = vcmp.ne.s16.totalorder %v3322_v5, 0  ;;  %vm3331_vm8 = vcmp.ne.s16.totalorder %v3323_v3, 0  ;;  %3059 = vmatpush1.bf16.msra.mxu0 %v6637_v24  ;;  %5425 = vmatmul.mubr.msk.bf16.vlgmr.msra.gmra.mrb[40].mxu1 %vm1787_vm9, %v5976_v41 }
 0x25b   : > { %3164 = vmatprep.subr.bf16.mxu0 %v6700_v48  ;;  %3112 = vmatpush1.bf16.msra.mxu1 %v6641_v25  ;;  %v3339_v57 = vsel %vm3331_vm8, %v6698_v33, 0  ;;  %v3338_v14 = vsel %vm3330_vm7, %v6700_v48, 0 }
 0x25c   : > { %v3649_v13 = vpop.permute.xlu0 %3648  ;;  %3217 = vmatprep.subr.bf16.mxu1 %v6707_v28  ;;  %3376 = vrot.lane.b32.xlu0 %v3339_v57, %s6002_s9  ;;  %v3317_v47 = vpop.permute.xlu1 %3316 }
 0x25d   : > { %3374 = vrot.lane.b32.xlu1 %v3338_v14, %s6002_s9  ;;  %v3324_v26 = vsel %vm2770_vm14, %v3315_v10, %v3317_v47  ;;  %2941 = vmatprep.mubr.bf16.mxu0 %v7915_v53  ;;  %vm3671_vm5 = vcmp.ne.s16.totalorder %v3649_v13, 0 }
 0x25e   : > { %vm3332_vm12 = vcmp.ne.s16.totalorder %v3324_v26, 0  ;;  %2994 = vmatprep.mubr.bf16.mxu1 %v7915_v53  ;;  %v3679_v44 = vsel %vm3671_vm5, %v6637_v24, 0 }
 0x25f   : > { %v3340_v21 = vsel %vm3332_vm12, %v6707_v28, 0 }
 0x260   : > { %v3653_v51 = vpop.permute.xlu0 %3652  ;;  %3380 = vrot.lane.b32.xlu0 %v7915_v53, %s6002_s9  ;;  %v3651_v11 = vpop.permute.xlu1 %3650 }
 0x261   : > { %3378 = vrot.lane.b32.xlu1 %v3340_v21, %s6002_s9  ;;  %v3664_v32 = vsel %vm2422_vm10, %v3649_v13, %v3651_v11  ;;  %v3665_v49 = vsel %vm2422_vm10, %v3651_v11, %v3653_v51  ;;  %5424 = vmatmul.mubr.msk.bf16.gmra.mrb[44].mxu0 %vm1787_vm9, %v6950_v18 }
 0x262   : > { %vm3672_vm13 = vcmp.ne.s16.totalorder %v3664_v32, 0  ;;  %vm3673_vm14 = vcmp.ne.s16.totalorder %v3665_v49, 0  ;;  %5426 = vmatmul.mubr.msk.bf16.gmra.mrb[44].mxu1 %vm1787_vm9, %v6950_v18  ;;  %3090 = vmatprep.mubr.bf16.mxu0 %v7915_v53  ;;  %v5982_v32 = vld [vmem:[%s7815_s3 + $0x60] sm:$0xff]  }
 0x263   : > { %v3681_v22 = vsel %vm3673_vm14, %v6641_v25, 0  ;;  %v3680_v1 = vsel %vm3672_vm13, %v6643_v62, 0  ;;  %3143 = vmatprep.mubr.bf16.mxu1 %v7915_v53 }
 0x264   : > { %v3657_v20 = vpop.permute.xlu0 %3656  ;;  %3714 = vrot.lane.b32.xlu0 %v3681_v22, %s6000_s7  ;;  %v3655_v45 = vpop.permute.xlu1 %3654 }
 0x265   : > { %3712 = vrot.lane.b32.xlu1 %v3680_v1, %s6000_s7  ;;  %v3666_v31 = vsel %vm2422_vm10, %v3653_v51, %v3655_v45  ;;  %v3667_v42 = vsel %vm2422_vm10, %v3655_v45, %v3657_v20 }
 0x266   : > { %vm3674_vm15 = vcmp.ne.s16.totalorder %v3666_v31, 0  ;;  %vm3675_vm3 = vcmp.ne.s16.totalorder %v3667_v42, 0 }
 0x267   : > { %v3683_v41 = vsel %vm3675_vm3, %v6690_v37, 0  ;;  %v3682_v36 = vsel %vm3674_vm15, %v6645_v29, 0 }
 0x268   : > { %3718 = vrot.lane.b32.xlu0 %v3683_v41, %s6000_s7  ;;  %v3661_v35 = vpop.permute.xlu0 %3660  ;;  %v3659_v52 = vpop.permute.xlu1 %3658 }
 0x269   : > { %3716 = vrot.lane.b32.xlu1 %v3682_v36, %s6000_s7  ;;  %5433 = vmatmul.mubr.msk.bf16.vlgmr.msra.gmra.mrb[32].mxu0 %vm1787_vm9, %v5978_v23  ;;  %v3669_v38 = vsel %vm2422_vm10, %v3659_v52, %v3661_v35 }
 0x26a   : > { %3165 = vmatpush1.bf16.msra.mxu0 %v6690_v37  ;;  %5435 = vmatmul.mubr.msk.bf16.vlgmr.msra.gmra.mrb[32].mxu1 %vm1787_vm9, %v5978_v23  ;;  %vm3677_vm2 = vcmp.ne.s16.totalorder %v3669_v38, 0 }
 0x26b   : > { %3218 = vmatpush1.bf16.msra.mxu1 %v6698_v33  ;;  %3153 = vmatprep.mubr.bf16.mxu1 %v7915_v53 }
 0x26c   : > { %4294 = vrot.lane.b32.xlu0 %v7924_v9, %s6001_s8  ;;  %3100 = vmatprep.mubr.bf16.mxu0 %v7915_v53  ;;  %v3668_v9 = vsel %vm2422_vm10, %v3657_v20, %v3659_v52 }
 0x26d   : > { %3710 = vrot.lane.b32.xlu1 %v3679_v44, %s6000_s7  ;;  %vm3676_vm6 = vcmp.ne.s16.totalorder %v3668_v9, 0 }
 0x270   : > { %4298 = vrot.lane.b32.xlu0 %v7925_v0, %s6001_s8  ;;  %v3685_v0 = vsel %vm3677_vm2, %v6698_v33, 0  ;;  %vm4027_vm2 = vcmask 785408  }
 0x271   : > { %4296 = vrot.lane.b32.xlu1 %v7926_v12, %s6001_s8  ;;  %5434 = vmatmul.mubr.msk.bf16.gmra.mrb[36].mxu0 %vm1787_vm9, %v5979_v59  ;;  %v3663_v12 = vpop.permute.xlu1 %3662 }
 0x272   : > { %5436 = vmatmul.mubr.msk.bf16.gmra.mrb[36].mxu1 %vm1787_vm9, %v5979_v59  ;;  %3196 = vmatprep.mubr.bf16.mxu0 %v7915_v53  ;;  %v3670_v40 = vsel %vm2422_vm10, %v3661_v35, %v3663_v12 }
 0x273   : > { %3249 = vmatprep.mubr.bf16.mxu1 %v7915_v53  ;;  %vm3678_vm7 = vcmp.ne.s16.totalorder %v3670_v40, 0 }
 0x274   : > { %4302 = vrot.lane.b32.xlu0 %v6684_v30, %s6001_s8  ;;  %v3684_v30 = vsel %vm3676_vm6, %v6700_v48, 0 }
 0x275   : > { %4300 = vrot.lane.b32.xlu1 %v7927_v54, %s6001_s8 }
 0x278   : > { %3722 = vrot.lane.b32.xlu0 %v3685_v0, %s6000_s7 }
 0x279   : > { %4304 = vrot.lane.b32.xlu1 %v6585_v58, %s6001_s8  ;;  %5437 = vmatmul.mubr.msk.bf16.vlgmr.msra.gmra.mrb[40].mxu0 %vm1787_vm9, %v5978_v23  ;;  %v3686_v58 = vsel %vm3678_vm7, %v6707_v28, 0 }
 0x27a   : > { %5439 = vmatmul.mubr.msk.bf16.vlgmr.msra.gmra.mrb[40].mxu1 %vm1787_vm9, %v5978_v23  ;;  %3206 = vmatprep.mubr.bf16.mxu0 %v7915_v53 }
 0x27b   : > { %3259 = vmatprep.mubr.bf16.mxu1 %v7915_v53 }
 0x27c   : > { %3726 = vrot.lane.b32.xlu0 %v7915_v53, %s6000_s7 }
 0x27d   : > { %3720 = vrot.lane.b32.xlu1 %v3684_v30, %s6000_s7 }
 0x280   : > { %4306 = vrot.lane.b32.xlu0 %v6705_v6, %s6001_s8 }
 0x281   : > { %3724 = vrot.lane.b32.xlu1 %v3686_v58, %s6000_s7  ;;  %5438 = vmatmul.mubr.msk.bf16.gmra.mrb[44].mxu0 %vm1787_vm9, %v5979_v59 }
 0x282   : > { %5440 = vmatmul.mubr.msk.bf16.gmra.mrb[44].mxu1 %vm1787_vm9, %v5979_v59  ;;  %3436 = vmatprep.mubr.bf16.mxu0 %v7915_v53 }
 0x283   : > { %3489 = vmatprep.mubr.bf16.mxu1 %v7915_v53 }
 0x284   : > { %4011 = vrot.lane.b32.xlu0 %v6643_v62, %s6005_s13 }
 0x285   : > { %4308 = vrot.lane.b32.xlu1 %v6696_v16, %s6001_s8 }
 0x288   : > { %4015 = vrot.lane.b32.xlu0 %v6645_v29, %s6005_s13 }
 0x289   : > { %4013 = vrot.lane.b32.xlu1 %v6641_v25, %s6005_s13 }
 0x28c   : > { %4009 = vrot.lane.b32.xlu0 %v6637_v24, %s6005_s13 }
 0x28d   : > { %4017 = vrot.lane.b32.xlu1 %v6690_v37, %s6005_s13 }
 0x290   : > { %4021 = vrot.lane.b32.xlu0 %v6698_v33, %s6005_s13 }
 0x291   : > { %4019 = vrot.lane.b32.xlu1 %v6700_v48, %s6005_s13 }
 0x294   : > { %4025 = vrot.lane.b32.xlu0 %v7915_v53, %s6005_s13 }
 0x295   : > { %4023 = vrot.lane.b32.xlu1 %v6707_v28, %s6005_s13 }
 0x2be   : > { %v3367_v16 = vpop.permute.xlu0 %3366  ;;  %v3369_v6 = vpop.permute.xlu1 %3368 }
 0x2bf   : > { %v3383_v54 = vsel %vm2705_vm1, %v3367_v16, %v3369_v6 }
 0x2c0   : > { %3404 = vmatprep.subr.bf16.mxu0 %v3383_v54 }
 0x2c2   : > { %v3371_v18 = vpop.permute.xlu0 %3370  ;;  %v3373_v34 = vpop.permute.xlu1 %3372 }
 0x2c3   : > { %v3384_v19 = vsel %vm2705_vm1, %v3369_v6, %v3371_v18  ;;  %v3385_v60 = vsel %vm2705_vm1, %v3371_v18, %v3373_v34  ;;  %v337_v18 = vld [vmem:[%s7816_s4] sm:$0xff] }
 0x2c4   : > { %3457 = vmatprep.subr.bf16.mxu1 %v3385_v60 }
 0x2c5   : > { %3458 = vmatpush1.bf16.msra.mxu1 %v3384_v19 }
 0x2c6   : > { %v3365_v4 = vpop.permute.xlu0 %3364 }
 0x2c7   : > { %v3382_v39 = vsel %vm2705_vm1, %v3365_v4, %v3367_v16 }
 0x2c8   : > { %3405 = vmatpush1.bf16.msra.mxu0 %v3382_v39  ;;  %5449 = vmatmul.mubr.msk.bf16.vlgmr.msra.gmra.mrb[32].mxu1 %vm1787_vm9, %v5980_v2 }
 0x2c9   : > { %3499 = vmatprep.mubr.bf16.mxu1 %v7915_v53 }
 0x2cb   : > { %5447 = vmatmul.mubr.msk.bf16.vlgmr.msra.gmra.mrb[32].mxu0 %vm1787_vm9, %v5980_v2 }
 0x2cc   : > { %3446 = vmatprep.mubr.bf16.mxu0 %v7915_v53 }
 0x2ce   : > { %v3377_v50 = vpop.permute.xlu0 %3376 }
 0x2cf   : > { %v3375_v63 = vpop.permute.xlu1 %3374 }
 0x2d0   : > { %v3386_v43 = vsel %vm2705_vm1, %v3373_v34, %v3375_v63  ;;  %v3387_v7 = vsel %vm2705_vm1, %v3375_v63, %v3377_v50  ;;  %5450 = vmatmul.mubr.msk.bf16.gmra.mrb[36].mxu1 %vm1787_vm9, %v5981_v27 }
 0x2d1   : > { %3510 = vmatprep.subr.bf16.mxu0 %v3387_v7  ;;  %3595 = vmatprep.mubr.bf16.mxu1 %v7915_v53  ;;  %v5984_v7 = vld [vmem:[%s7815_s3 + $0x70] sm:$0xff]  }
 0x2d2   : > { %3511 = vmatpush1.bf16.msra.mxu0 %v3386_v43  ;;  %v3381_v8 = vpop.permute.xlu0 %3380  ;;  %v340_v43 = vld [vmem:[%s7816_s4 + $0x18] sm:$0xff] }
 0x2d3   : > { %v3379_v15 = vpop.permute.xlu1 %3378  ;;  %5448 = vmatmul.mubr.msk.bf16.gmra.mrb[36].mxu0 %vm1787_vm9, %v5981_v27 }
 0x2d4   : > { %v3388_v55 = vsel %vm2705_vm1, %v3377_v50, %v3379_v15  ;;  %v3389_v61 = vsel %vm2705_vm1, %v3379_v15, %v3381_v8  ;;  %3542 = vmatprep.mubr.bf16.mxu0 %v7915_v53 }
 0x2d5   : > { %3563 = vmatprep.subr.bf16.mxu1 %v3389_v61 }
 0x2d6   : > { %3564 = vmatpush1.bf16.msra.mxu1 %v3388_v55  ;;  %v3715_v17 = vpop.permute.xlu0 %3714 }
 0x2d7   : > { %v3713_v46 = vpop.permute.xlu1 %3712 }
 0x2d8   : > { %v3729_v10 = vsel %vm2357_vm4, %v3713_v46, %v3715_v17 }
 0x2d9   : > { %3750 = vmatprep.subr.bf16.mxu0 %v3729_v10  ;;  %5453 = vmatmul.mubr.msk.bf16.vlgmr.msra.gmra.mrb[40].mxu1 %vm1787_vm9, %v5980_v2 }
 0x2da   : > { %v3719_v56 = vpop.permute.xlu0 %3718  ;;  %3605 = vmatprep.mubr.bf16.mxu1 %v7915_v53 }
 0x2db   : > { %v3717_v5 = vpop.permute.xlu1 %3716  ;;  %5451 = vmatmul.mubr.msk.bf16.vlgmr.msra.gmra.mrb[40].mxu0 %vm1787_vm9, %v5980_v2  ;;  %v339_v2 = vld [vmem:[%s7816_s4 + $0x10] sm:$0xff] }
 0x2dc   : > { %v3730_v3 = vsel %vm2357_vm4, %v3715_v17, %v3717_v5  ;;  %v3731_v57 = vsel %vm2357_vm4, %v3717_v5, %v3719_v56  ;;  %3552 = vmatprep.mubr.bf16.mxu0 %v7915_v53 }
 0x2dd   : > { %3803 = vmatprep.subr.bf16.mxu1 %v3731_v57 }
 0x2de   : > { %3804 = vmatpush1.bf16.msra.mxu1 %v3730_v3  ;;  %v4295_v14 = vpop.permute.xlu0 %4294 }
 0x2df   : > { %v3711_v13 = vpop.permute.xlu1 %3710  ;;  %vm4317_vm14 = vcmp.ne.s16.totalorder %v4295_v14, 0 }
 0x2e0   : > { %v3728_v47 = vsel %vm2357_vm4, %v3711_v13, %v3713_v46  ;;  %v5985_v46 = vld [vmem:[%s7815_s3 + $0x78] sm:$0xff]  }
 0x2e1   : > { %3751 = vmatpush1.bf16.msra.mxu0 %v3728_v47  ;;  %5454 = vmatmul.mubr.msk.bf16.gmra.mrb[44].mxu1 %vm1787_vm9, %v5981_v27  ;;  %v5986_v47 = vld [vmem:[%s7815_s3 + $0x80] sm:$0xff]  }
 0x2e2   : > { %v4299_v26 = vpop.permute.xlu0 %4298  ;;  %3835 = vmatprep.mubr.bf16.mxu1 %v7915_v53 }
 0x2e3   : > { %v4297_v21 = vpop.permute.xlu1 %4296  ;;  %5452 = vmatmul.mubr.msk.bf16.gmra.mrb[44].mxu0 %vm1787_vm9, %v5981_v27  ;;  %v338_v27 = vld [vmem:[%s7816_s4 + $0x8] sm:$0xff] }
 0x2e4   : > { %v4310_v51 = vsel %vm2042_vm0, %v4295_v14, %v4297_v21  ;;  %v4311_v11 = vsel %vm2042_vm0, %v4297_v21, %v4299_v26  ;;  %3782 = vmatprep.mubr.bf16.mxu0 %v7915_v53 }
 0x2e5   : > { %vm4318_vm10 = vcmp.ne.s16.totalorder %v4310_v51, 0  ;;  %vm4319_vm8 = vcmp.ne.s16.totalorder %v4311_v11, 0  ;;  %v5987_v11 = vld [vmem:[%s7815_s3 + $0x88] sm:$0xff]  }
 0x2e6   : > { %v4326_v49 = vsel %vm4318_vm10, %v6643_v62, 0  ;;  %v4327_v22 = vsel %vm4319_vm8, %v6641_v25, 0  ;;  %v4303_v1 = vpop.permute.xlu0 %4302 }
 0x2e7   : > { %4360 = vrot.lane.b32.xlu0 %v4327_v22, %s5998_s30  ;;  %4358 = vrot.lane.b32.xlu1 %v4326_v49, %s5998_s30  ;;  %v4301_v20 = vpop.permute.xlu1 %4300 }
 0x2e8   : > { %v4312_v45 = vsel %vm2042_vm0, %v4299_v26, %v4301_v20  ;;  %v4313_v31 = vsel %vm2042_vm0, %v4301_v20, %v4303_v1 }
 0x2e9   : > { %vm4320_vm12 = vcmp.ne.s16.totalorder %v4312_v45, 0  ;;  %vm4321_vm13 = vcmp.ne.s16.totalorder %v4313_v31, 0  ;;  %5463 = vmatmul.mubr.msk.bf16.vlgmr.msra.gmra.mrb[32].mxu1 %vm1787_vm9, %v5982_v32 }
 0x2ea   : > { %v4328_v42 = vsel %vm4320_vm12, %v6645_v29, 0  ;;  %v4329_v62 = vsel %vm4321_vm13, %v6690_v37, 0  ;;  %v3723_v23 = vpop.permute.xlu0 %3722  ;;  %3845 = vmatprep.mubr.bf16.mxu1 %v7915_v53  ;;  %v5983_v29 = vld [vmem:[%s7815_s3 + $0x68] sm:$0xff]   ;;  %v4325_v37 = vsel %vm4317_vm14, %v6637_v24, 0 }
 0x2eb   : > { %4364 = vrot.lane.b32.xlu0 %v4329_v62, %s5998_s30  ;;  %4362 = vrot.lane.b32.xlu1 %v4328_v42, %s5998_s30  ;;  %v4305_v25 = vpop.permute.xlu1 %4304 }
 0x2ec   : > { %v4314_v41 = vsel %vm2042_vm0, %v4303_v1, %v4305_v25  ;;  %5461 = vmatmul.mubr.msk.bf16.vlgmr.msra.gmra.mrb[32].mxu0 %vm1787_vm9, %v5982_v32 }
 0x2ed   : > { %vm4322_vm15 = vcmp.ne.s16.totalorder %v4314_v41, 0  ;;  %3792 = vmatprep.mubr.bf16.mxu0 %v7915_v53 }
 0x2ee   : > { %v4330_v36 = vsel %vm4322_vm15, %v6700_v48, 0  ;;  %v3727_v44 = vpop.permute.xlu0 %3726 }
 0x2ef   : > { %4356 = vrot.lane.b32.xlu1 %v4325_v37, %s5998_s30  ;;  %4366 = vrot.lane.b32.xlu0 %v4330_v36, %s5998_s30  ;;  %v3721_v35 = vpop.permute.xlu1 %3720 }
 0x2f0   : > { %v3732_v52 = vsel %vm2357_vm4, %v3719_v56, %v3721_v35  ;;  %v3733_v59 = vsel %vm2357_vm4, %v3721_v35, %v3723_v23 }
 0x2f1   : > { %3856 = vmatprep.subr.bf16.mxu0 %v3733_v59  ;;  %5464 = vmatmul.mubr.msk.bf16.gmra.mrb[36].mxu1 %vm1787_vm9, %v5983_v29 }
 0x2f2   : > { %3857 = vmatpush1.bf16.msra.mxu0 %v3732_v52  ;;  %v4307_v38 = vpop.permute.xlu0 %4306  ;;  %3941 = vmatprep.mubr.bf16.mxu1 %v7915_v53 }
 0x2f3   : > { %v4315_v24 = vsel %vm2042_vm0, %v4305_v25, %v4307_v38  ;;  %v3725_v48 = vpop.permute.xlu1 %3724 }
 0x2f4   : > { %vm4323_vm3 = vcmp.ne.s16.totalorder %v4315_v24, 0  ;;  %v3734_v9 = vsel %vm2357_vm4, %v3723_v23, %v3725_v48  ;;  %5462 = vmatmul.mubr.msk.bf16.gmra.mrb[36].mxu0 %vm1787_vm9, %v5983_v29  ;;  %v3735_v0 = vsel %vm2357_vm4, %v3725_v48, %v3727_v44 }
 0x2f5   : > { %v4331_v12 = vsel %vm4323_vm3, %v6698_v33, 0  ;;  %3909 = vmatprep.subr.bf16.mxu1 %v3735_v0  ;;  %3888 = vmatprep.mubr.bf16.mxu0 %v7915_v53 }
 0x2f6   : > { %3910 = vmatpush1.bf16.msra.mxu1 %v3734_v9  ;;  %v4012_v40 = vpop.permute.xlu0 %4011  ;;  %4368 = vrot.lane.b32.xlu1 %v4331_v12, %s5998_s30 }
 0x2f7   : > { %v4309_v30 = vpop.permute.xlu1 %4308 }
 0x2f8   : > { %v4316_v58 = vsel %vm2042_vm0, %v4307_v38, %v4309_v30 }
 0x2f9   : > { %vm4324_vm5 = vcmp.ne.s16.totalorder %v4316_v58, 0  ;;  %5467 = vmatmul.mubr.msk.bf16.vlgmr.msra.gmra.mrb[40].mxu1 %vm1787_vm9, %v5982_v32 }
 0x2fa   : > { %v4332_v16 = vsel %vm4324_vm5, %v6707_v28, 0  ;;  %v4016_v6 = vpop.permute.xlu0 %4015  ;;  %4372 = vrot.lane.b32.xlu1 %v7915_v53, %s5998_s30  ;;  %3951 = vmatprep.mubr.bf16.mxu1 %v7915_v53 }
 0x2fb   : > { %4370 = vrot.lane.b32.xlu0 %v4332_v16, %s5998_s30  ;;  %v4014_v33 = vpop.permute.xlu1 %4013 }
 0x2fc   : > { %5465 = vmatmul.mubr.msk.bf16.vlgmr.msra.gmra.mrb[40].mxu0 %vm1787_vm9, %v5982_v32  ;;  %v4029_v54 = vsel %vm4027_vm2, %v4012_v40, %v4014_v33  ;;  %v4030_v4 = vsel %vm4027_vm2, %v4014_v33, %v4016_v6 }
 0x2fd   : > { %4050 = vmatprep.subr.bf16.mxu0 %v4029_v54  ;;  %3898 = vmatprep.mubr.bf16.mxu0 %v7915_v53 }
 0x2fe   : > { %v4010_v28 = vpop.permute.xlu0 %4009  ;;  %4647 = vperm.xlu1 %5808, %v338_v27  }
 0x2ff   : > { %v4028_v34 = vsel %vm4027_vm2, %v4010_v28, %v4012_v40  ;;  %4642 = vperm.xlu0 %5807, %v337_v18   ;;  %v4018_v19 = vpop.permute.xlu1 %4017 }
 0x300   : > { %4051 = vmatpush1.bf16.msra.mxu0 %v4028_v34  ;;  %v4031_v60 = vsel %vm4027_vm2, %v4016_v6, %v4018_v19 }
 0x301   : > { %4103 = vmatprep.subr.bf16.mxu1 %v4031_v60  ;;  %5468 = vmatmul.mubr.msk.bf16.gmra.mrb[44].mxu1 %vm1787_vm9, %v5983_v29 }
 0x302   : > { %4104 = vmatpush1.bf16.msra.mxu1 %v4030_v4  ;;  %v4022_v39 = vpop.permute.xlu0 %4021  ;;  %4135 = vmatprep.mubr.bf16.mxu1 %v7915_v53 }
 0x303   : > { %4652 = vperm.xlu0 %5807, %v339_v2   ;;  %v4020_v50 = vpop.permute.xlu1 %4019  ;;  %4657 = vperm.xlu1 %5808, %v340_v43  }
 0x304   : > { %5466 = vmatmul.mubr.msk.bf16.gmra.mrb[44].mxu0 %vm1787_vm9, %v5983_v29  ;;  %v4033_v63 = vsel %vm4027_vm2, %v4020_v50, %v4022_v39  ;;  %v4032_v17 = vsel %vm4027_vm2, %v4018_v19, %v4020_v50 }
 0x305   : > { %4156 = vmatprep.subr.bf16.mxu0 %v4033_v63  ;;  %4082 = vmatprep.mubr.bf16.mxu0 %v7915_v53 }
 0x306   : > { %v4026_v8 = vpop.permute.xlu0 %4025 }
 0x307   : > { %v4024_v15 = vpop.permute.xlu1 %4023 }
 0x308   : > { %v4034_v55 = vsel %vm4027_vm2, %v4022_v39, %v4024_v15  ;;  %v4035_v61 = vsel %vm4027_vm2, %v4024_v15, %v4026_v8 }
 0x309   : > { %4209 = vmatprep.subr.bf16.mxu1 %v4035_v61  ;;  %5477 = vmatmul.mubr.msk.bf16.vlgmr.msra.gmra.mrb[32].mxu1 %vm1787_vm9, %v5984_v7 }
 0x30a   : > { %4210 = vmatpush1.bf16.msra.mxu1 %v4034_v55  ;;  %4145 = vmatprep.mubr.bf16.mxu1 %v7915_v53 }
 0x30c   : > { %5475 = vmatmul.mubr.msk.bf16.vlgmr.msra.gmra.mrb[32].mxu0 %vm1787_vm9, %v5984_v7 }
 0x30d   : > { %4157 = vmatpush1.bf16.msra.mxu0 %v4032_v17  ;;  %4092 = vmatprep.mubr.bf16.mxu0 %v7915_v53 }
 0x311   : > { %5478 = vmatmul.mubr.msk.bf16.gmra.mrb[36].mxu1 %vm1787_vm9, %v5985_v46 }
 0x312   : > { %4241 = vmatprep.mubr.bf16.mxu1 %v7915_v53 }
 0x314   : > { %5476 = vmatmul.mubr.msk.bf16.gmra.mrb[36].mxu0 %vm1787_vm9, %v5985_v46 }
 0x315   : > { %4188 = vmatprep.mubr.bf16.mxu0 %v7915_v53 }
 0x319   : > { %5481 = vmatmul.mubr.msk.bf16.vlgmr.msra.gmra.mrb[40].mxu1 %vm1787_vm9, %v5984_v7 }
 0x31a   : > { %4251 = vmatprep.mubr.bf16.mxu1 %v7915_v53 }
 0x31c   : > { %5479 = vmatmul.mubr.msk.bf16.vlgmr.msra.gmra.mrb[40].mxu0 %vm1787_vm9, %v5984_v7 }
 0x31d   : > { %4198 = vmatprep.mubr.bf16.mxu0 %v7915_v53 }
 0x321   : > { %5482 = vmatmul.mubr.msk.bf16.gmra.mrb[44].mxu1 %vm1787_vm9, %v5985_v46 }
 0x322   : > { %4481 = vmatprep.mubr.bf16.mxu1 %v7915_v53 }
 0x324   : > { %5480 = vmatmul.mubr.msk.bf16.gmra.mrb[44].mxu0 %vm1787_vm9, %v5985_v46 }
 0x325   : > { %4428 = vmatprep.mubr.bf16.mxu0 %v7915_v53 }
 0x359   : > { %v4361_v10 = vpop.permute.xlu0 %4360  ;;  %v4359_v56 = vpop.permute.xlu1 %4358 }
 0x35a   : > { %v4375_v5 = vsel %vm1700_vm11, %v4359_v56, %v4361_v10 }
 0x35b   : > { %4396 = vmatprep.subr.bf16.mxu0 %v4375_v5 }
 0x35d   : > { %v4365_v3 = vpop.permute.xlu0 %4364  ;;  %v4363_v57 = vpop.permute.xlu1 %4362 }
 0x35e   : > { %v4376_v14 = vsel %vm1700_vm11, %v4361_v10, %v4363_v57  ;;  %v4377_v13 = vsel %vm1700_vm11, %v4363_v57, %v4365_v3 }
 0x35f   : > { %4449 = vmatprep.subr.bf16.mxu1 %v4377_v13 }
 0x360   : > { %4450 = vmatpush1.bf16.msra.mxu1 %v4376_v14 }
 0x361   : > { %v4357_v26 = vpop.permute.xlu1 %4356  ;;  %v4367_v51 = vpop.permute.xlu0 %4366 }
 0x362   : > { %v4374_v21 = vsel %vm1700_vm11, %v4357_v26, %v4359_v56  ;;  %v4378_v22 = vsel %vm1700_vm11, %v4365_v3, %v4367_v51 }
 0x363   : > { %4397 = vmatpush1.bf16.msra.mxu0 %v4374_v21  ;;  %5491 = vmatmul.mubr.msk.bf16.vlgmr.msra.gmra.mrb[32].mxu1 %vm1787_vm9, %v5986_v47 }
 0x364   : > { %4491 = vmatprep.mubr.bf16.mxu1 %v7915_v53 }
 0x366   : > { %5489 = vmatmul.mubr.msk.bf16.vlgmr.msra.gmra.mrb[32].mxu0 %vm1787_vm9, %v5986_v47 }
 0x367   : > { %4438 = vmatprep.mubr.bf16.mxu0 %v7915_v53 }
 0x368   : > { %v4369_v32 = vpop.permute.xlu1 %4368 }
 0x369   : > { %v4379_v49 = vsel %vm1700_vm11, %v4367_v51, %v4369_v32 }
 0x36a   : > { %4502 = vmatprep.subr.bf16.mxu0 %v4379_v49 }
 0x36b   : > { %5492 = vmatmul.mubr.msk.bf16.gmra.mrb[36].mxu1 %vm1787_vm9, %v5987_v11  ;;  %4503 = vmatpush1.bf16.msra.mxu0 %v4378_v22 }
 0x36c   : > { %v4373_v1 = vpop.permute.xlu1 %4372  ;;  %4587 = vmatprep.mubr.bf16.mxu1 %v7915_v53 }
 0x36d   : > { %v4371_v20 = vpop.permute.xlu0 %4370 }
 0x36e   : > { %v4380_v45 = vsel %vm1700_vm11, %v4369_v32, %v4371_v20  ;;  %5490 = vmatmul.mubr.msk.bf16.gmra.mrb[36].mxu0 %vm1787_vm9, %v5987_v11  ;;  %v4381_v31 = vsel %vm1700_vm11, %v4371_v20, %v4373_v1 }
 0x36f   : > { %4555 = vmatprep.subr.bf16.mxu1 %v4381_v31  ;;  %4534 = vmatprep.mubr.bf16.mxu0 %v7915_v53 }
 0x370   : > { %4556 = vmatpush1.bf16.msra.mxu1 %v4380_v45 }
 0x373   : > { %5495 = vmatmul.mubr.msk.bf16.vlgmr.msra.gmra.mrb[40].mxu1 %vm1787_vm9, %v5986_v47 }
 0x374   : > { %4597 = vmatprep.mubr.bf16.mxu1 %v7915_v53 }
 0x376   : > { %5493 = vmatmul.mubr.msk.bf16.vlgmr.msra.gmra.mrb[40].mxu0 %vm1787_vm9, %v5986_v47 }
 0x377   : > { %4544 = vmatprep.mubr.bf16.mxu0 %v7915_v53 }
 0x37b   : > { %5496 = vmatmul.mubr.msk.bf16.gmra.mrb[44].mxu1 %vm1787_vm9, %v5987_v11 }
 0x37d   : > { %v7241_v23 = vpop.permute.xlu1 %4647 }
 0x37e   : > { %5494 = vmatmul.mubr.msk.bf16.gmra.mrb[44].mxu0 %vm1787_vm9, %v5987_v11  ;;  %v7239_v42 = vpop.permute.xlu0 %4642 }
 0x382   : > { %v7277_v54 = vpop.permute.xlu0 %4652  ;;  %v7296_v50 = vpop.permute.xlu1 %4657 }
 0x436   : > { %v4483_v62 = vpop.f32.mrb[32].mxu1 }
 0x437   : > { %v7244_v25 = vadd.f32 %v7239_v42, %v4483_v62  ;;  %v4485_v41 = vpop.f32.mrb[33].mxu1 }
 0x438   : > { %v7247_v29 = vadd.f32 %v7239_v42, %v4485_v41  ;;  %v4487_v37 = vpop.f32.mrb[34].mxu1 }
 0x439   : > { %v4694_v36 = vmax.f32 %v7244_v25, 0.0  ;;  %v4430_v53 = vpop.f32.mrb[32].mxu0  ;;  %v4489_v44 = vpop.f32.mrb[35].mxu1  ;;  %v7251_v35 = vadd.f32 %v7241_v23, %v4487_v37 }
 0x43a   : > { %v4695_v52 = vmax.f32 %v7247_v29, 0.0  ;;  %v7255_v59 = vadd.f32 %v7239_v42, %v4430_v53  ;;  %v7258_v38 = vadd.f32 %v7241_v23, %v4489_v44  ;;  %v4432_v24 = vpop.f32.mrb[33].mxu0 }
 0x43b   : > { %v7860_v48 = vmax.f32 %v7251_v35, 0.0  ;;  %v7262_v9 = vadd.f32 %v7239_v42, %v4432_v24  ;;  %v4434_v0 = vpop.f32.mrb[34].mxu0 }
 0x43c   : > { %v5814_v12 = vpack.i.bf16 %v4695_v52, %v4694_v36  ;;  %v4692_v40 = vmax.f32 %v7255_v59, 0.0  ;;  %v7862_v30 = vmax.f32 %v7258_v38, 0.0  ;;  %v7271_v58 = vadd.f32 %v7241_v23, %v4434_v0  ;;  %v4436_v16 = vpop.f32.mrb[35].mxu0 }
 0x43d   : > { %v4693_v6 = vmax.f32 %v7262_v9, 0.0  ;;  %v7275_v33 = vadd.f32 %v7241_v23, %v4436_v16 }
 0x43e   : > { %5815 = vrot.lane.b32.xlu1 %v5814_v12, %s6002_s9  ;;  %v4493_v18 = vpop.f32.mrb[36].mxu1  ;;  %v4700_v34 = vmax.f32 %v7271_v58, 0.0  ;;  %v5824_v4 = vpack.i.bf16 %v7862_v30, %v7860_v48 }
 0x43f   : > { %v5809_v28 = vpack.i.bf16 %v4693_v6, %v4692_v40  ;;  %v4701_v19 = vmax.f32 %v7275_v33, 0.0  ;;  %v7287_v60 = vadd.f32 %v7277_v54, %v4493_v18  ;;  %v4495_v2 = vpop.f32.mrb[37].mxu1 }
 0x440   : > { %v7294_v39 = vadd.f32 %v7277_v54, %v4495_v2  ;;  %v4497_v27 = vpop.f32.mrb[38].mxu1 }
 0x441   : > { %v7848_v63 = vmax.f32 %v7287_v60, 0.0  ;;  %v4499_v43 = vpop.f32.mrb[39].mxu1  ;;  %v7300_v7 = vadd.f32 %v7296_v50, %v4497_v27  ;;  %5810 = vrot.lane.b32.xlu0 %v5809_v28, %s6002_s9  ;;  %v4440_v8 = vpop.f32.mrb[36].mxu0  ;;  %v5819_v46 = vpack.i.bf16 %v4701_v19, %v4700_v34 }
 0x442   : > { %v7849_v15 = vmax.f32 %v7294_v39, 0.0  ;;  %v7305_v55 = vadd.f32 %v7296_v50, %v4499_v43  ;;  %v7308_v61 = vadd.f32 %v7277_v54, %v4440_v8  ;;  %v4442_v17 = vpop.f32.mrb[37].mxu0  ;;  %5825 = vrot.lane.b32.xlu1 %v5824_v4, %s6002_s9 }
 0x443   : > { %v7846_v10 = vmax.f32 %v7300_v7, 0.0  ;;  %v7317_v56 = vadd.f32 %v7277_v54, %v4442_v17  ;;  %v4444_v5 = vpop.f32.mrb[38].mxu0 }
 0x444   : > { %v5834_v3 = vpack.i.bf16 %v7849_v15, %v7848_v63  ;;  %v7847_v57 = vmax.f32 %v7305_v55, 0.0  ;;  %v4708_v14 = vmax.f32 %v7308_v61, 0.0  ;;  %v7326_v13 = vadd.f32 %v7296_v50, %v4444_v5  ;;  %v4446_v47 = vpop.f32.mrb[39].mxu0 }
 0x445   : > { %v4709_v26 = vmax.f32 %v7317_v56, 0.0  ;;  %v7330_v21 = vadd.f32 %v7296_v50, %v4446_v47  ;;  %5820 = vrot.lane.b32.xlu0 %v5819_v46, %s6002_s9 }
 0x446   : > { %v4589_v51 = vpop.f32.mrb[40].mxu1  ;;  %5835 = vrot.lane.b32.xlu1 %v5834_v3, %s6002_s9  ;;  %v4716_v32 = vmax.f32 %v7326_v13, 0.0  ;;  %v5844_v20 = vpack.i.bf16 %v7847_v57, %v7846_v10 }
 0x447   : > { %v5829_v11 = vpack.i.bf16 %v4709_v26, %v4708_v14  ;;  %v4717_v49 = vmax.f32 %v7330_v21, 0.0  ;;  %v7341_v22 = vadd.f32 %v7239_v42, %v4589_v51  ;;  %v4591_v1 = vpop.f32.mrb[41].mxu1 }
 0x448   : > { %v7348_v45 = vadd.f32 %v7239_v42, %v4591_v1  ;;  %v4593_v31 = vpop.f32.mrb[42].mxu1 }
 0x449   : > { %v7869_v62 = vmax.f32 %v7341_v22, 0.0  ;;  %v7352_v41 = vadd.f32 %v7241_v23, %v4593_v31  ;;  %v4536_v37 = vpop.f32.mrb[40].mxu0  ;;  %v4595_v53 = vpop.f32.mrb[43].mxu1  ;;  %5830 = vrot.lane.b32.xlu0 %v5829_v11, %s6002_s9  ;;  %v5839_v16 = vpack.i.bf16 %v4717_v49, %v4716_v32 }
 0x44a   : > { %v4699_v44 = vmax.f32 %v7348_v45, 0.0  ;;  %v7357_v24 = vadd.f32 %v7239_v42, %v4536_v37  ;;  %v7360_v0 = vadd.f32 %v7241_v23, %v4595_v53  ;;  %v4538_v12 = vpop.f32.mrb[41].mxu0  ;;  %5845 = vrot.lane.b32.xlu1 %v5844_v20, %s6002_s9 }
 0x44b   : > { %v7850_v18 = vmax.f32 %v7352_v41, 0.0  ;;  %v7369_v28 = vadd.f32 %v7239_v42, %v4538_v12  ;;  %v4540_v2 = vpop.f32.mrb[42].mxu0 }
 0x44c   : > { %v5854_v4 = vpack.i.bf16 %v4699_v44, %v7869_v62  ;;  %v4696_v27 = vmax.f32 %v7357_v24, 0.0  ;;  %v7853_v43 = vmax.f32 %v7360_v0, 0.0  ;;  %v7378_v8 = vadd.f32 %v7241_v23, %v4540_v2  ;;  %v4542_v17 = vpop.f32.mrb[43].mxu0 }
 0x44d   : > { %v4697_v46 = vmax.f32 %v7369_v28, 0.0  ;;  %v7382_v5 = vadd.f32 %v7241_v23, %v4542_v17  ;;  %5840 = vrot.lane.b32.xlu0 %v5839_v16, %s6002_s9 }
 0x44e   : > { %v4599_v42 = vpop.f32.mrb[44].mxu1  ;;  %5855 = vrot.lane.b32.xlu1 %v5854_v4, %s6002_s9  ;;  %v7868_v47 = vmax.f32 %v7378_v8, 0.0  ;;  %v5864_v23 = vpack.i.bf16 %v7853_v43, %v7850_v18  ;;  %v7929_v45 = vmax.f32 %v7378_v8, 0.0  ;;  %v7932_v8 = vmax.f32 %v7258_v38, 0.0 }
 0x44f   : > { %v5849_v3 = vpack.i.bf16 %v4697_v46, %v4696_v27  ;;  %v7866_v51 = vmax.f32 %v7382_v5, 0.0  ;;  %v7393_v11 = vadd.f32 %v7277_v54, %v4599_v42  ;;  %v4601_v1 = vpop.f32.mrb[45].mxu1  ;;  %v7934_v38 = vmax.f32 %v7251_v35, 0.0 }
 0x450   : > { %v7400_v20 = vadd.f32 %v7277_v54, %v4601_v1  ;;  %v4603_v31 = vpop.f32.mrb[46].mxu1  ;;  %v7937_v35 = vmax.f32 %v7360_v0, 0.0 }
 0x451   : > { %v7851_v37 = vmax.f32 %v7393_v11, 0.0  ;;  %v7404_v53 = vadd.f32 %v7296_v50, %v4603_v31  ;;  %v4546_v12 = vpop.f32.mrb[44].mxu0  ;;  %v4605_v16 = vpop.f32.mrb[47].mxu1  ;;  %5850 = vrot.lane.b32.xlu0 %v5849_v3, %s6002_s9  ;;  %v5859_v1 = vpack.i.bf16 %v7866_v51, %v7868_v47 }
 0x452   : > { %v7852_v2 = vmax.f32 %v7400_v20, 0.0  ;;  %v7409_v4 = vadd.f32 %v7277_v54, %v4546_v12  ;;  %v7412_v17 = vadd.f32 %v7296_v50, %v4605_v16  ;;  %v4548_v42 = vpop.f32.mrb[45].mxu0  ;;  %5865 = vrot.lane.b32.xlu1 %v5864_v23, %s6002_s9 }
 0x453   : > { %v7855_v31 = vmax.f32 %v7404_v53, 0.0  ;;  %v7421_v3 = vadd.f32 %v7277_v54, %v4548_v42  ;;  %v4550_v10 = vpop.f32.mrb[46].mxu0 }
 0x454   : > { %v5874_v12 = vpack.i.bf16 %v7852_v2, %v7851_v37  ;;  %v7859_v16 = vmax.f32 %v7409_v4, 0.0  ;;  %v7856_v23 = vmax.f32 %v7412_v17, 0.0  ;;  %v7430_v57 = vadd.f32 %v7296_v50, %v4550_v10  ;;  %v4552_v63 = vpop.f32.mrb[47].mxu0 }
 0x455   : > { %v7854_v15 = vmax.f32 %v7421_v3, 0.0  ;;  %v7434_v18 = vadd.f32 %v7296_v50, %v4552_v63  ;;  %5860 = vrot.lane.b32.xlu0 %v5859_v1, %s6002_s9 }
 0x456   : > { %5875 = vrot.lane.b32.xlu1 %v5874_v12, %s6002_s9  ;;  %v7858_v42 = vmax.f32 %v7430_v57, 0.0  ;;  %v5884_v37 = vpack.i.bf16 %v7856_v23, %v7855_v31  ;;  %v7939_v0 = vmax.f32 %v7430_v57, 0.0 }
 0x457   : > { %v5869_v54 = vpack.i.bf16 %v7854_v15, %v7859_v16  ;;  %v7857_v10 = vmax.f32 %v7434_v18, 0.0 }
 0x459   : > { %5870 = vrot.lane.b32.xlu0 %v5869_v54, %s6002_s9  ;;  %v5879_v50 = vpack.i.bf16 %v7857_v10, %v7858_v42 }
 0x45a   : > { %5885 = vrot.lane.b32.xlu1 %v5884_v37, %s6002_s9 }
 0x45d   : > { %5880 = vrot.lane.b32.xlu0 %v5879_v50, %s6002_s9  ;;  %s5516_s9 = sshll.u32 %s7953_s19, 7 }
 0x45e   : > { %s7730_s16 = scalar_lea.vmem %s7817_s5, %s5516_s9 }
 0x4b0   : > { %v5816_v63 = vpop.permute.xlu1 %5815 }
 0x4b1   : > { %v5817_v12 = vunpack.i.l.bf16 %v5816_v63 }
 0x4b3   : > { %v5811_v1 = vpop.permute.xlu0 %5810 }
 0x4b4   : > { %v5813_v2 = vunpack.i.h.bf16 %v5811_v1  ;;  %v5812_v43 = vunpack.i.l.bf16 %v5811_v1  ;;  %v7455_v15 = vpop.permute.xlu1 %5825 }
 0x4b5   : > { %v7864_v10 = vunpack.i.l.bf16 %v7455_v15 }
 0x4b6   : > { %v4821_v31 = vsel %vm2705_vm1, %v5812_v43, %v5813_v2  ;;  %v4822_v54 = vsel %vm2705_vm1, %v5813_v2, %v5817_v12 }
 0x4b7   : > { %v7461_v37 = vmax.f32 %v4692_v40, %v4821_v31  ;;  %v7465_v23 = vmax.f32 %v4693_v6, %v4822_v54  ;;  %v7467_v50 = vpop.permute.xlu0 %5820 }
 0x4b8   : > { %v5823_v1 = vunpack.i.h.bf16 %v7467_v50  ;;  %v7861_v42 = vunpack.i.l.bf16 %v7467_v50  ;;  %v7472_v16 = vpop.permute.xlu1 %5835 }
 0x4b9   : > { %v5889_v2 = vpack.i.bf16 %v7465_v23, %v7461_v37  ;;  %v7865_v54 = vunpack.i.l.bf16 %v7472_v16 }
 0x4ba   : > { %v4828_v59 = vsel %vm2705_vm1, %v7861_v42, %v5823_v1  ;;  %v4829_v9 = vsel %vm2705_vm1, %v5823_v1, %v7864_v10 }
 0x4bb   : > { %v7484_v40 = vmax.f32 %v4700_v34, %v4828_v59  ;;  %v7488_v6 = vmax.f32 %v4701_v19, %v4829_v9  ;;  %v7490_v31 = vpop.permute.xlu0 %5830  ;;  %5890 = vrot.lane.b32.xlu0 %v5889_v2, %s6005_s13  ;;  %v5818_v59 = vunpack.i.h.bf16 %v5816_v63 }
 0x4bc   : > { %v5833_v48 = vunpack.i.h.bf16 %v7490_v31  ;;  %v7863_v42 = vunpack.i.l.bf16 %v7490_v31  ;;  %v7496_v30 = vpop.permute.xlu1 %5845 }
 0x4bd   : > { %v5894_v58 = vpack.i.bf16 %v7488_v6, %v7484_v40  ;;  %v5847_v9 = vunpack.i.l.bf16 %v7496_v30 }
 0x4be   : > { %v4835_v33 = vsel %vm2705_vm1, %v7863_v42, %v5833_v48  ;;  %v4836_v34 = vsel %vm2705_vm1, %v5833_v48, %v7865_v54 }
 0x4bf   : > { %v7508_v19 = vmax.f32 %v4708_v14, %v4835_v33  ;;  %v7512_v1 = vmax.f32 %v4709_v26, %v4836_v34  ;;  %v7514_v2 = vpop.permute.xlu0 %5840  ;;  %5895 = vrot.lane.b32.xlu0 %v5894_v58, %s6005_s13  ;;  %v4823_v34 = vsel %vm2705_vm1, %v5817_v12, %v5818_v59 }
 0x4c0   : > { %v5843_v42 = vunpack.i.h.bf16 %v7514_v2  ;;  %v7867_v10 = vunpack.i.l.bf16 %v7514_v2  ;;  %v5856_v48 = vpop.permute.xlu1 %5855 }
 0x4c1   : > { %v5858_v54 = vunpack.i.h.bf16 %v5856_v48  ;;  %v5899_v61 = vpack.i.bf16 %v7512_v1, %v7508_v19  ;;  %v5857_v26 = vunpack.i.l.bf16 %v5856_v48  ;;  %v7547_v48 = vmax.f32 %v4694_v36, %v4823_v34 }
 0x4c2   : > { %v4842_v56 = vsel %vm2705_vm1, %v7867_v10, %v5843_v42  ;;  %v4843_v14 = vsel %vm2705_vm1, %v5843_v42, %v5847_v9 }
 0x4c3   : > { %v7530_v63 = vmax.f32 %v4716_v32, %v4842_v56  ;;  %v7534_v58 = vmax.f32 %v4717_v49, %v4843_v14  ;;  %v5851_v33 = vpop.permute.xlu0 %5850  ;;  %5900 = vrot.lane.b32.xlu0 %v5899_v61, %s6005_s13  ;;  %v4885_v62 = vsel %vm2705_vm1, %v5858_v54, %v5812_v43  ;;  %v4827_v13 = vsel %vm2705_vm1, %v5857_v26, %v5858_v54 }
 0x4c4   : > { %v5853_v51 = vunpack.i.h.bf16 %v5851_v33  ;;  %v5852_v10 = vunpack.i.l.bf16 %v5851_v33  ;;  %v5866_v47 = vpop.permute.xlu1 %5865  ;;  %v7565_v29 = vmax.f32 %v4699_v44, %v4885_v62  ;;  %v7931_v33 = vunpack.i.l.bf16 %v7455_v15 }
 0x4c5   : > { %v5904_v42 = vpack.i.bf16 %v7534_v58, %v7530_v63  ;;  %v5867_v25 = vunpack.i.l.bf16 %v5866_v47  ;;  %v5868_v28 = vunpack.i.h.bf16 %v5866_v47 }
 0x4c6   : > { %v4824_v32 = vsel %vm2705_vm1, %v5818_v59, %v5852_v10  ;;  %v4825_v21 = vsel %vm2705_vm1, %v5852_v10, %v5853_v51  ;;  %v4826_v49 = vsel %vm2705_vm1, %v5853_v51, %v5857_v26  ;;  %v5828_v51 = vunpack.i.h.bf16 %v7455_v15 }
 0x4c7   : > { %v7551_v12 = vmax.f32 %v4695_v52, %v4824_v32  ;;  %v7555_v43 = vmax.f32 %v4696_v27, %v4825_v21  ;;  %v7559_v54 = vmax.f32 %v4697_v46, %v4826_v49  ;;  %v5861_v59 = vpop.permute.xlu0 %5860  ;;  %5905 = vrot.lane.b32.xlu0 %v5904_v42, %s6005_s13  ;;  %v7928_v52 = vmax.f32 %v7341_v22, 0.0 }
 0x4c8   : > { %v5863_v36 = vunpack.i.h.bf16 %v5861_v59  ;;  %v5862_v10 = vunpack.i.l.bf16 %v5861_v59  ;;  %v5876_v61 = vpop.permute.xlu1 %5875  ;;  %v7930_v22 = vmax.f32 %v7382_v5, 0.0  ;;  %v4830_v34 = vsel %vm2705_vm1, %v7931_v33, %v5828_v51 }
 0x4c9   : > { %v7569_v24 = vmax.f32 %v7928_v52, %v4827_v13  ;;  %v5909_v27 = vpack.i.bf16 %v7551_v12, %v7547_v48  ;;  %v5914_v26 = vpack.i.bf16 %v7559_v54, %v7555_v43  ;;  %v5877_v42 = vunpack.i.l.bf16 %v5876_v61 }
 0x4ca   : > { %v4831_v46 = vsel %vm2705_vm1, %v5828_v51, %v5862_v10  ;;  %v4832_v56 = vsel %vm2705_vm1, %v5862_v10, %v5863_v36  ;;  %v4833_v14 = vsel %vm2705_vm1, %v5863_v36, %v5867_v25  ;;  %v7933_v15 = vunpack.i.l.bf16 %v7467_v50 }
 0x4cb   : > { %v7580_v62 = vmax.f32 %v7929_v45, %v4832_v56  ;;  %v7584_v44 = vmax.f32 %v7930_v22, %v4833_v14  ;;  %v5871_v47 = vpop.permute.xlu0 %5870  ;;  %5910 = vrot.lane.b32.xlu1 %v5909_v27, %s6005_s13  ;;  %5915 = vrot.lane.b32.xlu0 %v5914_v26, %s6005_s13  ;;  %v7593_v21 = vmax.f32 %v7932_v8, %v4831_v46  ;;  %v7935_v46 = vmax.f32 %v7409_v4, 0.0 }
 0x4cc   : > { %v5873_v13 = vunpack.i.h.bf16 %v5871_v47  ;;  %v5872_v32 = vunpack.i.l.bf16 %v5871_v47  ;;  %v5886_v49 = vpop.permute.xlu1 %5885  ;;  %v5919_v5 = vpack.i.bf16 %v7565_v29, %v7569_v24  ;;  %v4886_v51 = vsel %vm2705_vm1, %v5868_v28, %v7933_v15 }
 0x4cd   : > { %v5929_v59 = vpack.i.bf16 %v7584_v44, %v7580_v62  ;;  %v4834_v36 = vsel %vm2705_vm1, %v5867_v25, %v5868_v28  ;;  %v7607_v27 = vmax.f32 %v7934_v38, %v4830_v34  ;;  %v7936_v14 = vmax.f32 %v7421_v3, 0.0 }
 0x4ce   : > { %v4839_v10 = vsel %vm2705_vm1, %v5872_v32, %v5873_v13  ;;  %v4840_v52 = vsel %vm2705_vm1, %v5873_v13, %v5877_v42  ;;  %v5838_v25 = vunpack.i.h.bf16 %v7472_v16  ;;  %v5887_v28 = vunpack.i.l.bf16 %v5886_v49 }
 0x4cf   : > { %v7611_v56 = vmax.f32 %v7935_v46, %v4839_v10  ;;  %v7615_v26 = vmax.f32 %v7936_v14, %v4840_v52  ;;  %v5881_v50 = vpop.permute.xlu0 %5880  ;;  %5920 = vrot.lane.b32.xlu1 %v5919_v5, %s6005_s13  ;;  %5930 = vrot.lane.b32.xlu0 %v5929_v59, %s6005_s13  ;;  %v7622_v47 = vmax.f32 %v7937_v35, %v4886_v51  ;;  %v7938_v4 = vmax.f32 %v7352_v41, 0.0 }
 0x4d0   : > { %v5883_v45 = vunpack.i.h.bf16 %v5881_v50  ;;  %v5882_v22 = vunpack.i.l.bf16 %v5881_v50  ;;  %v5924_v3 = vpack.i.bf16 %v7593_v21, %v7607_v27  ;;  %v5878_v13 = vunpack.i.h.bf16 %v5876_v61 }
 0x4d1   : > { %v7626_v33 = vmax.f32 %v7938_v4, %v4834_v36  ;;  %v5944_v34 = vpack.i.bf16 %v7615_v26, %v7611_v56  ;;  %v4838_v8 = vsel %vm2705_vm1, %v5838_v25, %v5872_v32  ;;  %v7940_v41 = vmax.f32 %v7434_v18, 0.0 }
 0x4d2   : > { %v4846_v5 = vsel %vm2705_vm1, %v5882_v22, %v5883_v45  ;;  %v4847_v59 = vsel %vm2705_vm1, %v5883_v45, %v5887_v28  ;;  %v7941_v36 = vunpack.i.l.bf16 %v7472_v16  ;;  %v7942_v32 = vmax.f32 %v7294_v39, 0.0 }
 0x4d3   : > { %v7637_v15 = vmax.f32 %v7939_v0, %v4846_v5  ;;  %v7641_v51 = vmax.f32 %v7940_v41, %v4847_v59  ;;  %5925 = vrot.lane.b32.xlu1 %v5924_v3, %s6005_s13  ;;  %5945 = vrot.lane.b32.xlu0 %v5944_v34, %s6005_s13  ;;  %v5934_v57 = vpack.i.bf16 %v7622_v47, %v7626_v33  ;;  %v7943_v52 = vunpack.i.l.bf16 %v7490_v31 }
 0x4d4   : > { %v4837_v61 = vsel %vm2705_vm1, %v7941_v36, %v5838_v25  ;;  %v7650_v10 = vmax.f32 %v7942_v32, %v4838_v8  ;;  %v4841_v16 = vsel %vm2705_vm1, %v5877_v42, %v5878_v13  ;;  %v7944_v46 = vmax.f32 %v7287_v60, 0.0 }
 0x4d5   : > { %v5959_v18 = vpack.i.bf16 %v7641_v51, %v7637_v15  ;;  %v4887_v38 = vsel %vm2705_vm1, %v5878_v13, %v7943_v52  ;;  %v5848_v39 = vunpack.i.h.bf16 %v7496_v30  ;;  %v7945_v50 = vmax.f32 %v7400_v20, 0.0 }
 0x4d6   : > { %v7662_v14 = vmax.f32 %v7944_v46, %v4837_v61  ;;  %v7946_v31 = vmax.f32 %v7393_v11, 0.0  ;;  %v5888_v60 = vunpack.i.h.bf16 %v5886_v49  ;;  %v7947_v20 = vmax.f32 %v7305_v55, 0.0 }
 0x4d7   : > { %5935 = vrot.lane.b32.xlu1 %v5934_v57, %s6005_s13  ;;  %5960 = vrot.lane.b32.xlu0 %v5959_v18, %s6005_s13  ;;  %v7669_v25 = vmax.f32 %v7945_v50, %v4887_v38  ;;  %v4845_v35 = vsel %vm2705_vm1, %v5848_v39, %v5882_v22  ;;  %v4844_v4 = vsel %vm2705_vm1, %v5847_v9, %v5848_v39  ;;  %v7948_v34 = vunpack.i.l.bf16 %v7514_v2 }
 0x4d8   : > { %v7673_v45 = vmax.f32 %v7946_v31, %v4841_v16  ;;  %v5939_v42 = vpack.i.bf16 %v7650_v10, %v7662_v14  ;;  %v7684_v3 = vmax.f32 %v7947_v20, %v4845_v35  ;;  %v4848_v49 = vsel %vm2705_vm1, %v5887_v28, %v5888_v60 }
 0x4d9   : > { %v4888_v13 = vsel %vm2705_vm1, %v5888_v60, %v7948_v34  ;;  %v7949_v22 = vmax.f32 %v7300_v7, 0.0  ;;  %v7950_v30 = vmax.f32 %v7412_v17, 0.0  ;;  %v7951_v9 = vmax.f32 %v7404_v53, 0.0 }
 0x4da   : > { %v5949_v11 = vpack.i.bf16 %v7669_v25, %v7673_v45 }
 0x4db   : > { %5940 = vrot.lane.b32.xlu1 %v5939_v42, %s6005_s13  ;;  %v7694_v8 = vmax.f32 %v7949_v22, %v4844_v4  ;;  %v7699_v55 = vmax.f32 %v7950_v30, %v4888_v13  ;;  %v7703_v5 = vmax.f32 %v7951_v9, %v4848_v49 }
 0x4dd   : > { %v5954_v2 = vpack.i.bf16 %v7684_v3, %v7694_v8  ;;  %v5964_v7 = vpack.i.bf16 %v7699_v55, %v7703_v5 }
 0x4df   : > { %5950 = vrot.lane.b32.xlu1 %v5949_v11, %s6005_s13 }
 0x4e3   : > { %5955 = vrot.lane.b32.xlu1 %v5954_v2, %s6005_s13 }
 0x4e7   : > { %5965 = vrot.lane.b32.xlu1 %v5964_v7, %s6005_s13 }
 0x52d   : > { %v5891_v28 = vpop.permute.xlu0 %5890 }
 0x52e   : > { %v5893_v53 = vunpack.i.h.bf16 %v5891_v28  ;;  %v5892_v41 = vunpack.i.l.bf16 %v5891_v28 }
 0x530   : > { %v5018_v61 = vsel %vm4027_vm2, %v5892_v41, %v5893_v53 }
 0x531   : > { %v7711_v59 = vpop.permute.xlu0 %5895  ;;  %v5086_v31 = vmax.f32 %v7461_v37, %v5018_v61 }
 0x532   : > { %v5898_v52 = vunpack.i.h.bf16 %v7711_v59  ;;  %v5897_v38 = vunpack.i.l.bf16 %v7711_v59 }
 0x535   : > { %v7713_v17 = vpop.permute.xlu0 %5900 }
 0x539   : > { %v7715_v0 = vpop.permute.xlu0 %5905 }
 0x53d   : > { %v5911_v36 = vpop.permute.xlu1 %5910  ;;  %v5916_v18 = vpop.permute.xlu0 %5915 }
 0x53e   : > { %v5913_v32 = vunpack.i.h.bf16 %v5911_v36  ;;  %v5912_v57 = vunpack.i.l.bf16 %v5911_v36  ;;  %v5918_v16 = vunpack.i.h.bf16 %v5916_v18  ;;  %v5917_v46 = vunpack.i.l.bf16 %v5916_v18 }
 0x540   : > { %v5019_v39 = vsel %vm4027_vm2, %v5893_v53, %v5912_v57  ;;  %v5020_v50 = vsel %vm4027_vm2, %v5912_v57, %v5913_v32  ;;  %v5021_v35 = vsel %vm4027_vm2, %v5913_v32, %v5917_v46  ;;  %v5022_v20 = vsel %vm4027_vm2, %v5917_v46, %v5918_v16 }
 0x541   : > { %v5087_v42 = vmax.f32 %v7465_v23, %v5019_v39  ;;  %v5088_v60 = vmax.f32 %v7547_v48, %v5020_v50  ;;  %v5921_v4 = vpop.permute.xlu1 %5920  ;;  %v5089_v11 = vmax.f32 %v7551_v12, %v5021_v35  ;;  %v5025_v23 = vsel %vm4027_vm2, %v5897_v38, %v5898_v52  ;;  %v5931_v48 = vpop.permute.xlu0 %5930 }
 0x542   : > { %v5923_v34 = vunpack.i.h.bf16 %v5921_v4  ;;  %v5922_v37 = vunpack.i.l.bf16 %v5921_v4  ;;  %v5090_v2 = vmax.f32 %v7555_v43, %v5022_v20  ;;  %v5933_v53 = vunpack.i.h.bf16 %v5931_v48 }
 0x543   : > { %v5517_v13 = vpack.c.bf16 %v5087_v42, %v5086_v31  ;;  %v5518_v49 = vpack.c.bf16 %v5089_v11, %v5088_v60  ;;  %v5932_v36 = vunpack.i.l.bf16 %v5931_v48  ;;  %v5903_v57 = vunpack.i.h.bf16 %v7713_v17 }
 0x544   : > { %v5023_v22 = vsel %vm4027_vm2, %v5918_v16, %v5922_v37  ;;  %v5024_v30 = vsel %vm4027_vm2, %v5922_v37, %v5923_v34  ;;  %v5082_v9 = vsel %vm4027_vm2, %v5923_v34, %v5892_v41  ;;  %v5902_v43 = vunpack.i.l.bf16 %v7713_v17 }
 0x545   : > { %5214 = vst [vmem:[%s7730_s16] sm:$0xff] %v5517_v13  ;;  %v5091_v7 = vmax.f32 %v7559_v54, %v5023_v22  ;;  %v5092_v12 = vmax.f32 %v7569_v24, %v5024_v30  ;;  %v5093_v28 = vmax.f32 %v7565_v29, %v5082_v9  ;;  %v5926_v59 = vpop.permute.xlu1 %5925  ;;  %5215 = vst [vmem:[%s7730_s16 + $0x8] sm:$0xff] %v5518_v49  ;;  %v5946_v4 = vpop.permute.xlu0 %5945  ;;  %v5908_v30 = vunpack.i.h.bf16 %v7715_v0 }
 0x546   : > { %v5928_v61 = vunpack.i.h.bf16 %v5926_v59  ;;  %v5927_v32 = vunpack.i.l.bf16 %v5926_v59  ;;  %v5094_v29 = vmax.f32 %v7484_v40, %v5025_v23  ;;  %v5029_v17 = vsel %vm4027_vm2, %v5932_v36, %v5933_v53 }
 0x547   : > { %v5519_v41 = vpack.c.bf16 %v5091_v7, %v5090_v2  ;;  %v5520_v18 = vpack.c.bf16 %v5093_v28, %v5092_v12  ;;  %v5032_v40 = vsel %vm4027_vm2, %v5902_v43, %v5903_v57  ;;  %v5948_v13 = vunpack.i.h.bf16 %v5946_v4 }
 0x548   : > { %v5026_v54 = vsel %vm4027_vm2, %v5898_v52, %v5927_v32  ;;  %v5027_v24 = vsel %vm4027_vm2, %v5927_v32, %v5928_v61  ;;  %v5028_v16 = vsel %vm4027_vm2, %v5928_v61, %v5932_v36  ;;  %v5947_v48 = vunpack.i.l.bf16 %v5946_v4 }
 0x549   : > { %5216 = vst [vmem:[%s7730_s16 + $0x10] sm:$0xff] %v5519_v41  ;;  %5217 = vst [vmem:[%s7730_s16 + $0x18] sm:$0xff] %v5520_v18  ;;  %v5095_v46 = vmax.f32 %v7488_v6, %v5026_v54  ;;  %v5096_v39 = vmax.f32 %v7607_v27, %v5027_v24  ;;  %v5097_v50 = vmax.f32 %v7593_v21, %v5028_v16  ;;  %v5936_v31 = vpop.permute.xlu1 %5935  ;;  %v5961_v61 = vpop.permute.xlu0 %5960 }
 0x54a   : > { %v5938_v52 = vunpack.i.h.bf16 %v5936_v31  ;;  %v5937_v42 = vunpack.i.l.bf16 %v5936_v31  ;;  %v5098_v27 = vmax.f32 %v7580_v62, %v5029_v17  ;;  %v5907_v62 = vunpack.i.l.bf16 %v7715_v0 }
 0x54b   : > { %v5521_v60 = vpack.c.bf16 %v5095_v46, %v5094_v29  ;;  %v5522_v35 = vpack.c.bf16 %v5097_v50, %v5096_v39  ;;  %v5102_v7 = vmax.f32 %v7508_v19, %v5032_v40  ;;  %v5036_v0 = vsel %vm4027_vm2, %v5947_v48, %v5948_v13 }
 0x54c   : > { %v5030_v20 = vsel %vm4027_vm2, %v5933_v53, %v5937_v42  ;;  %v5031_v11 = vsel %vm4027_vm2, %v5937_v42, %v5938_v52  ;;  %v5083_v6 = vsel %vm4027_vm2, %v5938_v52, %v5897_v38  ;;  %v5039_v19 = vsel %vm4027_vm2, %v5907_v62, %v5908_v30 }
 0x54d   : > { %5218 = vst [vmem:[%s7730_s16 + $0x20] sm:$0xff] %v5521_v60  ;;  %5219 = vst [vmem:[%s7730_s16 + $0x28] sm:$0xff] %v5522_v35  ;;  %v5099_v21 = vmax.f32 %v7584_v44, %v5030_v20  ;;  %v5100_v34 = vmax.f32 %v7626_v33, %v5031_v11  ;;  %v5101_v37 = vmax.f32 %v7622_v47, %v5083_v6  ;;  %v5941_v23 = vpop.permute.xlu1 %5940  ;;  %v5963_v29 = vunpack.i.h.bf16 %v5961_v61 }
 0x54e   : > { %v5943_v49 = vunpack.i.h.bf16 %v5941_v23  ;;  %v5942_v22 = vunpack.i.l.bf16 %v5941_v23  ;;  %v5962_v46 = vunpack.i.l.bf16 %v5961_v61  ;;  %v5110_v42 = vmax.f32 %v7530_v63, %v5039_v19 }
 0x54f   : > { %v5523_v38 = vpack.c.bf16 %v5099_v21, %v5098_v27  ;;  %v5524_v9 = vpack.c.bf16 %v5101_v37, %v5100_v34 }
 0x550   : > { %v5033_v2 = vsel %vm4027_vm2, %v5903_v57, %v5942_v22  ;;  %v5034_v44 = vsel %vm4027_vm2, %v5942_v22, %v5943_v49  ;;  %v5035_v33 = vsel %vm4027_vm2, %v5943_v49, %v5947_v48  ;;  %v5043_v35 = vsel %vm4027_vm2, %v5962_v46, %v5963_v29 }
 0x551   : > { %5220 = vst [vmem:[%s7730_s16 + $0x30] sm:$0xff] %v5523_v38  ;;  %5221 = vst [vmem:[%s7730_s16 + $0x38] sm:$0xff] %v5524_v9  ;;  %v5103_v47 = vmax.f32 %v7512_v1, %v5033_v2  ;;  %v5104_v12 = vmax.f32 %v7662_v14, %v5034_v44  ;;  %v5105_v28 = vmax.f32 %v7650_v10, %v5035_v33  ;;  %v5951_v59 = vpop.permute.xlu1 %5950 }
 0x552   : > { %v5953_v53 = vunpack.i.h.bf16 %v5951_v59  ;;  %v5952_v36 = vunpack.i.l.bf16 %v5951_v59  ;;  %v5106_v14 = vmax.f32 %v7611_v56, %v5036_v0 }
 0x553   : > { %v5525_v32 = vpack.c.bf16 %v5103_v47, %v5102_v7  ;;  %v5526_v57 = vpack.c.bf16 %v5105_v28, %v5104_v12 }
 0x554   : > { %v5037_v41 = vsel %vm4027_vm2, %v5948_v13, %v5952_v36  ;;  %v5038_v18 = vsel %vm4027_vm2, %v5952_v36, %v5953_v53  ;;  %v5084_v1 = vsel %vm4027_vm2, %v5953_v53, %v5902_v43 }
 0x555   : > { %5222 = vst [vmem:[%s7730_s16 + $0x40] sm:$0xff] %v5525_v32  ;;  %5223 = vst [vmem:[%s7730_s16 + $0x48] sm:$0xff] %v5526_v57  ;;  %v5107_v10 = vmax.f32 %v7615_v26, %v5037_v41  ;;  %v5108_v54 = vmax.f32 %v7673_v45, %v5038_v18  ;;  %v5109_v24 = vmax.f32 %v7669_v25, %v5084_v1  ;;  %v5956_v16 = vpop.permute.xlu1 %5955 }
 0x556   : > { %v5958_v39 = vunpack.i.h.bf16 %v5956_v16  ;;  %v5957_v50 = vunpack.i.l.bf16 %v5956_v16 }
 0x557   : > { %v5527_v31 = vpack.c.bf16 %v5107_v10, %v5106_v14  ;;  %v5528_v17 = vpack.c.bf16 %v5109_v24, %v5108_v54 }
 0x558   : > { %v5040_v43 = vsel %vm4027_vm2, %v5908_v30, %v5957_v50  ;;  %v5041_v56 = vsel %vm4027_vm2, %v5957_v50, %v5958_v39  ;;  %v5042_v52 = vsel %vm4027_vm2, %v5958_v39, %v5962_v46 }
 0x559   : > { %5224 = vst [vmem:[%s7730_s16 + $0x50] sm:$0xff] %v5527_v31  ;;  %5225 = vst [vmem:[%s7730_s16 + $0x58] sm:$0xff] %v5528_v17  ;;  %v5111_v26 = vmax.f32 %v7534_v58, %v5040_v43  ;;  %v5112_v25 = vmax.f32 %v7694_v8, %v5041_v56  ;;  %v5113_v45 = vmax.f32 %v7684_v3, %v5042_v52  ;;  %v5966_v60 = vpop.permute.xlu1 %5965 }
 0x55a   : > { %v5968_v4 = vunpack.i.h.bf16 %v5966_v60  ;;  %v5967_v40 = vunpack.i.l.bf16 %v5966_v60  ;;  %v5114_v58 = vmax.f32 %v7637_v15, %v5043_v35 }
 0x55b   : > { %v5529_v20 = vpack.c.bf16 %v5111_v26, %v5110_v42  ;;  %v5530_v11 = vpack.c.bf16 %v5113_v45, %v5112_v25 }
 0x55c   : > { %v5044_v63 = vsel %vm4027_vm2, %v5963_v29, %v5967_v40  ;;  %v5045_v6 = vsel %vm4027_vm2, %v5967_v40, %v5968_v4  ;;  %v5085_v27 = vsel %vm4027_vm2, %v5968_v4, %v5907_v62 }
 0x55d   : > { %5226 = vst [vmem:[%s7730_s16 + $0x60] sm:$0xff] %v5529_v20  ;;  %5227 = vst [vmem:[%s7730_s16 + $0x68] sm:$0xff] %v5530_v11  ;;  %v5115_v3 = vmax.f32 %v7641_v51, %v5044_v63  ;;  %v5116_v8 = vmax.f32 %v7703_v5, %v5045_v6  ;;  %v5117_v21 = vmax.f32 %v7699_v55, %v5085_v27 }
 0x55f   : > { %v5531_v34 = vpack.c.bf16 %v5115_v3, %v5114_v58  ;;  %v5532_v37 = vpack.c.bf16 %v5117_v21, %v5116_v8 }
 0x561   : > { %5228 = vst [vmem:[%s7730_s16 + $0x70] sm:$0xff] %v5531_v34  ;;  %5229 = vst [vmem:[%s7730_s16 + $0x78] sm:$0xff] %v5532_v37 }
 0x562 PF: > { %s15_s18 = sadd.s32 1, %s5994_s18  }
 0x563   : > { %p12_p4 = scmp.ge.s32.totalorder %s15_s18, 4  }
 0x565   :  { %14 = sbr.rel (!%p12_p4) target bundleno = 1 (0x1), region = 78 }

// kernel: simple_cnn_forward.3
= control target key start
LH: loop header
LB: loop body
LE: loop exit
PB: predicated region body
PF: predicated region fallthrough
CT: control target
= control target key end

     0   :  { %v1073_v28 = vlaneseq  ;;  %v7770_v36 = vmov 1966171168   ;;  %s9508_s0 = inlined_call_operand.vmem [shape: bf16[2,8192], index: 0, kind: input, shape index: {}]   ;;  %s9509_s1 = inlined_call_operand.vmem [shape: bf16[8192,64], index: 1, kind: input, shape index: {}]   ;;  %s9510_s2 = inlined_call_operand.vmem [shape: f32[1,64], index: 2, kind: input, shape index: {}]   ;;  %s9511_s3 = inlined_call_operand.vmem [shape: bf16[64,10], index: 3, kind: input, shape index: {}]   ;;  %s9512_s4 = inlined_call_operand.vmem [shape: f32[1,10], index: 4, kind: input, shape index: {}]   ;;  %s9513_s5 = inlined_call_operand.hbm [shape: f32[2,10], index: 5, kind: output, shape index: {}]  }
   0x1   :  { %v7222_v0 = vld [vmem:[%s9509_s1 + $0x40] sm:$0xff]   ;;  %v7226_v4 = vld [vmem:[%s9509_s1 + $0x48] sm:$0xff]   ;;  %v7230_v8 = vld [vmem:[%s9509_s1 + $0x50] sm:$0xff]   ;;  %v1071_v37 = vunpack.c.l.s4 %v7770_v36 }
   0x2   :  { %v7223_v1 = vld [vmem:[%s9509_s1 + $0xc0] sm:$0xff]   ;;  %6497 = vmatprep.subr.bf16.mxu0 %v7222_v0  ;;  %v7227_v5 = vld [vmem:[%s9509_s1 + $0xc8] sm:$0xff]   ;;  %v7231_v9 = vld [vmem:[%s9509_s1 + $0xd0] sm:$0xff]   ;;  %v1074_v33 = vshrl.u32 %v1073_v28, 7 }
   0x3   :  { %v7224_v2 = vld [vmem:[%s9509_s1] sm:$0xff]   ;;  %6519 = vmatprep.subr.bf16.mxu1 %v7223_v1  ;;  %v7228_v6 = vld [vmem:[%s9509_s1 + $0x8] sm:$0xff]   ;;  %v7232_v10 = vld [vmem:[%s9509_s1 + $0x10] sm:$0xff]   ;;  %v1072_v40 = vunpack.c.0.s8 %v1071_v37 }
   0x4   :  { %v7225_v3 = vld [vmem:[%s9509_s1 + $0x80] sm:$0xff]   ;;  %6498 = vmatpush3.bf16.msra.mxu0 %v7224_v2  ;;  %v7229_v7 = vld [vmem:[%s9509_s1 + $0x88] sm:$0xff]   ;;  %v7233_v11 = vld [vmem:[%s9509_s1 + $0x90] sm:$0xff]  }
   0x5   :  { %6520 = vmatpush3.bf16.msra.mxu1 %v7225_v3  ;;  %6499 = vmatprep.subr.bf16.mxu0 %v7226_v4  ;;  %v7234_v12 = vld [vmem:[%s9509_s1 + $0x58] sm:$0xff]   ;;  %v7238_v16 = vld [vmem:[%s9509_s1 + $0x60] sm:$0xff]   ;;  %v7242_v20 = vld [vmem:[%s9509_s1 + $0x68] sm:$0xff]   ;;  %v7909_v41 = vsub.s32 %v1072_v40, %v1074_v33 }
   0x6   :  { %6521 = vmatprep.subr.bf16.mxu1 %v7227_v5  ;;  %v7235_v13 = vld [vmem:[%s9509_s1 + $0xd8] sm:$0xff]   ;;  %v7239_v17 = vld [vmem:[%s9509_s1 + $0xe0] sm:$0xff]   ;;  %v7243_v21 = vld [vmem:[%s9509_s1 + $0xe8] sm:$0xff]  }
   0x7   :  { %v7236_v14 = vld [vmem:[%s9509_s1 + $0x18] sm:$0xff]   ;;  %v7240_v18 = vld [vmem:[%s9509_s1 + $0x20] sm:$0xff]   ;;  %v7244_v22 = vld [vmem:[%s9509_s1 + $0x28] sm:$0xff]  }
   0x8   :  { %6500 = vmatpush3.bf16.msra.mxu0 %v7228_v6  ;;  %v7237_v15 = vld [vmem:[%s9509_s1 + $0x98] sm:$0xff]   ;;  %v7241_v19 = vld [vmem:[%s9509_s1 + $0xa0] sm:$0xff]   ;;  %v7245_v23 = vld [vmem:[%s9509_s1 + $0xa8] sm:$0xff]  }
   0x9   :  { %6522 = vmatpush3.bf16.msra.mxu1 %v7229_v7  ;;  %6501 = vmatprep.subr.bf16.mxu0 %v7230_v8  ;;  %v7246_v24 = vld [vmem:[%s9509_s1 + $0x70] sm:$0xff]   ;;  %v7250_v29 = vld [vmem:[%s9509_s1 + $0x78] sm:$0xff]   ;;  %v22_v34 = vld [vmem:[%s9508_s0] sm:$0xff] }
   0xa   :  { %6523 = vmatprep.subr.bf16.mxu1 %v7231_v9  ;;  %v7247_v25 = vld [vmem:[%s9509_s1 + $0xf0] sm:$0xff]   ;;  %v7251_v30 = vld [vmem:[%s9509_s1 + $0xf8] sm:$0xff]   ;;  %v7255_v35 = vld [vmem:[%s9509_s1 + $0x140] sm:$0xff]   ;;  %v1069_v39 = vcombine.high %v22_v34, %v22_v34  ;;  %v1076_v42 = vrot.slane %v22_v34, %v7909_v41 }
   0xb   :  { %v7248_v26 = vld [vmem:[%s9509_s1 + $0x30] sm:$0xff]   ;;  %v7252_v31 = vld [vmem:[%s9509_s1 + $0x38] sm:$0xff]   ;;  %v7256_v38 = vld [vmem:[%s9509_s1 + $0x1c0] sm:$0xff]  }
   0xc   :  { %6502 = vmatpush3.bf16.msra.mxu0 %v7232_v10  ;;  %v7249_v27 = vld [vmem:[%s9509_s1 + $0xb0] sm:$0xff]   ;;  %v7253_v32 = vld [vmem:[%s9509_s1 + $0xb8] sm:$0xff]   ;;  %v7913_v43 = vrot.slane %v1069_v39, %v7909_v41  ;;  %v1084_v44 = vcombine.high %v1076_v42, %v1076_v42  ;;  %v1092_v45 = vrot.slane %v1076_v42, %v7909_v41  ;;  %v7257_v47 = vld [vmem:[%s9509_s1 + $0x100] sm:$0xff]  }
   0xd   :  { %6524 = vmatpush3.bf16.msra.mxu1 %v7233_v11  ;;  %6503 = vmatprep.subr.bf16.mxu0 %v7234_v12  ;;  %v7258_v49 = vld [vmem:[%s9509_s1 + $0x180] sm:$0xff]   ;;  %v7259_v52 = vld [vmem:[%s9509_s1 + $0x148] sm:$0xff]   ;;  %v7263_v58 = vld [vmem:[%s9509_s1 + $0x150] sm:$0xff]  }
   0xe   :  { %6525 = vmatprep.subr.bf16.mxu1 %v7235_v13  ;;  %v1085_v46 = vcombine.high %v7913_v43, %v7913_v43  ;;  %v1106_v48 = vrot.slane %v1084_v44, %v7909_v41  ;;  %v1114_v51 = vcombine.high %v1092_v45, %v1092_v45  ;;  %v7260_v54 = vld [vmem:[%s9509_s1 + $0x1c8] sm:$0xff]   ;;  %v7264_v59 = vld [vmem:[%s9509_s1 + $0x1d0] sm:$0xff]   ;;  %v7267_v62 = vld [vmem:[%s9509_s1 + $0x158] sm:$0xff]  }
   0xf   :  { %v7261_v55 = vld [vmem:[%s9509_s1 + $0x108] sm:$0xff]   ;;  %v7265_v60 = vld [vmem:[%s9509_s1 + $0x110] sm:$0xff]   ;;  %v7268_v63 = vld [vmem:[%s9509_s1 + $0x1d8] sm:$0xff]  }
  0x10   :  { %6504 = vmatpush3.bf16.msra.mxu0 %v7236_v14  ;;  %v1113_v50 = vrot.slane %v1085_v46, %v7909_v41  ;;  %4629 = vmatprep.mubr.bf16.mxu0 %v1106_v48  ;;  %v1116_v53 = vcombine.high %v1106_v48, %v1106_v48  ;;  %v7262_v57 = vld [vmem:[%s9509_s1 + $0x188] sm:$0xff]   ;;  %v7266_v61 = vld [vmem:[%s9509_s1 + $0x190] sm:$0xff]   ;;  %v7269_v0 = vld [vmem:[%s9509_s1 + $0x118] sm:$0xff]  }
  0x11   :  { %6526 = vmatpush3.bf16.msra.mxu1 %v7237_v15  ;;  %6505 = vmatprep.subr.bf16.mxu0 %v7238_v16  ;;  %v7270_v1 = vld [vmem:[%s9509_s1 + $0x198] sm:$0xff]   ;;  %v7271_v2 = vld [vmem:[%s9509_s1 + $0x160] sm:$0xff]   ;;  %v7275_v6 = vld [vmem:[%s9509_s1 + $0x168] sm:$0xff]  }
  0x12   :  { %6527 = vmatprep.subr.bf16.mxu1 %v7239_v17  ;;  %v1117_v56 = vcombine.high %v1113_v50, %v1113_v50  ;;  %4669 = vmatprep.mubr.bf16.mxu1 %v1116_v53  ;;  %v7272_v3 = vld [vmem:[%s9509_s1 + $0x1e0] sm:$0xff]   ;;  %v7276_v7 = vld [vmem:[%s9509_s1 + $0x1e8] sm:$0xff]   ;;  %v7279_v10 = vld [vmem:[%s9509_s1 + $0x170] sm:$0xff]  }
  0x13   :  { %v7273_v4 = vld [vmem:[%s9509_s1 + $0x120] sm:$0xff]   ;;  %v7277_v8 = vld [vmem:[%s9509_s1 + $0x128] sm:$0xff]   ;;  %v7280_v11 = vld [vmem:[%s9509_s1 + $0x1f0] sm:$0xff]  }
  0x14   :  { %6506 = vmatpush3.bf16.msra.mxu0 %v7240_v18  ;;  %v7274_v5 = vld [vmem:[%s9509_s1 + $0x1a0] sm:$0xff]   ;;  %v7278_v9 = vld [vmem:[%s9509_s1 + $0x1a8] sm:$0xff]   ;;  %v7281_v12 = vld [vmem:[%s9509_s1 + $0x130] sm:$0xff]   ;;  %v1099_v18 = vrot.slane %v7913_v43, %v7909_v41 }
  0x15   :  { %6528 = vmatpush3.bf16.msra.mxu1 %v7241_v19  ;;  %6507 = vmatprep.subr.bf16.mxu0 %v7242_v20  ;;  %v7282_v13 = vld [vmem:[%s9509_s1 + $0x1b0] sm:$0xff]   ;;  %v7283_v14 = vld [vmem:[%s9509_s1 + $0x178] sm:$0xff]   ;;  %v7287_v19 = vld [vmem:[%s9509_s1 + $0x240] sm:$0xff]  }
  0x16   :  { %6529 = vmatprep.subr.bf16.mxu1 %v7243_v21  ;;  %v7284_v15 = vld [vmem:[%s9509_s1 + $0x1f8] sm:$0xff]   ;;  %v7288_v20 = vld [vmem:[%s9509_s1 + $0x2c0] sm:$0xff]   ;;  %v7295_v28 = vld [vmem:[%s9509_s1 + $0x250] sm:$0xff]  }
  0x17   :  { %v7285_v16 = vld [vmem:[%s9509_s1 + $0x138] sm:$0xff]   ;;  %v7289_v21 = vld [vmem:[%s9509_s1 + $0x200] sm:$0xff]   ;;  %v7307_v40 = vld [vmem:[%s9509_s1 + $0x268] sm:$0xff]  }
  0x18   :  { %6508 = vmatpush3.bf16.msra.mxu0 %v7244_v22  ;;  %v7286_v17 = vld [vmem:[%s9509_s1 + $0x1b8] sm:$0xff]   ;;  %v7290_v22 = vld [vmem:[%s9509_s1 + $0x280] sm:$0xff]   ;;  %v7308_v42 = vld [vmem:[%s9509_s1 + $0x2e8] sm:$0xff]  }
  0x19   :  { %6530 = vmatpush3.bf16.msra.mxu1 %v7245_v23  ;;  %6509 = vmatprep.subr.bf16.mxu0 %v7246_v24  ;;  %v1115_v23 = vcombine.high %v1099_v18, %v1099_v18  ;;  %v7291_v24 = vld [vmem:[%s9509_s1 + $0x248] sm:$0xff]   ;;  %v7300_v33 = vld [vmem:[%s9509_s1 + $0x2d8] sm:$0xff]   ;;  %v7303_v36 = vld [vmem:[%s9509_s1 + $0x260] sm:$0xff]  }
  0x1a   :  { %6531 = vmatprep.subr.bf16.mxu1 %v7247_v25  ;;  %v7292_v25 = vld [vmem:[%s9509_s1 + $0x2c8] sm:$0xff]   ;;  %v7301_v34 = vld [vmem:[%s9509_s1 + $0x218] sm:$0xff]   ;;  %v7304_v37 = vld [vmem:[%s9509_s1 + $0x2e0] sm:$0xff]  }
  0x1b   :  { %v7306_v39 = vld [vmem:[%s9509_s1 + $0x2a0] sm:$0xff]   ;;  %v7309_v43 = vld [vmem:[%s9509_s1 + $0x228] sm:$0xff]  }
  0x1c   :  { %6510 = vmatpush3.bf16.msra.mxu0 %v7248_v26  ;;  %v7293_v26 = vld [vmem:[%s9509_s1 + $0x208] sm:$0xff]  }
  0x1d   :  { %6532 = vmatpush3.bf16.msra.mxu1 %v7249_v27  ;;  %6511 = vmatprep.subr.bf16.mxu0 %v7250_v29  ;;  %v7294_v27 = vld [vmem:[%s9509_s1 + $0x288] sm:$0xff]   ;;  %v7296_v29 = vld [vmem:[%s9509_s1 + $0x2d0] sm:$0xff]  }
  0x1e   :  { %6533 = vmatprep.subr.bf16.mxu1 %v7251_v30  ;;  %v7297_v30 = vld [vmem:[%s9509_s1 + $0x210] sm:$0xff]   ;;  %v7310_v44 = vld [vmem:[%s9509_s1 + $0x2a8] sm:$0xff]  }
  0x1f   :  { %v23_v46 = vld [vmem:[%s9508_s0 + $0x8] sm:$0xff] }
  0x20   :  { %6512 = vmatpush3.bf16.msra.mxu0 %v7252_v31  ;;  %v7298_v31 = vld [vmem:[%s9509_s1 + $0x290] sm:$0xff]   ;;  %v1125_v48 = vrot.slane %v23_v46, %v7909_v41 }
  0x21   :  { %6534 = vmatpush3.bf16.msra.mxu1 %v7253_v32  ;;  %6541 = vmatprep.subr.bf16.mxu0 %v7255_v35  ;;  %v7299_v32 = vld [vmem:[%s9509_s1 + $0x258] sm:$0xff]  }
  0x22   :  { %6563 = vmatprep.subr.bf16.mxu1 %v7256_v38  ;;  %v7302_v35 = vld [vmem:[%s9509_s1 + $0x298] sm:$0xff]   ;;  %v7305_v38 = vld [vmem:[%s9509_s1 + $0x220] sm:$0xff]  }
  0x23   :  { %4630 = vmatmul.mubr.bf16.vlgmr.msra.gmra.mrb[0].mxu0 %v1092_v45  ;;  %v7311_v45 = vld [vmem:[%s9509_s1 + $0x270] sm:$0xff]  }
  0x24   :  { %6542 = vmatpush3.bf16.msra.mxu0 %v7257_v47  ;;  %4670 = vmatmul.mubr.bf16.vlgmr.msra.gmra.mrb[0].mxu1 %v1114_v51  ;;  %v7312_v47 = vld [vmem:[%s9509_s1 + $0x2f0] sm:$0xff]  }
  0x25   :  { %6543 = vmatprep.subr.bf16.mxu0 %v7259_v52  ;;  %6564 = vmatpush3.bf16.msra.mxu1 %v7258_v49  ;;  %v1118_v49 = vcombine.high %v23_v46, %v23_v46  ;;  %v7314_v51 = vld [vmem:[%s9509_s1 + $0x2b0] sm:$0xff]   ;;  %v1133_v52 = vcombine.high %v1125_v48, %v1125_v48 }
  0x26   :  { %4709 = vmatprep.mubr.bf16.mxu0 %v1113_v50  ;;  %6565 = vmatprep.subr.bf16.mxu1 %v7260_v54  ;;  %v7313_v50 = vld [vmem:[%s9509_s1 + $0x230] sm:$0xff]   ;;  %v7315_v54 = vld [vmem:[%s9509_s1 + $0x278] sm:$0xff]  }
  0x27   :  { %4749 = vmatprep.mubr.bf16.mxu1 %v1117_v56  ;;  %v8101_v53 = vrot.slane %v1118_v49, %v7909_v41  ;;  %v1155_v56 = vrot.slane %v1133_v52, %v7909_v41  ;;  %v7362_v46 = vld [vmem:[%s9509_s1 + $0x410] sm:$0xff]   ;;  %v7365_v49 = vld [vmem:[%s9509_s1 + $0x4d8] sm:$0xff]   ;;  %v7368_v52 = vld [vmem:[%s9509_s1 + $0x460] sm:$0xff]  }
  0x28   :  { %6544 = vmatpush3.bf16.msra.mxu0 %v7261_v55  ;;  %v7316_v55 = vld [vmem:[%s9509_s1 + $0x2f8] sm:$0xff]  }
  0x29   :  { %6545 = vmatprep.subr.bf16.mxu0 %v7263_v58  ;;  %6566 = vmatpush3.bf16.msra.mxu1 %v7262_v57  ;;  %v1134_v57 = vcombine.high %v8101_v53, %v8101_v53  ;;  %v7317_v58 = vld [vmem:[%s9509_s1 + $0x238] sm:$0xff]  }
  0x2a   :  { %6567 = vmatprep.subr.bf16.mxu1 %v7264_v59  ;;  %v7318_v59 = vld [vmem:[%s9509_s1 + $0x2b8] sm:$0xff]  }
  0x2c   :  { %6546 = vmatpush3.bf16.msra.mxu0 %v7265_v60  ;;  %v1165_v60 = vcombine.high %v1155_v56, %v1155_v56 }
  0x2d   :  { %6547 = vmatprep.subr.bf16.mxu0 %v7267_v62  ;;  %6568 = vmatpush3.bf16.msra.mxu1 %v7266_v61  ;;  %v1141_v61 = vrot.slane %v1125_v48, %v7909_v41  ;;  %v7319_v62 = vld [vmem:[%s9509_s1 + $0x340] sm:$0xff]   ;;  %v7364_v48 = vld [vmem:[%s9509_s1 + $0x458] sm:$0xff]  }
  0x2e   :  { %6569 = vmatprep.subr.bf16.mxu1 %v7268_v63  ;;  %v7320_v63 = vld [vmem:[%s9509_s1 + $0x3c0] sm:$0xff]  }
  0x30   :  { %6548 = vmatpush3.bf16.msra.mxu0 %v7269_v0  ;;  %v1162_v0 = vrot.slane %v1134_v57, %v7909_v41  ;;  %v7373_v57 = vld [vmem:[%s9509_s1 + $0x4e8] sm:$0xff]  }
  0x31   :  { %6549 = vmatprep.subr.bf16.mxu0 %v7271_v2  ;;  %6570 = vmatpush3.bf16.msra.mxu1 %v7270_v1  ;;  %v7321_v1 = vld [vmem:[%s9509_s1 + $0x300] sm:$0xff]  }
  0x32   :  { %6571 = vmatprep.subr.bf16.mxu1 %v7272_v3  ;;  %v7322_v2 = vld [vmem:[%s9509_s1 + $0x380] sm:$0xff]   ;;  %v1163_v3 = vcombine.high %v1141_v61, %v1141_v61 }
  0x34   :  { %6550 = vmatpush3.bf16.msra.mxu0 %v7273_v4  ;;  %v7323_v4 = vld [vmem:[%s9509_s1 + $0x348] sm:$0xff]  }
  0x35   :  { %6551 = vmatprep.subr.bf16.mxu0 %v7275_v6  ;;  %6572 = vmatpush3.bf16.msra.mxu1 %v7274_v5  ;;  %v7324_v5 = vld [vmem:[%s9509_s1 + $0x3c8] sm:$0xff]   ;;  %v1166_v6 = vcombine.high %v1162_v0, %v1162_v0 }
  0x36   :  { %6573 = vmatprep.subr.bf16.mxu1 %v7276_v7  ;;  %v7325_v7 = vld [vmem:[%s9509_s1 + $0x308] sm:$0xff]  }
  0x38   :  { %6552 = vmatpush3.bf16.msra.mxu0 %v7277_v8  ;;  %v7326_v8 = vld [vmem:[%s9509_s1 + $0x388] sm:$0xff]  }
  0x39   :  { %6553 = vmatprep.subr.bf16.mxu0 %v7279_v10  ;;  %6574 = vmatpush3.bf16.msra.mxu1 %v7278_v9  ;;  %v7327_v9 = vld [vmem:[%s9509_s1 + $0x350] sm:$0xff]  }
  0x3a   :  { %6575 = vmatprep.subr.bf16.mxu1 %v7280_v11  ;;  %v7328_v10 = vld [vmem:[%s9509_s1 + $0x3d0] sm:$0xff]  }
  0x3b   :  { %v7329_v11 = vld [vmem:[%s9509_s1 + $0x310] sm:$0xff]  }
  0x3c   :  { %6554 = vmatpush3.bf16.msra.mxu0 %v7281_v12  ;;  %v7330_v12 = vld [vmem:[%s9509_s1 + $0x390] sm:$0xff]  }
  0x3d   :  { %6555 = vmatprep.subr.bf16.mxu0 %v7283_v14  ;;  %6576 = vmatpush3.bf16.msra.mxu1 %v7282_v13  ;;  %v7331_v13 = vld [vmem:[%s9509_s1 + $0x358] sm:$0xff]  }
  0x3e   :  { %6577 = vmatprep.subr.bf16.mxu1 %v7284_v15  ;;  %v7332_v14 = vld [vmem:[%s9509_s1 + $0x3d8] sm:$0xff]  }
  0x3f   :  { %v7333_v15 = vld [vmem:[%s9509_s1 + $0x318] sm:$0xff]  }
  0x40   :  { %6556 = vmatpush3.bf16.msra.mxu0 %v7285_v16  ;;  %v7334_v16 = vld [vmem:[%s9509_s1 + $0x398] sm:$0xff]  }
  0x41   :  { %6585 = vmatprep.subr.bf16.mxu0 %v7287_v19  ;;  %6578 = vmatpush3.bf16.msra.mxu1 %v7286_v17  ;;  %v7335_v17 = vld [vmem:[%s9509_s1 + $0x360] sm:$0xff]  }
  0x42   :  { %6607 = vmatprep.subr.bf16.mxu1 %v7288_v20  ;;  %v7337_v19 = vld [vmem:[%s9509_s1 + $0x320] sm:$0xff]  }
  0x43   :  { %4710 = vmatmul.mubr.bf16.vlgmr.msra.gmra.mrb[4].mxu0 %v1099_v18  ;;  %v7336_v18 = vld [vmem:[%s9509_s1 + $0x3e0] sm:$0xff]  }
  0x44   :  { %6586 = vmatpush3.bf16.msra.mxu0 %v7289_v21  ;;  %4750 = vmatmul.mubr.bf16.vlgmr.msra.gmra.mrb[4].mxu1 %v1115_v23  ;;  %v7338_v20 = vld [vmem:[%s9509_s1 + $0x3a0] sm:$0xff]   ;;  %v7339_v21 = vld [vmem:[%s9509_s1 + $0x368] sm:$0xff]  }
  0x45   :  { %6587 = vmatprep.subr.bf16.mxu0 %v7291_v24  ;;  %6608 = vmatpush3.bf16.msra.mxu1 %v7290_v22  ;;  %v7340_v22 = vld [vmem:[%s9509_s1 + $0x3e8] sm:$0xff]  }
  0x46   :  { %6609 = vmatprep.subr.bf16.mxu1 %v7292_v25  ;;  %4789 = vmatprep.mubr.bf16.mxu0 %v1155_v56  ;;  %v7341_v23 = vld [vmem:[%s9509_s1 + $0x328] sm:$0xff]   ;;  %v7343_v25 = vld [vmem:[%s9509_s1 + $0x370] sm:$0xff]  }
  0x47   :  { %4829 = vmatprep.mubr.bf16.mxu1 %v1165_v60  ;;  %v7342_v24 = vld [vmem:[%s9509_s1 + $0x3a8] sm:$0xff]   ;;  %v7376_v60 = vld [vmem:[%s9509_s1 + $0x470] sm:$0xff]  }
  0x48   :  { %6588 = vmatpush3.bf16.msra.mxu0 %v7293_v26  ;;  %v7344_v26 = vld [vmem:[%s9509_s1 + $0x3f0] sm:$0xff]   ;;  %v7372_v56 = vld [vmem:[%s9509_s1 + $0x468] sm:$0xff]  }
  0x49   :  { %6589 = vmatprep.subr.bf16.mxu0 %v7295_v28  ;;  %6610 = vmatpush3.bf16.msra.mxu1 %v7294_v27  ;;  %v7345_v27 = vld [vmem:[%s9509_s1 + $0x330] sm:$0xff]  }
  0x4a   :  { %6611 = vmatprep.subr.bf16.mxu1 %v7296_v29  ;;  %v7346_v28 = vld [vmem:[%s9509_s1 + $0x3b0] sm:$0xff]   ;;  %v7347_v29 = vld [vmem:[%s9509_s1 + $0x378] sm:$0xff]  }
  0x4c   :  { %6590 = vmatpush3.bf16.msra.mxu0 %v7297_v30  ;;  %v7348_v30 = vld [vmem:[%s9509_s1 + $0x3f8] sm:$0xff]  }
  0x4d   :  { %6591 = vmatprep.subr.bf16.mxu0 %v7299_v32  ;;  %6612 = vmatpush3.bf16.msra.mxu1 %v7298_v31  ;;  %v7349_v31 = vld [vmem:[%s9509_s1 + $0x338] sm:$0xff]  }
  0x4e   :  { %6613 = vmatprep.subr.bf16.mxu1 %v7300_v33  ;;  %v7350_v32 = vld [vmem:[%s9509_s1 + $0x3b8] sm:$0xff]   ;;  %v1148_v33 = vrot.slane %v8101_v53, %v7909_v41  ;;  %v7369_v53 = vld [vmem:[%s9509_s1 + $0x4e0] sm:$0xff]  }
  0x50   :  { %6592 = vmatpush3.bf16.msra.mxu0 %v7301_v34  ;;  %v7352_v34 = vld [vmem:[%s9509_s1 + $0x440] sm:$0xff]  }
  0x51   :  { %6593 = vmatprep.subr.bf16.mxu0 %v7303_v36  ;;  %6614 = vmatpush3.bf16.msra.mxu1 %v7302_v35  ;;  %v7353_v35 = vld [vmem:[%s9509_s1 + $0x4c0] sm:$0xff]  }
  0x52   :  { %6615 = vmatprep.subr.bf16.mxu1 %v7304_v37  ;;  %v7354_v36 = vld [vmem:[%s9509_s1 + $0x400] sm:$0xff]  }
  0x53   :  { %v7355_v37 = vld [vmem:[%s9509_s1 + $0x480] sm:$0xff]  }
  0x54   :  { %6594 = vmatpush3.bf16.msra.mxu0 %v7305_v38  ;;  %v1164_v38 = vcombine.high %v1148_v33, %v1148_v33 }
  0x55   :  { %6595 = vmatprep.subr.bf16.mxu0 %v7307_v40  ;;  %6616 = vmatpush3.bf16.msra.mxu1 %v7306_v39  ;;  %v7356_v39 = vld [vmem:[%s9509_s1 + $0x448] sm:$0xff]  }
  0x56   :  { %6617 = vmatprep.subr.bf16.mxu1 %v7308_v42  ;;  %v7357_v40 = vld [vmem:[%s9509_s1 + $0x4c8] sm:$0xff]  }
  0x57   :  { %v7358_v42 = vld [vmem:[%s9509_s1 + $0x408] sm:$0xff]  }
  0x58   :  { %6596 = vmatpush3.bf16.msra.mxu0 %v7309_v43  ;;  %v7359_v43 = vld [vmem:[%s9509_s1 + $0x488] sm:$0xff]  }
  0x59   :  { %6597 = vmatprep.subr.bf16.mxu0 %v7311_v45  ;;  %6618 = vmatpush3.bf16.msra.mxu1 %v7310_v44  ;;  %v7360_v44 = vld [vmem:[%s9509_s1 + $0x450] sm:$0xff]  }
  0x5a   :  { %6619 = vmatprep.subr.bf16.mxu1 %v7312_v47  ;;  %v7361_v45 = vld [vmem:[%s9509_s1 + $0x4d0] sm:$0xff]  }
  0x5b   :  { %v7363_v47 = vld [vmem:[%s9509_s1 + $0x490] sm:$0xff]  }
  0x5c   :  { %6598 = vmatpush3.bf16.msra.mxu0 %v7313_v50  ;;  %v7366_v50 = vld [vmem:[%s9509_s1 + $0x418] sm:$0xff]  }
  0x5d   :  { %6599 = vmatprep.subr.bf16.mxu0 %v7315_v54  ;;  %6620 = vmatpush3.bf16.msra.mxu1 %v7314_v51  ;;  %v7367_v51 = vld [vmem:[%s9509_s1 + $0x498] sm:$0xff]   ;;  %v7370_v54 = vld [vmem:[%s9509_s1 + $0x420] sm:$0xff]  }
  0x5e   :  { %6621 = vmatprep.subr.bf16.mxu1 %v7316_v55  ;;  %v7371_v55 = vld [vmem:[%s9509_s1 + $0x4a0] sm:$0xff]  }
  0x60   :  { %6600 = vmatpush3.bf16.msra.mxu0 %v7317_v58  ;;  %v7374_v58 = vld [vmem:[%s9509_s1 + $0x428] sm:$0xff]  }
  0x61   :  { %6629 = vmatprep.subr.bf16.mxu0 %v7319_v62  ;;  %6622 = vmatpush3.bf16.msra.mxu1 %v7318_v59  ;;  %v7375_v59 = vld [vmem:[%s9509_s1 + $0x4a8] sm:$0xff]   ;;  %v7377_v62 = vld [vmem:[%s9509_s1 + $0x4f0] sm:$0xff]  }
  0x62   :  { %6651 = vmatprep.subr.bf16.mxu1 %v7320_v63 }
  0x63   :  { %4790 = vmatmul.mubr.bf16.vlgmr.msra.gmra.mrb[8].mxu0 %v1141_v61  ;;  %v24_v61 = vld [vmem:[%s9508_s0 + $0x10] sm:$0xff] }
  0x64   :  { %6630 = vmatpush3.bf16.msra.mxu0 %v7321_v1  ;;  %4869 = vmatprep.mubr.bf16.mxu0 %v1162_v0  ;;  %v1174_v63 = vrot.slane %v24_v61, %v7909_v41  ;;  %v1167_v0 = vcombine.high %v24_v61, %v24_v61  ;;  %v7378_v1 = vld [vmem:[%s9509_s1 + $0x430] sm:$0xff]  }
  0x65   :  { %4830 = vmatmul.mubr.bf16.vlgmr.msra.gmra.mrb[8].mxu1 %v1163_v3  ;;  %6631 = vmatprep.subr.bf16.mxu0 %v7323_v4  ;;  %v7427_v61 = vld [vmem:[%s9509_s1 + $0x610] sm:$0xff]  }
  0x66   :  { %6652 = vmatpush3.bf16.msra.mxu1 %v7322_v2  ;;  %4909 = vmatprep.mubr.bf16.mxu1 %v1166_v6  ;;  %v7379_v2 = vld [vmem:[%s9509_s1 + $0x4b0] sm:$0xff]   ;;  %v1182_v3 = vcombine.high %v1174_v63, %v1174_v63  ;;  %v8307_v4 = vrot.slane %v1167_v0, %v7909_v41  ;;  %v7381_v6 = vld [vmem:[%s9509_s1 + $0x4f8] sm:$0xff]  }
  0x67   :  { %6653 = vmatprep.subr.bf16.mxu1 %v7324_v5  ;;  %v7380_v5 = vld [vmem:[%s9509_s1 + $0x478] sm:$0xff]  }
  0x68   :  { %6632 = vmatpush3.bf16.msra.mxu0 %v7325_v7  ;;  %v1204_v7 = vrot.slane %v1182_v3, %v7909_v41  ;;  %v7430_v0 = vld [vmem:[%s9509_s1 + $0x6d8] sm:$0xff]   ;;  %v7433_v3 = vld [vmem:[%s9509_s1 + $0x660] sm:$0xff]  }
  0x69   :  { %6633 = vmatprep.subr.bf16.mxu0 %v7327_v9  ;;  %v7382_v9 = vld [vmem:[%s9509_s1 + $0x438] sm:$0xff]  }
  0x6a   :  { %6654 = vmatpush3.bf16.msra.mxu1 %v7326_v8  ;;  %v1183_v8 = vcombine.high %v8307_v4, %v8307_v4 }
  0x6b   :  { %6655 = vmatprep.subr.bf16.mxu1 %v7328_v10  ;;  %v7383_v10 = vld [vmem:[%s9509_s1 + $0x4b8] sm:$0xff]  }
  0x6c   :  { %6634 = vmatpush3.bf16.msra.mxu0 %v7329_v11  ;;  %v1214_v11 = vcombine.high %v1204_v7, %v1204_v7 }
  0x6d   :  { %6635 = vmatprep.subr.bf16.mxu0 %v7331_v13  ;;  %v7384_v13 = vld [vmem:[%s9509_s1 + $0x540] sm:$0xff]  }
  0x6e   :  { %6656 = vmatpush3.bf16.msra.mxu1 %v7330_v12  ;;  %v1190_v12 = vrot.slane %v1174_v63, %v7909_v41  ;;  %v7429_v63 = vld [vmem:[%s9509_s1 + $0x658] sm:$0xff]  }
  0x6f   :  { %6657 = vmatprep.subr.bf16.mxu1 %v7332_v14  ;;  %v7385_v14 = vld [vmem:[%s9509_s1 + $0x5c0] sm:$0xff]  }
  0x70   :  { %6636 = vmatpush3.bf16.msra.mxu0 %v7333_v15  ;;  %v1211_v15 = vrot.slane %v1183_v8, %v7909_v41  ;;  %v7438_v8 = vld [vmem:[%s9509_s1 + $0x6e8] sm:$0xff]  }
  0x71   :  { %6637 = vmatprep.subr.bf16.mxu0 %v7335_v17  ;;  %v7387_v17 = vld [vmem:[%s9509_s1 + $0x580] sm:$0xff]  }
  0x72   :  { %6658 = vmatpush3.bf16.msra.mxu1 %v7334_v16  ;;  %v7386_v16 = vld [vmem:[%s9509_s1 + $0x500] sm:$0xff]  }
  0x73   :  { %6659 = vmatprep.subr.bf16.mxu1 %v7336_v18  ;;  %v1212_v18 = vcombine.high %v1190_v12, %v1190_v12 }
  0x74   :  { %6638 = vmatpush3.bf16.msra.mxu0 %v7337_v19  ;;  %v7388_v19 = vld [vmem:[%s9509_s1 + $0x548] sm:$0xff]  }
  0x75   :  { %6639 = vmatprep.subr.bf16.mxu0 %v7339_v21  ;;  %v1215_v21 = vcombine.high %v1211_v15, %v1211_v15 }
  0x76   :  { %6660 = vmatpush3.bf16.msra.mxu1 %v7338_v20  ;;  %v7389_v20 = vld [vmem:[%s9509_s1 + $0x5c8] sm:$0xff]  }
  0x77   :  { %6661 = vmatprep.subr.bf16.mxu1 %v7340_v22  ;;  %v7390_v22 = vld [vmem:[%s9509_s1 + $0x508] sm:$0xff]  }
  0x78   :  { %6640 = vmatpush3.bf16.msra.mxu0 %v7341_v23  ;;  %v7391_v23 = vld [vmem:[%s9509_s1 + $0x588] sm:$0xff]  }
  0x79   :  { %6641 = vmatprep.subr.bf16.mxu0 %v7343_v25  ;;  %v7393_v25 = vld [vmem:[%s9509_s1 + $0x5d0] sm:$0xff]  }
  0x7a   :  { %6662 = vmatpush3.bf16.msra.mxu1 %v7342_v24  ;;  %v7392_v24 = vld [vmem:[%s9509_s1 + $0x550] sm:$0xff]  }
  0x7b   :  { %6663 = vmatprep.subr.bf16.mxu1 %v7344_v26  ;;  %v7394_v26 = vld [vmem:[%s9509_s1 + $0x510] sm:$0xff]  }
  0x7c   :  { %6642 = vmatpush3.bf16.msra.mxu0 %v7345_v27  ;;  %v7395_v27 = vld [vmem:[%s9509_s1 + $0x590] sm:$0xff]  }
  0x7d   :  { %6643 = vmatprep.subr.bf16.mxu0 %v7347_v29  ;;  %v7397_v29 = vld [vmem:[%s9509_s1 + $0x5d8] sm:$0xff]  }
  0x7e   :  { %6664 = vmatpush3.bf16.msra.mxu1 %v7346_v28  ;;  %v7396_v28 = vld [vmem:[%s9509_s1 + $0x558] sm:$0xff]  }
  0x7f   :  { %6665 = vmatprep.subr.bf16.mxu1 %v7348_v30  ;;  %v7398_v30 = vld [vmem:[%s9509_s1 + $0x518] sm:$0xff]  }
  0x80   :  { %6644 = vmatpush3.bf16.msra.mxu0 %v7349_v31  ;;  %v7399_v31 = vld [vmem:[%s9509_s1 + $0x598] sm:$0xff]  }
  0x81   :  { %6673 = vmatprep.subr.bf16.mxu0 %v7352_v34  ;;  %v7402_v34 = vld [vmem:[%s9509_s1 + $0x520] sm:$0xff]  }
  0x82   :  { %6666 = vmatpush3.bf16.msra.mxu1 %v7350_v32  ;;  %v7400_v32 = vld [vmem:[%s9509_s1 + $0x560] sm:$0xff]  }
  0x83   :  { %4870 = vmatmul.mubr.bf16.vlgmr.msra.gmra.mrb[12].mxu0 %v1148_v33  ;;  %6695 = vmatprep.subr.bf16.mxu1 %v7353_v35  ;;  %v7401_v33 = vld [vmem:[%s9509_s1 + $0x5e0] sm:$0xff]  }
  0x84   :  { %6674 = vmatpush3.bf16.msra.mxu0 %v7354_v36  ;;  %4949 = vmatprep.mubr.bf16.mxu0 %v1204_v7  ;;  %v7403_v35 = vld [vmem:[%s9509_s1 + $0x5a0] sm:$0xff]   ;;  %v7404_v36 = vld [vmem:[%s9509_s1 + $0x568] sm:$0xff]  }
  0x85   :  { %4910 = vmatmul.mubr.bf16.vlgmr.msra.gmra.mrb[12].mxu1 %v1164_v38  ;;  %6675 = vmatprep.subr.bf16.mxu0 %v7356_v39  ;;  %v7406_v38 = vld [vmem:[%s9509_s1 + $0x528] sm:$0xff]  }
  0x86   :  { %6696 = vmatpush3.bf16.msra.mxu1 %v7355_v37  ;;  %4989 = vmatprep.mubr.bf16.mxu1 %v1214_v11  ;;  %v7405_v37 = vld [vmem:[%s9509_s1 + $0x5e8] sm:$0xff]   ;;  %v7441_v11 = vld [vmem:[%s9509_s1 + $0x670] sm:$0xff]  }
  0x87   :  { %6697 = vmatprep.subr.bf16.mxu1 %v7357_v40  ;;  %v7407_v39 = vld [vmem:[%s9509_s1 + $0x5a8] sm:$0xff]   ;;  %v7408_v40 = vld [vmem:[%s9509_s1 + $0x570] sm:$0xff]  }
  0x88   :  { %6676 = vmatpush3.bf16.msra.mxu0 %v7358_v42  ;;  %v7409_v42 = vld [vmem:[%s9509_s1 + $0x5f0] sm:$0xff]   ;;  %v7437_v7 = vld [vmem:[%s9509_s1 + $0x668] sm:$0xff]  }
  0x89   :  { %6677 = vmatprep.subr.bf16.mxu0 %v7360_v44  ;;  %v7411_v44 = vld [vmem:[%s9509_s1 + $0x5b0] sm:$0xff]  }
  0x8a   :  { %6698 = vmatpush3.bf16.msra.mxu1 %v7359_v43  ;;  %v7410_v43 = vld [vmem:[%s9509_s1 + $0x530] sm:$0xff]  }
  0x8b   :  { %6699 = vmatprep.subr.bf16.mxu1 %v7361_v45  ;;  %v7412_v45 = vld [vmem:[%s9509_s1 + $0x578] sm:$0xff]  }
  0x8c   :  { %6678 = vmatpush3.bf16.msra.mxu0 %v7362_v46  ;;  %v7413_v46 = vld [vmem:[%s9509_s1 + $0x5f8] sm:$0xff]  }
  0x8d   :  { %6679 = vmatprep.subr.bf16.mxu0 %v7364_v48  ;;  %v7415_v48 = vld [vmem:[%s9509_s1 + $0x5b8] sm:$0xff]  }
  0x8e   :  { %6700 = vmatpush3.bf16.msra.mxu1 %v7363_v47  ;;  %v7414_v47 = vld [vmem:[%s9509_s1 + $0x538] sm:$0xff]  }
  0x8f   :  { %6701 = vmatprep.subr.bf16.mxu1 %v7365_v49  ;;  %v1197_v49 = vrot.slane %v8307_v4, %v7909_v41  ;;  %v7434_v4 = vld [vmem:[%s9509_s1 + $0x6e0] sm:$0xff]  }
  0x90   :  { %6680 = vmatpush3.bf16.msra.mxu0 %v7366_v50  ;;  %v7417_v50 = vld [vmem:[%s9509_s1 + $0x640] sm:$0xff]  }
  0x91   :  { %6681 = vmatprep.subr.bf16.mxu0 %v7368_v52  ;;  %v7419_v52 = vld [vmem:[%s9509_s1 + $0x600] sm:$0xff]  }
  0x92   :  { %6702 = vmatpush3.bf16.msra.mxu1 %v7367_v51  ;;  %v7418_v51 = vld [vmem:[%s9509_s1 + $0x6c0] sm:$0xff]  }
  0x93   :  { %6703 = vmatprep.subr.bf16.mxu1 %v7369_v53  ;;  %v7420_v53 = vld [vmem:[%s9509_s1 + $0x680] sm:$0xff]  }
  0x94   :  { %6682 = vmatpush3.bf16.msra.mxu0 %v7370_v54  ;;  %v1213_v54 = vcombine.high %v1197_v49, %v1197_v49 }
  0x95   :  { %6683 = vmatprep.subr.bf16.mxu0 %v7372_v56  ;;  %v7422_v56 = vld [vmem:[%s9509_s1 + $0x6c8] sm:$0xff]  }
  0x96   :  { %6704 = vmatpush3.bf16.msra.mxu1 %v7371_v55  ;;  %v7421_v55 = vld [vmem:[%s9509_s1 + $0x648] sm:$0xff]  }
  0x97   :  { %6705 = vmatprep.subr.bf16.mxu1 %v7373_v57  ;;  %v7423_v57 = vld [vmem:[%s9509_s1 + $0x608] sm:$0xff]  }
  0x98   :  { %6684 = vmatpush3.bf16.msra.mxu0 %v7374_v58  ;;  %v7424_v58 = vld [vmem:[%s9509_s1 + $0x688] sm:$0xff]  }
  0x99   :  { %6685 = vmatprep.subr.bf16.mxu0 %v7376_v60  ;;  %v7426_v60 = vld [vmem:[%s9509_s1 + $0x6d0] sm:$0xff]  }
  0x9a   :  { %6706 = vmatpush3.bf16.msra.mxu1 %v7375_v59  ;;  %v7425_v59 = vld [vmem:[%s9509_s1 + $0x650] sm:$0xff]  }
  0x9b   :  { %6707 = vmatprep.subr.bf16.mxu1 %v7377_v62  ;;  %v7428_v62 = vld [vmem:[%s9509_s1 + $0x690] sm:$0xff]  }
  0x9c   :  { %6686 = vmatpush3.bf16.msra.mxu0 %v7378_v1  ;;  %v7431_v1 = vld [vmem:[%s9509_s1 + $0x618] sm:$0xff]  }
  0x9d   :  { %6687 = vmatprep.subr.bf16.mxu0 %v7380_v5  ;;  %v7435_v5 = vld [vmem:[%s9509_s1 + $0x620] sm:$0xff]  }
  0x9e   :  { %6708 = vmatpush3.bf16.msra.mxu1 %v7379_v2  ;;  %v7432_v2 = vld [vmem:[%s9509_s1 + $0x698] sm:$0xff]  }
  0x9f   :  { %6709 = vmatprep.subr.bf16.mxu1 %v7381_v6  ;;  %v7436_v6 = vld [vmem:[%s9509_s1 + $0x6a0] sm:$0xff]  }
  0xa0   :  { %6688 = vmatpush3.bf16.msra.mxu0 %v7382_v9  ;;  %v7439_v9 = vld [vmem:[%s9509_s1 + $0x628] sm:$0xff]  }
  0xa1   :  { %6717 = vmatprep.subr.bf16.mxu0 %v7384_v13  ;;  %v7442_v13 = vld [vmem:[%s9509_s1 + $0x6f0] sm:$0xff]  }
  0xa2   :  { %6710 = vmatpush3.bf16.msra.mxu1 %v7383_v10  ;;  %v7440_v10 = vld [vmem:[%s9509_s1 + $0x6a8] sm:$0xff]  }
  0xa3   :  { %4950 = vmatmul.mubr.bf16.vlgmr.msra.gmra.mrb[16].mxu0 %v1190_v12  ;;  %6739 = vmatprep.subr.bf16.mxu1 %v7385_v14  ;;  %v25_v12 = vld [vmem:[%s9508_s0 + $0x18] sm:$0xff] }
  0xa4   :  { %6718 = vmatpush3.bf16.msra.mxu0 %v7386_v16  ;;  %5029 = vmatprep.mubr.bf16.mxu0 %v1211_v15  ;;  %v1223_v14 = vrot.slane %v25_v12, %v7909_v41  ;;  %v1216_v15 = vcombine.high %v25_v12, %v25_v12  ;;  %v7443_v16 = vld [vmem:[%s9509_s1 + $0x630] sm:$0xff]   ;;  %v7480_v12 = vld [vmem:[%s9509_s1 + $0x7b8] sm:$0xff]  }
  0xa5   :  { %4990 = vmatmul.mubr.bf16.vlgmr.msra.gmra.mrb[16].mxu1 %v1212_v18  ;;  %6719 = vmatprep.subr.bf16.mxu0 %v7388_v19 }
  0xa6   :  { %6740 = vmatpush3.bf16.msra.mxu1 %v7387_v17  ;;  %5069 = vmatprep.mubr.bf16.mxu1 %v1215_v21  ;;  %v7445_v17 = vld [vmem:[%s9509_s1 + $0x678] sm:$0xff]   ;;  %v1231_v18 = vcombine.high %v1223_v14, %v1223_v14  ;;  %v8513_v19 = vrot.slane %v1216_v15, %v7909_v41  ;;  %v7483_v15 = vld [vmem:[%s9509_s1 + $0x8c0] sm:$0xff]  }
  0xa7   :  { %6741 = vmatprep.subr.bf16.mxu1 %v7389_v20  ;;  %v7444_v20 = vld [vmem:[%s9509_s1 + $0x6b0] sm:$0xff]   ;;  %v7446_v21 = vld [vmem:[%s9509_s1 + $0x6f8] sm:$0xff]  }
  0xa8   :  { %6720 = vmatpush3.bf16.msra.mxu0 %v7390_v22  ;;  %v1253_v22 = vrot.slane %v1231_v18, %v7909_v41 }
  0xa9   :  { %6721 = vmatprep.subr.bf16.mxu0 %v7392_v24  ;;  %v7447_v24 = vld [vmem:[%s9509_s1 + $0x638] sm:$0xff]  }
  0xaa   :  { %6742 = vmatpush3.bf16.msra.mxu1 %v7391_v23  ;;  %v1232_v23 = vcombine.high %v8513_v19, %v8513_v19 }
  0xab   :  { %6743 = vmatprep.subr.bf16.mxu1 %v7393_v25  ;;  %v1263_v25 = vcombine.high %v1253_v22, %v1253_v22 }
  0xac   :  { %6722 = vmatpush3.bf16.msra.mxu0 %v7394_v26  ;;  %v1239_v26 = vrot.slane %v1223_v14, %v7909_v41  ;;  %v7482_v14 = vld [vmem:[%s9509_s1 + $0x840] sm:$0xff]  }
  0xad   :  { %6723 = vmatprep.subr.bf16.mxu0 %v7396_v28  ;;  %v7448_v28 = vld [vmem:[%s9509_s1 + $0x6b8] sm:$0xff]  }
  0xae   :  { %6744 = vmatpush3.bf16.msra.mxu1 %v7395_v27  ;;  %v7449_v27 = vld [vmem:[%s9509_s1 + $0x740] sm:$0xff]  }
  0xaf   :  { %6745 = vmatprep.subr.bf16.mxu1 %v7397_v29  ;;  %v1260_v29 = vrot.slane %v1232_v23, %v7909_v41  ;;  %v7490_v23 = vld [vmem:[%s9509_s1 + $0x850] sm:$0xff]  }
  0xb0   :  { %6724 = vmatpush3.bf16.msra.mxu0 %v7398_v30  ;;  %v7450_v30 = vld [vmem:[%s9509_s1 + $0x7c0] sm:$0xff]  }
  0xb1   :  { %6725 = vmatprep.subr.bf16.mxu0 %v7400_v32  ;;  %v1261_v32 = vcombine.high %v1239_v26, %v1239_v26 }
  0xb2   :  { %6746 = vmatpush3.bf16.msra.mxu1 %v7399_v31  ;;  %v7451_v31 = vld [vmem:[%s9509_s1 + $0x700] sm:$0xff]  }
  0xb3   :  { %6747 = vmatprep.subr.bf16.mxu1 %v7401_v33  ;;  %v7453_v33 = vld [vmem:[%s9509_s1 + $0x748] sm:$0xff]  }
  0xb4   :  { %6726 = vmatpush3.bf16.msra.mxu0 %v7402_v34  ;;  %v7452_v34 = vld [vmem:[%s9509_s1 + $0x780] sm:$0xff]  }
  0xb5   :  { %6727 = vmatprep.subr.bf16.mxu0 %v7404_v36  ;;  %v7454_v36 = vld [vmem:[%s9509_s1 + $0x7c8] sm:$0xff]  }
  0xb6   :  { %6748 = vmatpush3.bf16.msra.mxu1 %v7403_v35  ;;  %v1264_v35 = vcombine.high %v1260_v29, %v1260_v29 }
  0xb7   :  { %6749 = vmatprep.subr.bf16.mxu1 %v7405_v37  ;;  %v7455_v37 = vld [vmem:[%s9509_s1 + $0x708] sm:$0xff]  }
  0xb8   :  { %6728 = vmatpush3.bf16.msra.mxu0 %v7406_v38  ;;  %v7457_v38 = vld [vmem:[%s9509_s1 + $0x750] sm:$0xff]  }
  0xb9   :  { %6729 = vmatprep.subr.bf16.mxu0 %v7408_v40  ;;  %v7458_v40 = vld [vmem:[%s9509_s1 + $0x7d0] sm:$0xff]  }
  0xba   :  { %6750 = vmatpush3.bf16.msra.mxu1 %v7407_v39  ;;  %v7456_v39 = vld [vmem:[%s9509_s1 + $0x788] sm:$0xff]  }
  0xbb   :  { %6751 = vmatprep.subr.bf16.mxu1 %v7409_v42  ;;  %v7459_v42 = vld [vmem:[%s9509_s1 + $0x710] sm:$0xff]  }
  0xbc   :  { %6730 = vmatpush3.bf16.msra.mxu0 %v7410_v43  ;;  %v7461_v43 = vld [vmem:[%s9509_s1 + $0x758] sm:$0xff]  }
  0xbd   :  { %6731 = vmatprep.subr.bf16.mxu0 %v7412_v45  ;;  %v7462_v45 = vld [vmem:[%s9509_s1 + $0x7d8] sm:$0xff]  }
  0xbe   :  { %6752 = vmatpush3.bf16.msra.mxu1 %v7411_v44  ;;  %v7460_v44 = vld [vmem:[%s9509_s1 + $0x790] sm:$0xff]  }
  0xbf   :  { %6753 = vmatprep.subr.bf16.mxu1 %v7413_v46  ;;  %v7463_v46 = vld [vmem:[%s9509_s1 + $0x718] sm:$0xff]  }
  0xc0   :  { %6732 = vmatpush3.bf16.msra.mxu0 %v7414_v47  ;;  %v7464_v47 = vld [vmem:[%s9509_s1 + $0x798] sm:$0xff]  }
  0xc1   :  { %6761 = vmatprep.subr.bf16.mxu0 %v7417_v50  ;;  %v7467_v50 = vld [vmem:[%s9509_s1 + $0x720] sm:$0xff]  }
  0xc2   :  { %6754 = vmatpush3.bf16.msra.mxu1 %v7415_v48  ;;  %v7465_v48 = vld [vmem:[%s9509_s1 + $0x760] sm:$0xff]  }
  0xc3   :  { %5030 = vmatmul.mubr.bf16.vlgmr.msra.gmra.mrb[20].mxu0 %v1197_v49  ;;  %6783 = vmatprep.subr.bf16.mxu1 %v7418_v51  ;;  %v7466_v49 = vld [vmem:[%s9509_s1 + $0x7e0] sm:$0xff]  }
  0xc4   :  { %6762 = vmatpush3.bf16.msra.mxu0 %v7419_v52  ;;  %5109 = vmatprep.mubr.bf16.mxu0 %v1253_v22  ;;  %v7468_v51 = vld [vmem:[%s9509_s1 + $0x7a0] sm:$0xff]   ;;  %v7469_v52 = vld [vmem:[%s9509_s1 + $0x768] sm:$0xff]  }
  0xc5   :  { %5070 = vmatmul.mubr.bf16.vlgmr.msra.gmra.mrb[20].mxu1 %v1213_v54  ;;  %6763 = vmatprep.subr.bf16.mxu0 %v7421_v55  ;;  %v7471_v54 = vld [vmem:[%s9509_s1 + $0x728] sm:$0xff]  }
  0xc6   :  { %6784 = vmatpush3.bf16.msra.mxu1 %v7420_v53  ;;  %5149 = vmatprep.mubr.bf16.mxu1 %v1263_v25  ;;  %v7470_v53 = vld [vmem:[%s9509_s1 + $0x7e8] sm:$0xff]   ;;  %v7492_v25 = vld [vmem:[%s9509_s1 + $0x810] sm:$0xff]  }
  0xc7   :  { %6785 = vmatprep.subr.bf16.mxu1 %v7422_v56  ;;  %v7472_v55 = vld [vmem:[%s9509_s1 + $0x7a8] sm:$0xff]   ;;  %v5978_v56 = vld [vmem:[%s9510_s2] ss:$0 sm:$0xff] }
  0xc8   :  { %6764 = vmatpush3.bf16.msra.mxu0 %v7423_v57  ;;  %v7473_v57 = vld [vmem:[%s9509_s1 + $0x770] sm:$0xff]   ;;  %v7489_v22 = vld [vmem:[%s9509_s1 + $0x888] sm:$0xff]  }
  0xc9   :  { %6765 = vmatprep.subr.bf16.mxu0 %v7425_v59  ;;  %v7474_v59 = vld [vmem:[%s9509_s1 + $0x7f0] sm:$0xff]  }
  0xca   :  { %6786 = vmatpush3.bf16.msra.mxu1 %v7424_v58 }
  0xcb   :  { %6787 = vmatprep.subr.bf16.mxu1 %v7426_v60 }
  0xcc   :  { %6766 = vmatpush3.bf16.msra.mxu0 %v7427_v61  ;;  %v7475_v61 = vld [vmem:[%s9509_s1 + $0x730] sm:$0xff]  }
  0xcd   :  { %6767 = vmatprep.subr.bf16.mxu0 %v7429_v63 }
  0xce   :  { %6788 = vmatpush3.bf16.msra.mxu1 %v7428_v62 }
  0xcf   :  { %6789 = vmatprep.subr.bf16.mxu1 %v7430_v0 }
  0xd0   :  { %6768 = vmatpush3.bf16.msra.mxu0 %v7431_v1  ;;  %v7476_v1 = vld [vmem:[%s9509_s1 + $0x7b0] sm:$0xff]  }
  0xd1   :  { %6769 = vmatprep.subr.bf16.mxu0 %v7433_v3 }
  0xd2   :  { %6790 = vmatpush3.bf16.msra.mxu1 %v7432_v2  ;;  %v7477_v2 = vld [vmem:[%s9509_s1 + $0x778] sm:$0xff]  }
  0xd3   :  { %6791 = vmatprep.subr.bf16.mxu1 %v7434_v4 }
  0xd4   :  { %6770 = vmatpush3.bf16.msra.mxu0 %v7435_v5 }
  0xd5   :  { %6771 = vmatprep.subr.bf16.mxu0 %v7437_v7 }
  0xd6   :  { %6792 = vmatpush3.bf16.msra.mxu1 %v7436_v6 }
  0xd7   :  { %6793 = vmatprep.subr.bf16.mxu1 %v7438_v8  ;;  %v7478_v8 = vld [vmem:[%s9509_s1 + $0x7f8] sm:$0xff]  }
  0xd8   :  { %6772 = vmatpush3.bf16.msra.mxu0 %v7439_v9 }
  0xd9   :  { %6773 = vmatprep.subr.bf16.mxu0 %v7441_v11 }
  0xda   :  { %6794 = vmatpush3.bf16.msra.mxu1 %v7440_v10  ;;  %v7479_v10 = vld [vmem:[%s9509_s1 + $0x738] sm:$0xff]  }
  0xdb   :  { %6795 = vmatprep.subr.bf16.mxu1 %v7442_v13  ;;  %v1246_v13 = vrot.slane %v8513_v19, %v7909_v41  ;;  %v7486_v19 = vld [vmem:[%s9509_s1 + $0x848] sm:$0xff]  }
  0xdc   :  { %6774 = vmatpush3.bf16.msra.mxu0 %v7443_v16  ;;  %v7484_v16 = vld [vmem:[%s9509_s1 + $0x800] sm:$0xff]  }
  0xdd   :  { %6775 = vmatprep.subr.bf16.mxu0 %v7445_v17  ;;  %v7485_v17 = vld [vmem:[%s9509_s1 + $0x880] sm:$0xff]   ;;  %v1262_v18 = vcombine.high %v1246_v13, %v1246_v13 }
  0xde   :  { %6796 = vmatpush3.bf16.msra.mxu1 %v7444_v20  ;;  %v7487_v20 = vld [vmem:[%s9509_s1 + $0x8c8] sm:$0xff]  }
  0xdf   :  { %6797 = vmatprep.subr.bf16.mxu1 %v7446_v21  ;;  %v7488_v21 = vld [vmem:[%s9509_s1 + $0x808] sm:$0xff]  }
  0xe0   :  { %6776 = vmatpush3.bf16.msra.mxu0 %v7447_v24  ;;  %v7491_v24 = vld [vmem:[%s9509_s1 + $0x8d0] sm:$0xff]  }
  0xe1   :  { %6805 = vmatprep.subr.bf16.mxu0 %v7449_v27  ;;  %v7494_v27 = vld [vmem:[%s9509_s1 + $0x858] sm:$0xff]  }
  0xe2   :  { %6798 = vmatpush3.bf16.msra.mxu1 %v7448_v28  ;;  %v7495_v28 = vld [vmem:[%s9509_s1 + $0x8d8] sm:$0xff]  }
  0xe3   :  { %5110 = vmatmul.mubr.bf16.vlgmr.msra.gmra.mrb[24].mxu0 %v1239_v26  ;;  %6827 = vmatprep.subr.bf16.mxu1 %v7450_v30  ;;  %v7493_v26 = vld [vmem:[%s9509_s1 + $0x890] sm:$0xff]   ;;  %v7497_v30 = vld [vmem:[%s9509_s1 + $0x898] sm:$0xff]  }
  0xe4   :  { %6806 = vmatpush3.bf16.msra.mxu0 %v7451_v31  ;;  %5189 = vmatprep.mubr.bf16.mxu0 %v1260_v29  ;;  %v7496_v29 = vld [vmem:[%s9509_s1 + $0x818] sm:$0xff]   ;;  %v7498_v31 = vld [vmem:[%s9509_s1 + $0x860] sm:$0xff]  }
  0xe5   :  { %5150 = vmatmul.mubr.bf16.vlgmr.msra.gmra.mrb[24].mxu1 %v1261_v32  ;;  %6807 = vmatprep.subr.bf16.mxu0 %v7453_v33  ;;  %v7499_v32 = vld [vmem:[%s9509_s1 + $0x8e0] sm:$0xff]  }
  0xe6   :  { %6828 = vmatpush3.bf16.msra.mxu1 %v7452_v34  ;;  %5229 = vmatprep.mubr.bf16.mxu1 %v1264_v35  ;;  %v7500_v33 = vld [vmem:[%s9509_s1 + $0x820] sm:$0xff]   ;;  %v7502_v35 = vld [vmem:[%s9509_s1 + $0x868] sm:$0xff]  }
  0xe7   :  { %6829 = vmatprep.subr.bf16.mxu1 %v7454_v36  ;;  %v7501_v34 = vld [vmem:[%s9509_s1 + $0x8a0] sm:$0xff]   ;;  %v7503_v36 = vld [vmem:[%s9509_s1 + $0x8e8] sm:$0xff]  }
  0xe8   :  { %6808 = vmatpush3.bf16.msra.mxu0 %v7455_v37  ;;  %v7504_v37 = vld [vmem:[%s9509_s1 + $0x828] sm:$0xff]  }
  0xe9   :  { %6809 = vmatprep.subr.bf16.mxu0 %v7457_v38  ;;  %v7505_v38 = vld [vmem:[%s9509_s1 + $0x8a8] sm:$0xff]  }
  0xea   :  { %6830 = vmatpush3.bf16.msra.mxu1 %v7456_v39  ;;  %v7506_v39 = vld [vmem:[%s9509_s1 + $0x870] sm:$0xff]  }
  0xeb   :  { %6831 = vmatprep.subr.bf16.mxu1 %v7458_v40  ;;  %v7507_v40 = vld [vmem:[%s9509_s1 + $0x8f0] sm:$0xff]  }
  0xec   :  { %6810 = vmatpush3.bf16.msra.mxu0 %v7459_v42 }
  0xed   :  { %6811 = vmatprep.subr.bf16.mxu0 %v7461_v43  ;;  %v7508_v43 = vld [vmem:[%s9509_s1 + $0x830] sm:$0xff]  }
  0xee   :  { %6832 = vmatpush3.bf16.msra.mxu1 %v7460_v44 }
  0xef   :  { %6833 = vmatprep.subr.bf16.mxu1 %v7462_v45  ;;  %v26_v45 = vld [vmem:[%s9508_s0 + $0x20] sm:$0xff] }
  0xf0   :  { %6812 = vmatpush3.bf16.msra.mxu0 %v7463_v46 }
  0xf1   :  { %6813 = vmatprep.subr.bf16.mxu0 %v7465_v48 }
  0xf2   :  { %6834 = vmatpush3.bf16.msra.mxu1 %v7464_v47 }
  0xf3   :  { %6835 = vmatprep.subr.bf16.mxu1 %v7466_v49  ;;  %v7509_v49 = vld [vmem:[%s9509_s1 + $0x8b0] sm:$0xff]  }
  0xf4   :  { %6814 = vmatpush3.bf16.msra.mxu0 %v7467_v50  ;;  %v7510_v50 = vld [vmem:[%s9509_s1 + $0x878] sm:$0xff]  }
  0xf5   :  { %6815 = vmatprep.subr.bf16.mxu0 %v7469_v52  ;;  %v1265_v52 = vcombine.high %v26_v45, %v26_v45 }
  0xf6   :  { %6836 = vmatpush3.bf16.msra.mxu1 %v7468_v51  ;;  %v6513_v58 = vpop.f32.mrb[0].mxu0  ;;  %v1272_v51 = vrot.slane %v26_v45, %v7909_v41 }
  0xf7   :  { %v6514_v60 = vpop.f32.mrb[1].mxu0  ;;  %6837 = vmatprep.subr.bf16.mxu1 %v7470_v53  ;;  %v6535_v62 = vpop.f32.mrb[0].mxu1 }
  0xf8   :  { %v6515_v63 = vadd.f32 %v6514_v60, %v6513_v58  ;;  %v6516_v0 = vpop.f32.mrb[2].mxu0  ;;  %6816 = vmatpush3.bf16.msra.mxu0 %v7471_v54  ;;  %v6536_v3 = vpop.f32.mrb[1].mxu1  ;;  %v7511_v58 = vld [vmem:[%s9509_s1 + $0x8f8] sm:$0xff]  }
  0xf9   :  { %v6517_v4 = vpop.f32.mrb[3].mxu0  ;;  %6817 = vmatprep.subr.bf16.mxu0 %v7473_v57  ;;  %v6537_v6 = vadd.f32 %v6536_v3, %v6535_v62  ;;  %v6538_v7 = vpop.f32.mrb[2].mxu1  ;;  %v8734_v62 = vrot.slane %v1265_v52, %v7909_v41  ;;  %v7513_v0 = vld [vmem:[%s9509_s1 + $0x8b8] sm:$0xff]   ;;  %v7514_v3 = vld [vmem:[%s9509_s1 + $0x940] sm:$0xff]  }
  0xfa   :  { %v4632_v5 = vadd.f32 %v6515_v63, %v5978_v56  ;;  %6838 = vmatpush3.bf16.msra.mxu1 %v7472_v55  ;;  %v6539_v9 = vpop.f32.mrb[3].mxu1  ;;  %v7516_v7 = vld [vmem:[%s9509_s1 + $0x900] sm:$0xff]   ;;  %v7545_v52 = vld [vmem:[%s9509_s1 + $0x9b8] sm:$0xff]  }
  0xfb   :  { %6839 = vmatprep.subr.bf16.mxu1 %v7474_v59  ;;  %v1280_v59 = vcombine.high %v1272_v51, %v1272_v51  ;;  %v1281_v4 = vcombine.high %v8734_v62, %v8734_v62  ;;  %v7517_v9 = vld [vmem:[%s9509_s1 + $0x980] sm:$0xff]  }
  0xfc   :  { %v8628_v11 = vadd.f32 %v6537_v6, %v4632_v5  ;;  %6818 = vmatpush3.bf16.msra.mxu0 %v7475_v61  ;;  %v7512_v61 = vld [vmem:[%s9509_s1 + $0x838] sm:$0xff]   ;;  %v7515_v6 = vld [vmem:[%s9509_s1 + $0x9c0] sm:$0xff]  }
  0xfd   :  { %6819 = vmatprep.subr.bf16.mxu0 %v7477_v2  ;;  %v1288_v2 = vrot.slane %v1272_v51, %v7909_v41 }
  0xfe   :  { %6840 = vmatpush3.bf16.msra.mxu1 %v7476_v1  ;;  %v1302_v1 = vrot.slane %v1280_v59, %v7909_v41  ;;  %v7551_v59 = vld [vmem:[%s9509_s1 + $0xa48] sm:$0xff]  }
  0xff   :  { %6841 = vmatprep.subr.bf16.mxu1 %v7478_v8  ;;  %v1309_v8 = vrot.slane %v1281_v4, %v7909_v41  ;;  %v7560_v4 = vld [vmem:[%s9509_s1 + $0xad8] sm:$0xff]  }
 0x100   :  { %6820 = vmatpush3.bf16.msra.mxu0 %v7479_v10  ;;  %v1312_v5 = vcombine.high %v1302_v1, %v1302_v1  ;;  %v1310_v10 = vcombine.high %v1288_v2, %v1288_v2 }
 0x101   :  { %6849 = vmatprep.subr.bf16.mxu0 %v7482_v14  ;;  %v7520_v14 = vld [vmem:[%s9509_s1 + $0x908] sm:$0xff]  }
 0x102   :  { %6842 = vmatpush3.bf16.msra.mxu1 %v7480_v12  ;;  %v7519_v12 = vld [vmem:[%s9509_s1 + $0x9c8] sm:$0xff]  }
 0x103   :  { %5190 = vmatmul.mubr.bf16.vlgmr.msra.gmra.mrb[28].mxu0 %v1246_v13  ;;  %6871 = vmatprep.subr.bf16.mxu1 %v7483_v15  ;;  %v1313_v13 = vcombine.high %v1309_v8, %v1309_v8  ;;  %v7521_v15 = vld [vmem:[%s9509_s1 + $0x988] sm:$0xff]  }
 0x104   :  { %6850 = vmatpush3.bf16.msra.mxu0 %v7484_v16  ;;  %5269 = vmatprep.mubr.bf16.mxu0 %v1302_v1  ;;  %v7522_v16 = vld [vmem:[%s9509_s1 + $0x950] sm:$0xff]  }
 0x105   :  { %5230 = vmatmul.mubr.bf16.vlgmr.msra.gmra.mrb[28].mxu1 %v1262_v18  ;;  %6851 = vmatprep.subr.bf16.mxu0 %v7486_v19  ;;  %v7524_v18 = vld [vmem:[%s9509_s1 + $0x910] sm:$0xff]  }
 0x106   :  { %6872 = vmatpush3.bf16.msra.mxu1 %v7485_v17  ;;  %5309 = vmatprep.mubr.bf16.mxu1 %v1312_v5  ;;  %v7523_v17 = vld [vmem:[%s9509_s1 + $0x9d0] sm:$0xff]   ;;  %v7561_v5 = vld [vmem:[%s9509_s1 + $0xa18] sm:$0xff]  }
 0x107   :  { %6873 = vmatprep.subr.bf16.mxu1 %v7487_v20  ;;  %v7525_v19 = vld [vmem:[%s9509_s1 + $0x990] sm:$0xff]   ;;  %v7526_v20 = vld [vmem:[%s9509_s1 + $0x958] sm:$0xff]  }
 0x108   :  { %6852 = vmatpush3.bf16.msra.mxu0 %v7488_v21  ;;  %v7527_v21 = vld [vmem:[%s9509_s1 + $0x9d8] sm:$0xff]   ;;  %v7557_v1 = vld [vmem:[%s9509_s1 + $0xa10] sm:$0xff]  }
 0x109   :  { %6853 = vmatprep.subr.bf16.mxu0 %v7490_v23  ;;  %v7529_v23 = vld [vmem:[%s9509_s1 + $0x998] sm:$0xff]  }
 0x10a   :  { %6874 = vmatpush3.bf16.msra.mxu1 %v7489_v22  ;;  %v7528_v22 = vld [vmem:[%s9509_s1 + $0x918] sm:$0xff]  }
 0x10b   :  { %6875 = vmatprep.subr.bf16.mxu1 %v7491_v24  ;;  %v7530_v24 = vld [vmem:[%s9509_s1 + $0x960] sm:$0xff]  }
 0x10c   :  { %6854 = vmatpush3.bf16.msra.mxu0 %v7492_v25  ;;  %v7531_v25 = vld [vmem:[%s9509_s1 + $0x9e0] sm:$0xff]  }
 0x10d   :  { %6855 = vmatprep.subr.bf16.mxu0 %v7494_v27  ;;  %v7533_v27 = vld [vmem:[%s9509_s1 + $0x9a0] sm:$0xff]  }
 0x10e   :  { %6876 = vmatpush3.bf16.msra.mxu1 %v7493_v26  ;;  %v7532_v26 = vld [vmem:[%s9509_s1 + $0x920] sm:$0xff]  }
 0x10f   :  { %6877 = vmatprep.subr.bf16.mxu1 %v7495_v28  ;;  %v7534_v28 = vld [vmem:[%s9509_s1 + $0x968] sm:$0xff]  }
 0x110   :  { %6856 = vmatpush3.bf16.msra.mxu0 %v7496_v29  ;;  %v7535_v29 = vld [vmem:[%s9509_s1 + $0x9e8] sm:$0xff]  }
 0x111   :  { %6857 = vmatprep.subr.bf16.mxu0 %v7498_v31  ;;  %v7537_v31 = vld [vmem:[%s9509_s1 + $0x9a8] sm:$0xff]  }
 0x112   :  { %6878 = vmatpush3.bf16.msra.mxu1 %v7497_v30  ;;  %v7536_v30 = vld [vmem:[%s9509_s1 + $0x928] sm:$0xff]  }
 0x113   :  { %6879 = vmatprep.subr.bf16.mxu1 %v7499_v32  ;;  %v7538_v32 = vld [vmem:[%s9509_s1 + $0x970] sm:$0xff]  }
 0x114   :  { %6858 = vmatpush3.bf16.msra.mxu0 %v7500_v33 }
 0x115   :  { %6859 = vmatprep.subr.bf16.mxu0 %v7502_v35 }
 0x116   :  { %6880 = vmatpush3.bf16.msra.mxu1 %v7501_v34  ;;  %v6557_v42 = vpop.f32.mrb[4].mxu0  ;;  %v7539_v34 = vld [vmem:[%s9509_s1 + $0x9f0] sm:$0xff]  }
 0x117   :  { %v6558_v44 = vpop.f32.mrb[5].mxu0  ;;  %6881 = vmatprep.subr.bf16.mxu1 %v7503_v36  ;;  %v6579_v46 = vpop.f32.mrb[4].mxu1  ;;  %v7540_v36 = vld [vmem:[%s9509_s1 + $0x930] sm:$0xff]  }
 0x118   :  { %v6559_v47 = vadd.f32 %v6558_v44, %v6557_v42  ;;  %v6560_v48 = vpop.f32.mrb[6].mxu0  ;;  %6860 = vmatpush3.bf16.msra.mxu0 %v7504_v37  ;;  %v6580_v53 = vpop.f32.mrb[5].mxu1  ;;  %v7542_v42 = vld [vmem:[%s9509_s1 + $0x978] sm:$0xff]  }
 0x119   :  { %v6561_v54 = vpop.f32.mrb[7].mxu0  ;;  %6861 = vmatprep.subr.bf16.mxu0 %v7506_v39  ;;  %v6581_v56 = vadd.f32 %v6580_v53, %v6579_v46  ;;  %v6582_v57 = vpop.f32.mrb[6].mxu1  ;;  %v7543_v48 = vld [vmem:[%s9509_s1 + $0x9f8] sm:$0xff]   ;;  %v1295_v53 = vrot.slane %v8734_v62, %v7909_v41  ;;  %v7554_v62 = vld [vmem:[%s9509_s1 + $0xa88] sm:$0xff]  }
 0x11a   :  { %v4712_v55 = vadd.f32 %v6559_v47, %v8628_v11  ;;  %6882 = vmatpush3.bf16.msra.mxu1 %v7505_v38  ;;  %v6583_v60 = vpop.f32.mrb[7].mxu1  ;;  %v7518_v11 = vld [vmem:[%s9509_s1 + $0x948] sm:$0xff]   ;;  %v7547_v54 = vld [vmem:[%s9509_s1 + $0xa40] sm:$0xff]  }
 0x11b   :  { %6883 = vmatprep.subr.bf16.mxu1 %v7507_v40  ;;  %v7541_v40 = vld [vmem:[%s9509_s1 + $0x9b0] sm:$0xff]   ;;  %v7550_v57 = vld [vmem:[%s9509_s1 + $0xa80] sm:$0xff]   ;;  %v7552_v60 = vld [vmem:[%s9509_s1 + $0xac8] sm:$0xff]  }
 0x11c   :  { %v8736_v63 = vadd.f32 %v6581_v56, %v4712_v55  ;;  %6862 = vmatpush3.bf16.msra.mxu0 %v7508_v43  ;;  %v7548_v55 = vld [vmem:[%s9509_s1 + $0xac0] sm:$0xff]  }
 0x11d   :  { %6863 = vmatprep.subr.bf16.mxu0 %v7510_v50  ;;  %v7544_v50 = vld [vmem:[%s9509_s1 + $0x938] sm:$0xff]   ;;  %v7549_v56 = vld [vmem:[%s9509_s1 + $0xa00] sm:$0xff]  }
 0x11e   :  { %6884 = vmatpush3.bf16.msra.mxu1 %v7509_v49 }
 0x11f   :  { %6885 = vmatprep.subr.bf16.mxu1 %v7511_v58  ;;  %v1311_v58 = vcombine.high %v1295_v53, %v1295_v53 }
 0x120   :  { %6864 = vmatpush3.bf16.msra.mxu0 %v7512_v61  ;;  %v7553_v61 = vld [vmem:[%s9509_s1 + $0xa08] sm:$0xff]  }
 0x121   :  { %6893 = vmatprep.subr.bf16.mxu0 %v7514_v3  ;;  %v7559_v3 = vld [vmem:[%s9509_s1 + $0xa58] sm:$0xff]  }
 0x122   :  { %6886 = vmatpush3.bf16.msra.mxu1 %v7513_v0  ;;  %v7556_v0 = vld [vmem:[%s9509_s1 + $0xad0] sm:$0xff]  }
 0x123   :  { %5270 = vmatmul.mubr.bf16.vlgmr.msra.gmra.mrb[32].mxu0 %v1288_v2  ;;  %6915 = vmatprep.subr.bf16.mxu1 %v7515_v6  ;;  %v7558_v2 = vld [vmem:[%s9509_s1 + $0xa90] sm:$0xff]   ;;  %v7562_v6 = vld [vmem:[%s9509_s1 + $0xa98] sm:$0xff]  }
 0x124   :  { %6894 = vmatpush3.bf16.msra.mxu0 %v7516_v7  ;;  %5349 = vmatprep.mubr.bf16.mxu0 %v1309_v8  ;;  %v7563_v7 = vld [vmem:[%s9509_s1 + $0xa60] sm:$0xff]  }
 0x125   :  { %5310 = vmatmul.mubr.bf16.vlgmr.msra.gmra.mrb[32].mxu1 %v1310_v10  ;;  %6895 = vmatprep.subr.bf16.mxu0 %v7518_v11  ;;  %v7564_v8 = vld [vmem:[%s9509_s1 + $0xae0] sm:$0xff]   ;;  %v7567_v11 = vld [vmem:[%s9509_s1 + $0xa68] sm:$0xff]  }
 0x126   :  { %6916 = vmatpush3.bf16.msra.mxu1 %v7517_v9  ;;  %5389 = vmatprep.mubr.bf16.mxu1 %v1313_v13  ;;  %v7565_v9 = vld [vmem:[%s9509_s1 + $0xa20] sm:$0xff]   ;;  %v7569_v13 = vld [vmem:[%s9509_s1 + $0xa28] sm:$0xff]  }
 0x127   :  { %6917 = vmatprep.subr.bf16.mxu1 %v7519_v12  ;;  %v7566_v10 = vld [vmem:[%s9509_s1 + $0xaa0] sm:$0xff]   ;;  %v7568_v12 = vld [vmem:[%s9509_s1 + $0xae8] sm:$0xff]  }
 0x128   :  { %6896 = vmatpush3.bf16.msra.mxu0 %v7520_v14  ;;  %v7570_v14 = vld [vmem:[%s9509_s1 + $0xaa8] sm:$0xff]  }
 0x129   :  { %6897 = vmatprep.subr.bf16.mxu0 %v7522_v16 }
 0x12a   :  { %6918 = vmatpush3.bf16.msra.mxu1 %v7521_v15  ;;  %v7571_v15 = vld [vmem:[%s9509_s1 + $0xa70] sm:$0xff]  }
 0x12b   :  { %6919 = vmatprep.subr.bf16.mxu1 %v7523_v17  ;;  %v7572_v17 = vld [vmem:[%s9509_s1 + $0xaf0] sm:$0xff]  }
 0x12c   :  { %6898 = vmatpush3.bf16.msra.mxu0 %v7524_v18 }
 0x12d   :  { %6899 = vmatprep.subr.bf16.mxu0 %v7526_v20 }
 0x12e   :  { %6920 = vmatpush3.bf16.msra.mxu1 %v7525_v19  ;;  %v7573_v19 = vld [vmem:[%s9509_s1 + $0xa30] sm:$0xff]  }
 0x12f   :  { %6921 = vmatprep.subr.bf16.mxu1 %v7527_v21 }
 0x130   :  { %6900 = vmatpush3.bf16.msra.mxu0 %v7528_v22 }
 0x131   :  { %6901 = vmatprep.subr.bf16.mxu0 %v7530_v24  ;;  %v7575_v24 = vld [vmem:[%s9509_s1 + $0xa78] sm:$0xff]  }
 0x132   :  { %6922 = vmatpush3.bf16.msra.mxu1 %v7529_v23  ;;  %v7574_v23 = vld [vmem:[%s9509_s1 + $0xab0] sm:$0xff]  }
 0x133   :  { %6923 = vmatprep.subr.bf16.mxu1 %v7531_v25  ;;  %v27_v25 = vld [vmem:[%s9508_s0 + $0x28] sm:$0xff] }
 0x134   :  { %6902 = vmatpush3.bf16.msra.mxu0 %v7532_v26 }
 0x135   :  { %6903 = vmatprep.subr.bf16.mxu0 %v7534_v28  ;;  %v1321_v28 = vrot.slane %v27_v25, %v7909_v41 }
 0x136   :  { %6924 = vmatpush3.bf16.msra.mxu1 %v7533_v27  ;;  %v6601_v33 = vpop.f32.mrb[8].mxu0 }
 0x137   :  { %v6602_v35 = vpop.f32.mrb[9].mxu0  ;;  %6925 = vmatprep.subr.bf16.mxu1 %v7535_v29  ;;  %v1314_v29 = vcombine.high %v27_v25, %v27_v25  ;;  %v7609_v25 = vld [vmem:[%s9509_s1 + $0xb38] sm:$0xff]  }
 0x138   :  { %v6623_v37 = vpop.f32.mrb[8].mxu1  ;;  %v6603_v38 = vadd.f32 %v6602_v35, %v6601_v33  ;;  %v6604_v39 = vpop.f32.mrb[10].mxu0  ;;  %6904 = vmatpush3.bf16.msra.mxu0 %v7536_v30  ;;  %v7576_v33 = vld [vmem:[%s9509_s1 + $0xaf8] sm:$0xff]  }
 0x139   :  { %v6624_v43 = vpop.f32.mrb[9].mxu1  ;;  %v6605_v44 = vpop.f32.mrb[11].mxu0  ;;  %6905 = vmatprep.subr.bf16.mxu0 %v7538_v32  ;;  %v7577_v35 = vld [vmem:[%s9509_s1 + $0xa38] sm:$0xff]  }
 0x13a   :  { %v4792_v45 = vadd.f32 %v6603_v38, %v8736_v63  ;;  %v6625_v46 = vadd.f32 %v6624_v43, %v6623_v37  ;;  %v6626_v47 = vpop.f32.mrb[10].mxu1  ;;  %6926 = vmatpush3.bf16.msra.mxu1 %v7537_v31  ;;  %v7555_v63 = vld [vmem:[%s9509_s1 + $0xa50] sm:$0xff]   ;;  %v8946_v37 = vrot.slane %v1314_v29, %v7909_v41  ;;  %v7578_v39 = vld [vmem:[%s9509_s1 + $0xab8] sm:$0xff]   ;;  %v7579_v43 = vld [vmem:[%s9509_s1 + $0xb40] sm:$0xff]  }
 0x13b   :  { %v6627_v49 = vpop.f32.mrb[11].mxu1  ;;  %6927 = vmatprep.subr.bf16.mxu1 %v7539_v34  ;;  %v7581_v47 = vld [vmem:[%s9509_s1 + $0xb00] sm:$0xff]  }
 0x13c   :  { %v8840_v51 = vadd.f32 %v6625_v46, %v4792_v45  ;;  %6906 = vmatpush3.bf16.msra.mxu0 %v7540_v36  ;;  %v1329_v36 = vcombine.high %v1321_v28, %v1321_v28  ;;  %v1330_v44 = vcombine.high %v8946_v37, %v8946_v37  ;;  %v7580_v45 = vld [vmem:[%s9509_s1 + $0xbc0] sm:$0xff]  }
 0x13d   :  { %6907 = vmatprep.subr.bf16.mxu0 %v7542_v42  ;;  %v1337_v42 = vrot.slane %v1321_v28, %v7909_v41  ;;  %v7582_v49 = vld [vmem:[%s9509_s1 + $0xb80] sm:$0xff]   ;;  %v1344_v28 = vrot.slane %v8946_v37, %v7909_v41  ;;  %v7619_v37 = vld [vmem:[%s9509_s1 + $0xc88] sm:$0xff]  }
 0x13e   :  { %6928 = vmatpush3.bf16.msra.mxu1 %v7541_v40  ;;  %v1351_v40 = vrot.slane %v1329_v36, %v7909_v41  ;;  %v7612_v29 = vld [vmem:[%s9509_s1 + $0xc40] sm:$0xff]   ;;  %v7618_v36 = vld [vmem:[%s9509_s1 + $0xc08] sm:$0xff]  }
 0x13f   :  { %6929 = vmatprep.subr.bf16.mxu1 %v7543_v48  ;;  %v1358_v48 = vrot.slane %v1330_v44, %v7909_v41  ;;  %v7625_v44 = vld [vmem:[%s9509_s1 + $0xcd8] sm:$0xff]  }
 0x140   :  { %6908 = vmatpush3.bf16.msra.mxu0 %v7544_v50  ;;  %v1361_v46 = vcombine.high %v1351_v40, %v1351_v40  ;;  %v1359_v50 = vcombine.high %v1337_v42, %v1337_v42 }
 0x141   :  { %6937 = vmatprep.subr.bf16.mxu0 %v7547_v54  ;;  %v7585_v54 = vld [vmem:[%s9509_s1 + $0xb08] sm:$0xff]  }
 0x142   :  { %6930 = vmatpush3.bf16.msra.mxu1 %v7545_v52  ;;  %v7584_v52 = vld [vmem:[%s9509_s1 + $0xbc8] sm:$0xff]  }
 0x143   :  { %5350 = vmatmul.mubr.bf16.vlgmr.msra.gmra.mrb[36].mxu0 %v1295_v53  ;;  %6959 = vmatprep.subr.bf16.mxu1 %v7548_v55  ;;  %v1362_v53 = vcombine.high %v1358_v48, %v1358_v48  ;;  %v7586_v55 = vld [vmem:[%s9509_s1 + $0xb88] sm:$0xff]  }
 0x144   :  { %6938 = vmatpush3.bf16.msra.mxu0 %v7549_v56  ;;  %5429 = vmatprep.mubr.bf16.mxu0 %v1351_v40  ;;  %v7587_v56 = vld [vmem:[%s9509_s1 + $0xb50] sm:$0xff]  }
 0x145   :  { %5390 = vmatmul.mubr.bf16.vlgmr.msra.gmra.mrb[36].mxu1 %v1311_v58  ;;  %6939 = vmatprep.subr.bf16.mxu0 %v7551_v59  ;;  %v7589_v58 = vld [vmem:[%s9509_s1 + $0xb10] sm:$0xff]  }
 0x146   :  { %6960 = vmatpush3.bf16.msra.mxu1 %v7550_v57  ;;  %5469 = vmatprep.mubr.bf16.mxu1 %v1361_v46  ;;  %v7588_v57 = vld [vmem:[%s9509_s1 + $0xbd0] sm:$0xff]   ;;  %v7627_v46 = vld [vmem:[%s9509_s1 + $0xc98] sm:$0xff]  }
 0x147   :  { %6961 = vmatprep.subr.bf16.mxu1 %v7552_v60  ;;  %v7590_v59 = vld [vmem:[%s9509_s1 + $0xb90] sm:$0xff]   ;;  %v7591_v60 = vld [vmem:[%s9509_s1 + $0xb58] sm:$0xff]  }
 0x148   :  { %6940 = vmatpush3.bf16.msra.mxu0 %v7553_v61  ;;  %v7592_v61 = vld [vmem:[%s9509_s1 + $0xbd8] sm:$0xff]   ;;  %v7622_v40 = vld [vmem:[%s9509_s1 + $0xc10] sm:$0xff]  }
 0x149   :  { %6941 = vmatprep.subr.bf16.mxu0 %v7555_v63  ;;  %v7594_v63 = vld [vmem:[%s9509_s1 + $0xb98] sm:$0xff]  }
 0x14a   :  { %6962 = vmatpush3.bf16.msra.mxu1 %v7554_v62  ;;  %v7593_v62 = vld [vmem:[%s9509_s1 + $0xb18] sm:$0xff]  }
 0x14b   :  { %6963 = vmatprep.subr.bf16.mxu1 %v7556_v0  ;;  %v7595_v0 = vld [vmem:[%s9509_s1 + $0xb60] sm:$0xff]  }
 0x14c   :  { %6942 = vmatpush3.bf16.msra.mxu0 %v7557_v1  ;;  %v7596_v1 = vld [vmem:[%s9509_s1 + $0xbe0] sm:$0xff]  }
 0x14d   :  { %6943 = vmatprep.subr.bf16.mxu0 %v7559_v3  ;;  %v7598_v3 = vld [vmem:[%s9509_s1 + $0xba0] sm:$0xff]  }
 0x14e   :  { %6964 = vmatpush3.bf16.msra.mxu1 %v7558_v2  ;;  %v7597_v2 = vld [vmem:[%s9509_s1 + $0xb20] sm:$0xff]  }
 0x14f   :  { %6965 = vmatprep.subr.bf16.mxu1 %v7560_v4  ;;  %v7599_v4 = vld [vmem:[%s9509_s1 + $0xb68] sm:$0xff]  }
 0x150   :  { %6944 = vmatpush3.bf16.msra.mxu0 %v7561_v5  ;;  %v7600_v5 = vld [vmem:[%s9509_s1 + $0xbe8] sm:$0xff]  }
 0x151   :  { %6945 = vmatprep.subr.bf16.mxu0 %v7563_v7  ;;  %v7602_v7 = vld [vmem:[%s9509_s1 + $0xba8] sm:$0xff]  }
 0x152   :  { %6966 = vmatpush3.bf16.msra.mxu1 %v7562_v6  ;;  %v7601_v6 = vld [vmem:[%s9509_s1 + $0xb28] sm:$0xff]  }
 0x153   :  { %6967 = vmatprep.subr.bf16.mxu1 %v7564_v8  ;;  %v7603_v8 = vld [vmem:[%s9509_s1 + $0xb70] sm:$0xff]  }
 0x154   :  { %6946 = vmatpush3.bf16.msra.mxu0 %v7565_v9 }
 0x155   :  { %6947 = vmatprep.subr.bf16.mxu0 %v7567_v11 }
 0x156   :  { %6968 = vmatpush3.bf16.msra.mxu1 %v7566_v10  ;;  %v6645_v16 = vpop.f32.mrb[12].mxu0  ;;  %v7604_v10 = vld [vmem:[%s9509_s1 + $0xbf0] sm:$0xff]  }
 0x157   :  { %v6646_v18 = vpop.f32.mrb[13].mxu0  ;;  %6969 = vmatprep.subr.bf16.mxu1 %v7568_v12  ;;  %v7605_v12 = vld [vmem:[%s9509_s1 + $0xb30] sm:$0xff]  }
 0x158   :  { %v6667_v20 = vpop.f32.mrb[12].mxu1  ;;  %v6647_v21 = vadd.f32 %v6646_v18, %v6645_v16  ;;  %v6648_v22 = vpop.f32.mrb[14].mxu0  ;;  %6948 = vmatpush3.bf16.msra.mxu0 %v7569_v13  ;;  %v7606_v16 = vld [vmem:[%s9509_s1 + $0xbb0] sm:$0xff]  }
 0x159   :  { %v6668_v26 = vpop.f32.mrb[13].mxu1  ;;  %v6649_v27 = vpop.f32.mrb[15].mxu0  ;;  %6949 = vmatprep.subr.bf16.mxu0 %v7571_v15 }
 0x15a   :  { %v4872_v30 = vadd.f32 %v6647_v21, %v8840_v51  ;;  %v6669_v31 = vadd.f32 %v6668_v26, %v6667_v20  ;;  %v6670_v32 = vpop.f32.mrb[14].mxu1  ;;  %6970 = vmatpush3.bf16.msra.mxu1 %v7570_v14  ;;  %v7583_v51 = vld [vmem:[%s9509_s1 + $0xb48] sm:$0xff]   ;;  %v7610_v27 = vld [vmem:[%s9509_s1 + $0xbb8] sm:$0xff]  }
 0x15b   :  { %v6671_v34 = vpop.f32.mrb[15].mxu1  ;;  %6971 = vmatprep.subr.bf16.mxu1 %v7572_v17  ;;  %v7607_v17 = vld [vmem:[%s9509_s1 + $0xb78] sm:$0xff]   ;;  %v7615_v32 = vld [vmem:[%s9509_s1 + $0xc80] sm:$0xff]  }
 0x15c   :  { %v8948_v38 = vadd.f32 %v6669_v31, %v4872_v30  ;;  %6950 = vmatpush3.bf16.msra.mxu0 %v7573_v19  ;;  %v7613_v30 = vld [vmem:[%s9509_s1 + $0xcc0] sm:$0xff]   ;;  %v7616_v34 = vld [vmem:[%s9509_s1 + $0xc48] sm:$0xff]  }
 0x15d   :  { %6951 = vmatprep.subr.bf16.mxu0 %v7575_v24  ;;  %v7614_v31 = vld [vmem:[%s9509_s1 + $0xc00] sm:$0xff]  }
 0x15e   :  { %6972 = vmatpush3.bf16.msra.mxu1 %v7574_v23  ;;  %v7608_v23 = vld [vmem:[%s9509_s1 + $0xbf8] sm:$0xff]  }
 0x15f   :  { %6973 = vmatprep.subr.bf16.mxu1 %v7576_v33  ;;  %v1360_v33 = vcombine.high %v1344_v28, %v1344_v28 }
 0x160   :  { %6952 = vmatpush3.bf16.msra.mxu0 %v7577_v35  ;;  %v7617_v35 = vld [vmem:[%s9509_s1 + $0xcc8] sm:$0xff]  }
 0x161   :  { %6981 = vmatprep.subr.bf16.mxu0 %v7579_v43  ;;  %v7624_v43 = vld [vmem:[%s9509_s1 + $0xc58] sm:$0xff]  }
 0x162   :  { %6974 = vmatpush3.bf16.msra.mxu1 %v7578_v39  ;;  %v7621_v39 = vld [vmem:[%s9509_s1 + $0xcd0] sm:$0xff]  }
 0x163   :  { %5430 = vmatmul.mubr.bf16.vlgmr.msra.gmra.mrb[40].mxu0 %v1337_v42  ;;  %7003 = vmatprep.subr.bf16.mxu1 %v7580_v45  ;;  %v7623_v42 = vld [vmem:[%s9509_s1 + $0xc90] sm:$0xff]   ;;  %v7626_v45 = vld [vmem:[%s9509_s1 + $0xc18] sm:$0xff]  }
 0x164   :  { %6982 = vmatpush3.bf16.msra.mxu0 %v7581_v47  ;;  %5509 = vmatprep.mubr.bf16.mxu0 %v1358_v48  ;;  %v7628_v47 = vld [vmem:[%s9509_s1 + $0xc60] sm:$0xff]  }
 0x165   :  { %5470 = vmatmul.mubr.bf16.vlgmr.msra.gmra.mrb[40].mxu1 %v1359_v50  ;;  %6983 = vmatprep.subr.bf16.mxu0 %v7583_v51  ;;  %v7629_v48 = vld [vmem:[%s9509_s1 + $0xce0] sm:$0xff]   ;;  %v7632_v51 = vld [vmem:[%s9509_s1 + $0xc68] sm:$0xff]  }
 0x166   :  { %7004 = vmatpush3.bf16.msra.mxu1 %v7582_v49  ;;  %5549 = vmatprep.mubr.bf16.mxu1 %v1362_v53  ;;  %v7630_v49 = vld [vmem:[%s9509_s1 + $0xc20] sm:$0xff]   ;;  %v7634_v53 = vld [vmem:[%s9509_s1 + $0xc28] sm:$0xff]  }
 0x167   :  { %7005 = vmatprep.subr.bf16.mxu1 %v7584_v52  ;;  %v7631_v50 = vld [vmem:[%s9509_s1 + $0xca0] sm:$0xff]   ;;  %v7633_v52 = vld [vmem:[%s9509_s1 + $0xce8] sm:$0xff]  }
 0x168   :  { %6984 = vmatpush3.bf16.msra.mxu0 %v7585_v54  ;;  %v7635_v54 = vld [vmem:[%s9509_s1 + $0xca8] sm:$0xff]  }
 0x169   :  { %6985 = vmatprep.subr.bf16.mxu0 %v7587_v56 }
 0x16a   :  { %7006 = vmatpush3.bf16.msra.mxu1 %v7586_v55  ;;  %v7636_v55 = vld [vmem:[%s9509_s1 + $0xc70] sm:$0xff]  }
 0x16b   :  { %7007 = vmatprep.subr.bf16.mxu1 %v7588_v57  ;;  %v7637_v57 = vld [vmem:[%s9509_s1 + $0xcf0] sm:$0xff]  }
 0x16c   :  { %6986 = vmatpush3.bf16.msra.mxu0 %v7589_v58 }
 0x16d   :  { %6987 = vmatprep.subr.bf16.mxu0 %v7591_v60 }
 0x16e   :  { %7008 = vmatpush3.bf16.msra.mxu1 %v7590_v59  ;;  %v7638_v59 = vld [vmem:[%s9509_s1 + $0xc30] sm:$0xff]  }
 0x16f   :  { %7009 = vmatprep.subr.bf16.mxu1 %v7592_v61 }
 0x170   :  { %6988 = vmatpush3.bf16.msra.mxu0 %v7593_v62 }
 0x171   :  { %6989 = vmatprep.subr.bf16.mxu0 %v7595_v0 }
 0x172   :  { %7010 = vmatpush3.bf16.msra.mxu1 %v7594_v63  ;;  %v7639_v63 = vld [vmem:[%s9509_s1 + $0xcb0] sm:$0xff]  }
 0x173   :  { %7011 = vmatprep.subr.bf16.mxu1 %v7596_v1 }
 0x174   :  { %6990 = vmatpush3.bf16.msra.mxu0 %v7597_v2  ;;  %v7640_v2 = vld [vmem:[%s9509_s1 + $0xc78] sm:$0xff]  }
 0x175   :  { %6991 = vmatprep.subr.bf16.mxu0 %v7599_v4 }
 0x176   :  { %7012 = vmatpush3.bf16.msra.mxu1 %v7598_v3  ;;  %v6689_v9 = vpop.f32.mrb[16].mxu0  ;;  %v28_v3 = vld [vmem:[%s9508_s0 + $0x30] sm:$0xff] }
 0x177   :  { %v6690_v11 = vpop.f32.mrb[17].mxu0  ;;  %7013 = vmatprep.subr.bf16.mxu1 %v7600_v5 }
 0x178   :  { %v6711_v13 = vpop.f32.mrb[16].mxu1  ;;  %v6691_v14 = vadd.f32 %v6690_v11, %v6689_v9  ;;  %v6692_v15 = vpop.f32.mrb[18].mxu0  ;;  %6992 = vmatpush3.bf16.msra.mxu0 %v7601_v6  ;;  %v1363_v9 = vcombine.high %v28_v3, %v28_v3  ;;  %v7642_v11 = vld [vmem:[%s9509_s1 + $0xc38] sm:$0xff]  }
 0x179   :  { %v6712_v18 = vpop.f32.mrb[17].mxu1  ;;  %v6693_v19 = vpop.f32.mrb[19].mxu0  ;;  %6993 = vmatprep.subr.bf16.mxu0 %v7603_v8  ;;  %v1370_v8 = vrot.slane %v28_v3, %v7909_v41  ;;  %v7675_v3 = vld [vmem:[%s9509_s1 + $0xdb8] sm:$0xff]  }
 0x17a   :  { %v4952_v20 = vadd.f32 %v6691_v14, %v8948_v38  ;;  %v6713_v21 = vadd.f32 %v6712_v18, %v6711_v13  ;;  %v6714_v22 = vpop.f32.mrb[18].mxu1  ;;  %7014 = vmatpush3.bf16.msra.mxu1 %v7602_v7  ;;  %v7620_v38 = vld [vmem:[%s9509_s1 + $0xc50] sm:$0xff]   ;;  %v7641_v7 = vld [vmem:[%s9509_s1 + $0xcf8] sm:$0xff]   ;;  %v9163_v15 = vrot.slane %v1363_v9, %v7909_v41  ;;  %v7645_v19 = vld [vmem:[%s9509_s1 + $0xdc0] sm:$0xff]  }
 0x17b   :  { %v6715_v24 = vpop.f32.mrb[19].mxu1  ;;  %7015 = vmatprep.subr.bf16.mxu1 %v7604_v10  ;;  %v7643_v13 = vld [vmem:[%s9509_s1 + $0xcb8] sm:$0xff]   ;;  %v1378_v14 = vcombine.high %v1370_v8, %v1370_v8 }
 0x17c   :  { %v9052_v26 = vadd.f32 %v6713_v21, %v4952_v20  ;;  %6994 = vmatpush3.bf16.msra.mxu0 %v7605_v12  ;;  %v1379_v20 = vcombine.high %v9163_v15, %v9163_v15  ;;  %v7646_v21 = vld [vmem:[%s9509_s1 + $0xd00] sm:$0xff]  }
 0x17d   :  { %6995 = vmatprep.subr.bf16.mxu0 %v7607_v17  ;;  %v7644_v17 = vld [vmem:[%s9509_s1 + $0xd40] sm:$0xff]   ;;  %v1400_v18 = vrot.slane %v1378_v14, %v7909_v41  ;;  %v7685_v14 = vld [vmem:[%s9509_s1 + $0xe50] sm:$0xff]  }
 0x17e   :  { %7016 = vmatpush3.bf16.msra.mxu1 %v7606_v16  ;;  %v1386_v16 = vrot.slane %v1370_v8, %v7909_v41  ;;  %v1407_v24 = vrot.slane %v1379_v20, %v7909_v41  ;;  %v7680_v8 = vld [vmem:[%s9509_s1 + $0xe80] sm:$0xff]   ;;  %v7691_v20 = vld [vmem:[%s9509_s1 + $0xe18] sm:$0xff]  }
 0x17f   :  { %7017 = vmatprep.subr.bf16.mxu1 %v7608_v23  ;;  %v1410_v22 = vcombine.high %v1400_v18, %v1400_v18  ;;  %v7647_v23 = vld [vmem:[%s9509_s1 + $0xd80] sm:$0xff]  }
 0x180   :  { %6996 = vmatpush3.bf16.msra.mxu0 %v7609_v25  ;;  %v1408_v25 = vcombine.high %v1386_v16, %v1386_v16 }
 0x181   :  { %7025 = vmatprep.subr.bf16.mxu0 %v7612_v29  ;;  %v7650_v29 = vld [vmem:[%s9509_s1 + $0xd08] sm:$0xff]  }
 0x182   :  { %7018 = vmatpush3.bf16.msra.mxu1 %v7610_v27  ;;  %v7649_v27 = vld [vmem:[%s9509_s1 + $0xdc8] sm:$0xff]  }
 0x183   :  { %5510 = vmatmul.mubr.bf16.vlgmr.msra.gmra.mrb[44].mxu0 %v1344_v28  ;;  %7047 = vmatprep.subr.bf16.mxu1 %v7613_v30  ;;  %v1411_v28 = vcombine.high %v1407_v24, %v1407_v24  ;;  %v7651_v30 = vld [vmem:[%s9509_s1 + $0xd88] sm:$0xff]  }
 0x184   :  { %7026 = vmatpush3.bf16.msra.mxu0 %v7614_v31  ;;  %5589 = vmatprep.mubr.bf16.mxu0 %v1400_v18  ;;  %v7652_v31 = vld [vmem:[%s9509_s1 + $0xd50] sm:$0xff]   ;;  %v7689_v18 = vld [vmem:[%s9509_s1 + $0xe58] sm:$0xff]  }
 0x185   :  { %5550 = vmatmul.mubr.bf16.vlgmr.msra.gmra.mrb[44].mxu1 %v1360_v33  ;;  %7027 = vmatprep.subr.bf16.mxu0 %v7616_v34  ;;  %v7654_v33 = vld [vmem:[%s9509_s1 + $0xd10] sm:$0xff]  }
 0x186   :  { %7048 = vmatpush3.bf16.msra.mxu1 %v7615_v32  ;;  %5629 = vmatprep.mubr.bf16.mxu1 %v1410_v22  ;;  %v7653_v32 = vld [vmem:[%s9509_s1 + $0xdd0] sm:$0xff]   ;;  %v7693_v22 = vld [vmem:[%s9509_s1 + $0xe60] sm:$0xff]  }
 0x187   :  { %7049 = vmatprep.subr.bf16.mxu1 %v7617_v35  ;;  %v7655_v34 = vld [vmem:[%s9509_s1 + $0xd90] sm:$0xff]   ;;  %v7656_v35 = vld [vmem:[%s9509_s1 + $0xd58] sm:$0xff]  }
 0x188   :  { %7028 = vmatpush3.bf16.msra.mxu0 %v7618_v36  ;;  %v7657_v36 = vld [vmem:[%s9509_s1 + $0xdd8] sm:$0xff]  }
 0x189   :  { %7029 = vmatprep.subr.bf16.mxu0 %v7620_v38  ;;  %v7659_v38 = vld [vmem:[%s9509_s1 + $0xd98] sm:$0xff]  }
 0x18a   :  { %7050 = vmatpush3.bf16.msra.mxu1 %v7619_v37  ;;  %v7658_v37 = vld [vmem:[%s9509_s1 + $0xd18] sm:$0xff]  }
 0x18b   :  { %7051 = vmatprep.subr.bf16.mxu1 %v7621_v39  ;;  %v7660_v39 = vld [vmem:[%s9509_s1 + $0xd60] sm:$0xff]  }
 0x18c   :  { %7030 = vmatpush3.bf16.msra.mxu0 %v7622_v40  ;;  %v7661_v40 = vld [vmem:[%s9509_s1 + $0xde0] sm:$0xff]  }
 0x18d   :  { %7031 = vmatprep.subr.bf16.mxu0 %v7624_v43  ;;  %v7663_v43 = vld [vmem:[%s9509_s1 + $0xda0] sm:$0xff]  }
 0x18e   :  { %7052 = vmatpush3.bf16.msra.mxu1 %v7623_v42  ;;  %v7662_v42 = vld [vmem:[%s9509_s1 + $0xd20] sm:$0xff]  }
 0x18f   :  { %7053 = vmatprep.subr.bf16.mxu1 %v7625_v44  ;;  %v7664_v44 = vld [vmem:[%s9509_s1 + $0xd68] sm:$0xff]  }
 0x190   :  { %7032 = vmatpush3.bf16.msra.mxu0 %v7626_v45  ;;  %v7665_v45 = vld [vmem:[%s9509_s1 + $0xde8] sm:$0xff]  }
 0x191   :  { %7033 = vmatprep.subr.bf16.mxu0 %v7628_v47  ;;  %v7667_v47 = vld [vmem:[%s9509_s1 + $0xda8] sm:$0xff]  }
 0x192   :  { %7054 = vmatpush3.bf16.msra.mxu1 %v7627_v46  ;;  %v7666_v46 = vld [vmem:[%s9509_s1 + $0xd28] sm:$0xff]  }
 0x193   :  { %7055 = vmatprep.subr.bf16.mxu1 %v7629_v48  ;;  %v7668_v48 = vld [vmem:[%s9509_s1 + $0xd70] sm:$0xff]  }
 0x194   :  { %7034 = vmatpush3.bf16.msra.mxu0 %v7630_v49 }
 0x195   :  { %7035 = vmatprep.subr.bf16.mxu0 %v7632_v51 }
 0x196   :  { %7056 = vmatpush3.bf16.msra.mxu1 %v7631_v50  ;;  %v6733_v56 = vpop.f32.mrb[20].mxu0  ;;  %v7669_v50 = vld [vmem:[%s9509_s1 + $0xdf0] sm:$0xff]  }
 0x197   :  { %v6734_v58 = vpop.f32.mrb[21].mxu0  ;;  %7057 = vmatprep.subr.bf16.mxu1 %v7633_v52  ;;  %v7670_v52 = vld [vmem:[%s9509_s1 + $0xd30] sm:$0xff]  }
 0x198   :  { %v6755_v60 = vpop.f32.mrb[20].mxu1  ;;  %v6735_v61 = vadd.f32 %v6734_v58, %v6733_v56  ;;  %v6736_v62 = vpop.f32.mrb[22].mxu0  ;;  %7036 = vmatpush3.bf16.msra.mxu0 %v7634_v53  ;;  %v7671_v56 = vld [vmem:[%s9509_s1 + $0xdb0] sm:$0xff]  }
 0x199   :  { %v6756_v0 = vpop.f32.mrb[21].mxu1  ;;  %v6737_v1 = vpop.f32.mrb[23].mxu0  ;;  %7037 = vmatprep.subr.bf16.mxu0 %v7636_v55 }
 0x19a   :  { %v5032_v4 = vadd.f32 %v6735_v61, %v9052_v26  ;;  %v6757_v5 = vadd.f32 %v6756_v0, %v6755_v60  ;;  %v6758_v6 = vpop.f32.mrb[22].mxu1  ;;  %7058 = vmatpush3.bf16.msra.mxu1 %v7635_v54  ;;  %v7648_v26 = vld [vmem:[%s9509_s1 + $0xd48] sm:$0xff]   ;;  %v7674_v1 = vld [vmem:[%s9509_s1 + $0xd38] sm:$0xff]  }
 0x19b   :  { %v6759_v10 = vpop.f32.mrb[23].mxu1  ;;  %7059 = vmatprep.subr.bf16.mxu1 %v7637_v57  ;;  %v7672_v57 = vld [vmem:[%s9509_s1 + $0xd78] sm:$0xff]   ;;  %v7678_v6 = vld [vmem:[%s9509_s1 + $0xec0] sm:$0xff]  }
 0x19c   :  { %v9157_v12 = vadd.f32 %v6757_v5, %v5032_v4  ;;  %7038 = vmatpush3.bf16.msra.mxu0 %v7638_v59  ;;  %v1393_v4 = vrot.slane %v9163_v15, %v7909_v41  ;;  %v7677_v5 = vld [vmem:[%s9509_s1 + $0xe40] sm:$0xff]   ;;  %v7681_v10 = vld [vmem:[%s9509_s1 + $0xe48] sm:$0xff]   ;;  %v7686_v15 = vld [vmem:[%s9509_s1 + $0xed0] sm:$0xff]  }
 0x19d   :  { %7039 = vmatprep.subr.bf16.mxu0 %v7640_v2 }
 0x19e   :  { %7060 = vmatpush3.bf16.msra.mxu1 %v7639_v63  ;;  %v7673_v63 = vld [vmem:[%s9509_s1 + $0xdf8] sm:$0xff]   ;;  %v1409_v9 = vcombine.high %v1393_v4, %v1393_v4 }
 0x19f   :  { %7061 = vmatprep.subr.bf16.mxu1 %v7641_v7  ;;  %v7679_v7 = vld [vmem:[%s9509_s1 + $0xe00] sm:$0xff]  }
 0x1a0   :  { %7040 = vmatpush3.bf16.msra.mxu0 %v7642_v11  ;;  %v7682_v11 = vld [vmem:[%s9509_s1 + $0xec8] sm:$0xff]  }
 0x1a1   :  { %7069 = vmatprep.subr.bf16.mxu0 %v7644_v17  ;;  %v7688_v17 = vld [vmem:[%s9509_s1 + $0xe90] sm:$0xff]  }
 0x1a2   :  { %7062 = vmatpush3.bf16.msra.mxu1 %v7643_v13  ;;  %v7684_v13 = vld [vmem:[%s9509_s1 + $0xe88] sm:$0xff]  }
 0x1a3   :  { %5590 = vmatmul.mubr.bf16.vlgmr.msra.gmra.mrb[48].mxu0 %v1386_v16  ;;  %7091 = vmatprep.subr.bf16.mxu1 %v7645_v19  ;;  %v7687_v16 = vld [vmem:[%s9509_s1 + $0xe10] sm:$0xff]   ;;  %v7690_v19 = vld [vmem:[%s9509_s1 + $0xed8] sm:$0xff]  }
 0x1a4   :  { %7070 = vmatpush3.bf16.msra.mxu0 %v7646_v21  ;;  %5669 = vmatprep.mubr.bf16.mxu0 %v1407_v24  ;;  %v7692_v21 = vld [vmem:[%s9509_s1 + $0xe98] sm:$0xff]   ;;  %v7695_v24 = vld [vmem:[%s9509_s1 + $0xe20] sm:$0xff]  }
 0x1a5   :  { %5630 = vmatmul.mubr.bf16.vlgmr.msra.gmra.mrb[48].mxu1 %v1408_v25  ;;  %7071 = vmatprep.subr.bf16.mxu0 %v7648_v26  ;;  %v7696_v25 = vld [vmem:[%s9509_s1 + $0xea0] sm:$0xff]   ;;  %v7697_v26 = vld [vmem:[%s9509_s1 + $0xe68] sm:$0xff]  }
 0x1a6   :  { %7092 = vmatpush3.bf16.msra.mxu1 %v7647_v23  ;;  %5709 = vmatprep.mubr.bf16.mxu1 %v1411_v28  ;;  %v7694_v23 = vld [vmem:[%s9509_s1 + $0xee0] sm:$0xff]   ;;  %v7699_v28 = vld [vmem:[%s9509_s1 + $0xe28] sm:$0xff]  }
 0x1a7   :  { %7093 = vmatprep.subr.bf16.mxu1 %v7649_v27  ;;  %v7698_v27 = vld [vmem:[%s9509_s1 + $0xee8] sm:$0xff]  }
 0x1a8   :  { %7072 = vmatpush3.bf16.msra.mxu0 %v7650_v29  ;;  %v7700_v29 = vld [vmem:[%s9509_s1 + $0xea8] sm:$0xff]  }
 0x1a9   :  { %7073 = vmatprep.subr.bf16.mxu0 %v7652_v31 }
 0x1aa   :  { %7094 = vmatpush3.bf16.msra.mxu1 %v7651_v30  ;;  %v7701_v30 = vld [vmem:[%s9509_s1 + $0xe70] sm:$0xff]  }
 0x1ab   :  { %7095 = vmatprep.subr.bf16.mxu1 %v7653_v32  ;;  %v7702_v32 = vld [vmem:[%s9509_s1 + $0xef0] sm:$0xff]  }
 0x1ac   :  { %7074 = vmatpush3.bf16.msra.mxu0 %v7654_v33 }
 0x1ad   :  { %7075 = vmatprep.subr.bf16.mxu0 %v7656_v35 }
 0x1ae   :  { %7096 = vmatpush3.bf16.msra.mxu1 %v7655_v34  ;;  %v7703_v34 = vld [vmem:[%s9509_s1 + $0xe30] sm:$0xff]  }
 0x1af   :  { %7097 = vmatprep.subr.bf16.mxu1 %v7657_v36 }
 0x1b0   :  { %7076 = vmatpush3.bf16.msra.mxu0 %v7658_v37 }
 0x1b1   :  { %7077 = vmatprep.subr.bf16.mxu0 %v7660_v39 }
 0x1b2   :  { %7098 = vmatpush3.bf16.msra.mxu1 %v7659_v38  ;;  %v7704_v38 = vld [vmem:[%s9509_s1 + $0xeb0] sm:$0xff]  }
 0x1b3   :  { %7099 = vmatprep.subr.bf16.mxu1 %v7661_v40 }
 0x1b4   :  { %7078 = vmatpush3.bf16.msra.mxu0 %v7662_v42  ;;  %v7705_v42 = vld [vmem:[%s9509_s1 + $0xe78] sm:$0xff]  }
 0x1b5   :  { %7079 = vmatprep.subr.bf16.mxu0 %v7664_v44 }
 0x1b6   :  { %7100 = vmatpush3.bf16.msra.mxu1 %v7663_v43  ;;  %v6777_v49 = vpop.f32.mrb[24].mxu0  ;;  %v7706_v43 = vld [vmem:[%s9509_s1 + $0xef8] sm:$0xff]  }
 0x1b7   :  { %v6778_v51 = vpop.f32.mrb[25].mxu0  ;;  %7101 = vmatprep.subr.bf16.mxu1 %v7665_v45 }
 0x1b8   :  { %v6799_v53 = vpop.f32.mrb[24].mxu1  ;;  %v6779_v54 = vadd.f32 %v6778_v51, %v6777_v49  ;;  %v6780_v55 = vpop.f32.mrb[26].mxu0  ;;  %7080 = vmatpush3.bf16.msra.mxu0 %v7666_v46  ;;  %v7707_v49 = vld [vmem:[%s9509_s1 + $0xe38] sm:$0xff]  }
 0x1b9   :  { %v6800_v58 = vpop.f32.mrb[25].mxu1  ;;  %v6781_v59 = vpop.f32.mrb[27].mxu0  ;;  %7081 = vmatprep.subr.bf16.mxu0 %v7668_v48 }
 0x1ba   :  { %v5112_v60 = vadd.f32 %v6779_v54, %v9157_v12  ;;  %v6801_v61 = vadd.f32 %v6800_v58, %v6799_v53  ;;  %v6802_v62 = vpop.f32.mrb[26].mxu1  ;;  %7102 = vmatpush3.bf16.msra.mxu1 %v7667_v47  ;;  %v7683_v12 = vld [vmem:[%s9509_s1 + $0xe08] sm:$0xff]   ;;  %v29_v47 = vld [vmem:[%s9508_s0 + $0x38] sm:$0xff]  ;;  %v7710_v58 = vld [vmem:[%s9509_s1 + $0xfc0] sm:$0xff]  }
 0x1bb   :  { %v6803_v0 = vpop.f32.mrb[27].mxu1  ;;  %7103 = vmatprep.subr.bf16.mxu1 %v7669_v50  ;;  %v1419_v50 = vrot.slane %v29_v47, %v7909_v41  ;;  %v1412_v51 = vcombine.high %v29_v47, %v29_v47  ;;  %v7708_v53 = vld [vmem:[%s9509_s1 + $0xeb8] sm:$0xff]   ;;  %v7712_v62 = vld [vmem:[%s9509_s1 + $0xf80] sm:$0xff]  }
 0x1bc   :  { %v9264_v2 = vadd.f32 %v6801_v61, %v5112_v60  ;;  %7082 = vmatpush3.bf16.msra.mxu0 %v7670_v52  ;;  %v7711_v60 = vld [vmem:[%s9509_s1 + $0xf00] sm:$0xff]  }
 0x1bd   :  { %7083 = vmatprep.subr.bf16.mxu0 %v7672_v57  ;;  %v1427_v54 = vcombine.high %v1419_v50, %v1419_v50  ;;  %v1435_v55 = vrot.slane %v1419_v50, %v7909_v41  ;;  %v9379_v57 = vrot.slane %v1412_v51, %v7909_v41 }
 0x1be   :  { %7104 = vmatpush3.bf16.msra.mxu1 %v7671_v56  ;;  %v7709_v56 = vld [vmem:[%s9509_s1 + $0xf40] sm:$0xff]  }
 0x1bf   :  { %7105 = vmatprep.subr.bf16.mxu1 %v7673_v63  ;;  %v1449_v59 = vrot.slane %v1427_v54, %v7909_v41  ;;  %v1428_v61 = vcombine.high %v9379_v57, %v9379_v57  ;;  %v1457_v0 = vcombine.high %v1435_v55, %v1435_v55 }
 0x1c0   :  { %7084 = vmatpush3.bf16.msra.mxu0 %v7674_v1  ;;  %v7713_v1 = vld [vmem:[%s9509_s1 + $0xf48] sm:$0xff]  }
 0x1c1   :  { %7113 = vmatprep.subr.bf16.mxu0 %v7677_v5  ;;  %v1459_v63 = vcombine.high %v1449_v59, %v1449_v59 }
 0x1c2   :  { %7106 = vmatpush3.bf16.msra.mxu1 %v7675_v3  ;;  %v7714_v3 = vld [vmem:[%s9509_s1 + $0xfc8] sm:$0xff]  }
 0x1c3   :  { %5670 = vmatmul.mubr.bf16.vlgmr.msra.gmra.mrb[52].mxu0 %v1393_v4  ;;  %7135 = vmatprep.subr.bf16.mxu1 %v7678_v6  ;;  %v7715_v4 = vld [vmem:[%s9509_s1 + $0xf08] sm:$0xff]  }
 0x1c4   :  { %7114 = vmatpush3.bf16.msra.mxu0 %v7679_v7  ;;  %5749 = vmatprep.mubr.bf16.mxu0 %v1449_v59  ;;  %v7716_v6 = vld [vmem:[%s9509_s1 + $0xf88] sm:$0xff]   ;;  %v7717_v7 = vld [vmem:[%s9509_s1 + $0xf50] sm:$0xff]  }
 0x1c5   :  { %5710 = vmatmul.mubr.bf16.vlgmr.msra.gmra.mrb[52].mxu1 %v1409_v9  ;;  %7115 = vmatprep.subr.bf16.mxu0 %v7681_v10  ;;  %v7719_v9 = vld [vmem:[%s9509_s1 + $0xf10] sm:$0xff]  }
 0x1c6   :  { %7136 = vmatpush3.bf16.msra.mxu1 %v7680_v8  ;;  %5789 = vmatprep.mubr.bf16.mxu1 %v1459_v63  ;;  %v7718_v8 = vld [vmem:[%s9509_s1 + $0xfd0] sm:$0xff]  }
 0x1c7   :  { %7137 = vmatprep.subr.bf16.mxu1 %v7682_v11  ;;  %v7720_v10 = vld [vmem:[%s9509_s1 + $0xf90] sm:$0xff]   ;;  %v7721_v11 = vld [vmem:[%s9509_s1 + $0xf58] sm:$0xff]  }
 0x1c8   :  { %7116 = vmatpush3.bf16.msra.mxu0 %v7683_v12  ;;  %v7722_v12 = vld [vmem:[%s9509_s1 + $0xfd8] sm:$0xff]  }
 0x1c9   :  { %7117 = vmatprep.subr.bf16.mxu0 %v7685_v14  ;;  %v7724_v14 = vld [vmem:[%s9509_s1 + $0xf98] sm:$0xff]  }
 0x1ca   :  { %7138 = vmatpush3.bf16.msra.mxu1 %v7684_v13  ;;  %v7723_v13 = vld [vmem:[%s9509_s1 + $0xf18] sm:$0xff]  }
 0x1cb   :  { %7139 = vmatprep.subr.bf16.mxu1 %v7686_v15  ;;  %v7725_v15 = vld [vmem:[%s9509_s1 + $0xf60] sm:$0xff]  }
 0x1cc   :  { %7118 = vmatpush3.bf16.msra.mxu0 %v7687_v16  ;;  %v7726_v16 = vld [vmem:[%s9509_s1 + $0xfe0] sm:$0xff]  }
 0x1cd   :  { %7119 = vmatprep.subr.bf16.mxu0 %v7689_v18  ;;  %v7728_v18 = vld [vmem:[%s9509_s1 + $0xfa0] sm:$0xff]  }
 0x1ce   :  { %7140 = vmatpush3.bf16.msra.mxu1 %v7688_v17  ;;  %v7727_v17 = vld [vmem:[%s9509_s1 + $0xf20] sm:$0xff]  }
 0x1cf   :  { %7141 = vmatprep.subr.bf16.mxu1 %v7690_v19  ;;  %v7729_v19 = vld [vmem:[%s9509_s1 + $0xf68] sm:$0xff]  }
 0x1d0   :  { %7120 = vmatpush3.bf16.msra.mxu0 %v7691_v20  ;;  %v7730_v20 = vld [vmem:[%s9509_s1 + $0xfe8] sm:$0xff]  }
 0x1d1   :  { %7121 = vmatprep.subr.bf16.mxu0 %v7693_v22  ;;  %v7732_v22 = vld [vmem:[%s9509_s1 + $0xfa8] sm:$0xff]  }
 0x1d2   :  { %7142 = vmatpush3.bf16.msra.mxu1 %v7692_v21  ;;  %v7731_v21 = vld [vmem:[%s9509_s1 + $0xf28] sm:$0xff]  }
 0x1d3   :  { %7143 = vmatprep.subr.bf16.mxu1 %v7694_v23  ;;  %v7733_v23 = vld [vmem:[%s9509_s1 + $0xf70] sm:$0xff]  }
 0x1d4   :  { %7122 = vmatpush3.bf16.msra.mxu0 %v7695_v24 }
 0x1d5   :  { %7123 = vmatprep.subr.bf16.mxu0 %v7697_v26 }
 0x1d6   :  { %7144 = vmatpush3.bf16.msra.mxu1 %v7696_v25  ;;  %v6821_v31 = vpop.f32.mrb[28].mxu0  ;;  %v7734_v25 = vld [vmem:[%s9509_s1 + $0xff0] sm:$0xff]  }
 0x1d7   :  { %v6822_v33 = vpop.f32.mrb[29].mxu0  ;;  %7145 = vmatprep.subr.bf16.mxu1 %v7698_v27  ;;  %v7735_v27 = vld [vmem:[%s9509_s1 + $0xf30] sm:$0xff]  }
 0x1d8   :  { %v6843_v35 = vpop.f32.mrb[28].mxu1  ;;  %v6823_v36 = vadd.f32 %v6822_v33, %v6821_v31  ;;  %v6824_v37 = vpop.f32.mrb[30].mxu0  ;;  %7124 = vmatpush3.bf16.msra.mxu0 %v7699_v28  ;;  %v7736_v31 = vld [vmem:[%s9509_s1 + $0xfb0] sm:$0xff]  }
 0x1d9   :  { %v6844_v39 = vpop.f32.mrb[29].mxu1  ;;  %v6825_v40 = vpop.f32.mrb[31].mxu0  ;;  %7125 = vmatprep.subr.bf16.mxu0 %v7701_v30 }
 0x1da   :  { %v5192_v44 = vadd.f32 %v6823_v36, %v9264_v2  ;;  %v6845_v45 = vadd.f32 %v6844_v39, %v6843_v35  ;;  %v6846_v46 = vpop.f32.mrb[30].mxu1  ;;  %7146 = vmatpush3.bf16.msra.mxu1 %v7700_v29  ;;  %v1456_v2 = vrot.slane %v1428_v61, %v7909_v41  ;;  %v7739_v40 = vld [vmem:[%s9509_s1 + $0xf38] sm:$0xff]  }
 0x1db   :  { %v6847_v48 = vpop.f32.mrb[31].mxu1  ;;  %7147 = vmatprep.subr.bf16.mxu1 %v7702_v32  ;;  %v7737_v32 = vld [vmem:[%s9509_s1 + $0xf78] sm:$0xff]  }
 0x1dc   :  { %v9369_v52 = vadd.f32 %v6845_v45, %v5192_v44  ;;  %7126 = vmatpush3.bf16.msra.mxu0 %v7703_v34  ;;  %v1460_v5 = vcombine.high %v1456_v2, %v1456_v2  ;;  %v7740_v44 = vld [vmem:[%s9509_s1 + $0xfb8] sm:$0xff]  }
 0x1dd   :  { %7127 = vmatprep.subr.bf16.mxu0 %v7705_v42 }
 0x1de   :  { %7148 = vmatpush3.bf16.msra.mxu1 %v7704_v38  ;;  %v7738_v38 = vld [vmem:[%s9509_s1 + $0xff8] sm:$0xff]  }
 0x1df   :  { %7149 = vmatprep.subr.bf16.mxu1 %v7706_v43  ;;  %v1442_v43 = vrot.slane %v9379_v57, %v7909_v41 }
 0x1e0   :  { %7128 = vmatpush3.bf16.msra.mxu0 %v7707_v49 }
 0x1e1   :  { %7157 = vmatprep.subr.bf16.mxu0 %v7709_v56 }
 0x1e2   :  { %7150 = vmatpush3.bf16.msra.mxu1 %v7708_v53 }
 0x1e3   :  { %5750 = vmatmul.mubr.bf16.vlgmr.msra.gmra.mrb[56].mxu0 %v1435_v55  ;;  %7179 = vmatprep.subr.bf16.mxu1 %v7710_v58 }
 0x1e4   :  { %7158 = vmatpush3.bf16.msra.mxu0 %v7711_v60  ;;  %5829 = vmatprep.mubr.bf16.mxu0 %v1456_v2 }
 0x1e5   :  { %5790 = vmatmul.mubr.bf16.vlgmr.msra.gmra.mrb[56].mxu1 %v1457_v0  ;;  %7159 = vmatprep.subr.bf16.mxu0 %v7713_v1 }
 0x1e6   :  { %7180 = vmatpush3.bf16.msra.mxu1 %v7712_v62  ;;  %5869 = vmatprep.mubr.bf16.mxu1 %v1460_v5 }
 0x1e7   :  { %7181 = vmatprep.subr.bf16.mxu1 %v7714_v3 }
 0x1e8   :  { %7160 = vmatpush3.bf16.msra.mxu0 %v7715_v4 }
 0x1e9   :  { %7161 = vmatprep.subr.bf16.mxu0 %v7717_v7 }
 0x1ea   :  { %7182 = vmatpush3.bf16.msra.mxu1 %v7716_v6 }
 0x1eb   :  { %7183 = vmatprep.subr.bf16.mxu1 %v7718_v8 }
 0x1ec   :  { %7162 = vmatpush3.bf16.msra.mxu0 %v7719_v9 }
 0x1ed   :  { %7163 = vmatprep.subr.bf16.mxu0 %v7721_v11 }
 0x1ee   :  { %7184 = vmatpush3.bf16.msra.mxu1 %v7720_v10 }
 0x1ef   :  { %7185 = vmatprep.subr.bf16.mxu1 %v7722_v12 }
 0x1f0   :  { %7164 = vmatpush3.bf16.msra.mxu0 %v7723_v13 }
 0x1f1   :  { %7165 = vmatprep.subr.bf16.mxu0 %v7725_v15 }
 0x1f2   :  { %7186 = vmatpush3.bf16.msra.mxu1 %v7724_v14 }
 0x1f3   :  { %7187 = vmatprep.subr.bf16.mxu1 %v7726_v16 }
 0x1f4   :  { %7166 = vmatpush3.bf16.msra.mxu0 %v7727_v17 }
 0x1f5   :  { %7167 = vmatprep.subr.bf16.mxu0 %v7729_v19 }
 0x1f6   :  { %7188 = vmatpush3.bf16.msra.mxu1 %v7728_v18  ;;  %v6865_v24 = vpop.f32.mrb[32].mxu0 }
 0x1f7   :  { %v6866_v26 = vpop.f32.mrb[33].mxu0  ;;  %7189 = vmatprep.subr.bf16.mxu1 %v7730_v20 }
 0x1f8   :  { %v6887_v28 = vpop.f32.mrb[32].mxu1  ;;  %v6867_v29 = vadd.f32 %v6866_v26, %v6865_v24  ;;  %v6868_v30 = vpop.f32.mrb[34].mxu0  ;;  %7168 = vmatpush3.bf16.msra.mxu0 %v7731_v21 }
 0x1f9   :  { %v6888_v33 = vpop.f32.mrb[33].mxu1  ;;  %v6869_v34 = vpop.f32.mrb[35].mxu0  ;;  %7169 = vmatprep.subr.bf16.mxu0 %v7733_v23 }
 0x1fa   :  { %v5272_v35 = vadd.f32 %v6867_v29, %v9369_v52  ;;  %v6889_v36 = vadd.f32 %v6888_v33, %v6887_v28  ;;  %v6890_v37 = vpop.f32.mrb[34].mxu1  ;;  %7190 = vmatpush3.bf16.msra.mxu1 %v7732_v22 }
 0x1fb   :  { %v6891_v39 = vpop.f32.mrb[35].mxu1  ;;  %7191 = vmatprep.subr.bf16.mxu1 %v7734_v25 }
 0x1fc   :  { %v5312_v42 = vadd.f32 %v6889_v36, %v5272_v35  ;;  %7170 = vmatpush3.bf16.msra.mxu0 %v7735_v27 }
 0x1fd   :  { %7171 = vmatprep.subr.bf16.mxu0 %v7737_v32 }
 0x1fe   :  { %7192 = vmatpush3.bf16.msra.mxu1 %v7736_v31 }
 0x1ff   :  { %10 = vsyncpa [#allocation3], 0  ;;  %7193 = vmatprep.subr.bf16.mxu1 %v7738_v38  ;;  %v1458_v45 = vcombine.high %v1442_v43, %v1442_v43  ;;  %v7742_v5 = vld [vmem:[%s9511_s3] sm:$0xff]   ;;  %v7771_v6 = vmov 0.0   ;;  %v7743_v9 = vld [vmem:[%s9511_s3 + $0x8] sm:$0xff]   ;;  %vm7772_vm0 = vmmov 0  }
 0x200   :  { %7172 = vmatpush3.bf16.msra.mxu0 %v7739_v40  ;;  %v7744_v19 = vld [vmem:[%s9511_s3 + $0x10] sm:$0xff]   ;;  %v7745_v21 = vld [vmem:[%s9511_s3 + $0x18] sm:$0xff]   ;;  %vm5918_vm1 = vcmask 523264   ;;  %s7773_s19 = smov [#allocation2]   ;;  %vm5962_vm2 = vcmask 74752  }
 0x201   :  { %7206 = vmatprep.subr.bf16.mxu0 %v7771_v6  ;;  %s5970_s20 = sshll.u32 %s7773_s19, 4  ;;  %s5971_s20 = int_to_ptr.vmem [resolvable:$true] %s5970_s20 }
 0x202   :  { %7194 = vmatpush3.bf16.msra.mxu1 %v7740_v44  ;;  %s7746_s21 = scalar_lea.vmem %s5971_s20, 32  ;;  %p7751_p1 = scmp.lt.s32.totalorder %s5971_s20, %s5971_s20 }
 0x203   :  { %5830 = vmatmul.mubr.bf16.vlgmr.msra.gmra.mrb[60].mxu0 %v1442_v43  ;;  %p7747_p0 = scmp.ne.s32.totalorder %s5971_s20, %s7746_s21  ;;  %p7752_p2 = scmp.lt.s32.totalorder %s7746_s21, %s7746_s21 }
 0x204   :  { %7207 = vmatpush3.bf16.msra.mxu0 %v7742_v5  ;;  %7214 = vmatprep.mubr.msk.bf16.mxu0 %vm7772_vm0, %v7771_v6 }
 0x205   :  { %5870 = vmatmul.mubr.bf16.vlgmr.msra.gmra.mrb[60].mxu1 %v1458_v45  ;;  %7208 = vmatprep.subr.bf16.mxu0 %v7771_v6  ;;  %p7753_p3 = por %p7752_p2, %p7751_p1 }
 0x207   :  { %p7754_p4 = pnand %p7753_p3, %p7747_p0 }
 0x208   :  { %7209 = vmatpush3.bf16.msra.mxu0 %v7743_v9 }
 0x209   :  { %7210 = vmatprep.subr.bf16.mxu0 %v7771_v6 }
 0x20c   :  { %7211 = vmatpush3.bf16.msra.mxu0 %v7744_v19 }
 0x20d   :  { %7212 = vmatprep.subr.bf16.mxu0 %v7771_v6 }
 0x210   :  { %7213 = vmatpush3.bf16.msra.mxu0 %v7745_v21 }
 0x216   :  { %v6909_v46 = vpop.f32.mrb[36].mxu0 }
 0x217   :  { %v6910_v47 = vpop.f32.mrb[37].mxu0 }
 0x218   :  { %v6931_v48 = vpop.f32.mrb[36].mxu1  ;;  %v6911_v49 = vadd.f32 %v6910_v47, %v6909_v46  ;;  %v6912_v50 = vpop.f32.mrb[38].mxu0 }
 0x219   :  { %v6932_v51 = vpop.f32.mrb[37].mxu1  ;;  %v6913_v52 = vpop.f32.mrb[39].mxu0 }
 0x21a   :  { %v5352_v41 = vadd.f32 %v6911_v49, %v5312_v42  ;;  %v6933_v53 = vadd.f32 %v6932_v51, %v6931_v48  ;;  %v6934_v54 = vpop.f32.mrb[38].mxu1 }
 0x21b   :  { %v6935_v55 = vpop.f32.mrb[39].mxu1 }
 0x21c   :  { %v5392_v56 = vadd.f32 %v6933_v53, %v5352_v41 }
 0x236   :  { %v6953_v57 = vpop.f32.mrb[40].mxu0 }
 0x237   :  { %v6954_v58 = vpop.f32.mrb[41].mxu0 }
 0x238   :  { %v6975_v59 = vpop.f32.mrb[40].mxu1  ;;  %v6955_v60 = vadd.f32 %v6954_v58, %v6953_v57  ;;  %v6956_v61 = vpop.f32.mrb[42].mxu0 }
 0x239   :  { %v6976_v62 = vpop.f32.mrb[41].mxu1  ;;  %v6957_v63 = vpop.f32.mrb[43].mxu0 }
 0x23a   :  { %v5432_v0 = vadd.f32 %v6955_v60, %v5392_v56  ;;  %v6977_v1 = vadd.f32 %v6976_v62, %v6975_v59  ;;  %v6978_v2 = vpop.f32.mrb[42].mxu1 }
 0x23b   :  { %v6979_v3 = vpop.f32.mrb[43].mxu1 }
 0x23c   :  { %v5472_v4 = vadd.f32 %v6977_v1, %v5432_v0 }
 0x256   :  { %v6997_v7 = vpop.f32.mrb[44].mxu0 }
 0x257   :  { %v6998_v8 = vpop.f32.mrb[45].mxu0 }
 0x258   :  { %v7019_v10 = vpop.f32.mrb[44].mxu1  ;;  %v6999_v11 = vadd.f32 %v6998_v8, %v6997_v7  ;;  %v7000_v12 = vpop.f32.mrb[46].mxu0  ;;  %v6491_v8 = vld [vmem:[%s9512_s4] ss:$0 sm:$0xff] }
 0x259   :  { %v7020_v13 = vpop.f32.mrb[45].mxu1  ;;  %v7001_v14 = vpop.f32.mrb[47].mxu0 }
 0x25a   :  { %v5512_v15 = vadd.f32 %v6999_v11, %v5472_v4  ;;  %v7021_v16 = vadd.f32 %v7020_v13, %v7019_v10  ;;  %v7022_v17 = vpop.f32.mrb[46].mxu1 }
 0x25b   :  { %v7023_v18 = vpop.f32.mrb[47].mxu1 }
 0x25c   :  { %v5552_v20 = vadd.f32 %v7021_v16, %v5512_v15 }
 0x276   :  { %v7041_v22 = vpop.f32.mrb[48].mxu0 }
 0x277   :  { %v7042_v23 = vpop.f32.mrb[49].mxu0 }
 0x278   :  { %v7063_v24 = vpop.f32.mrb[48].mxu1  ;;  %v7043_v25 = vadd.f32 %v7042_v23, %v7041_v22  ;;  %v7044_v26 = vpop.f32.mrb[50].mxu0 }
 0x279   :  { %v7064_v27 = vpop.f32.mrb[49].mxu1  ;;  %v7045_v28 = vpop.f32.mrb[51].mxu0 }
 0x27a   :  { %v5592_v29 = vadd.f32 %v7043_v25, %v5552_v20  ;;  %v7065_v30 = vadd.f32 %v7064_v27, %v7063_v24  ;;  %v7066_v31 = vpop.f32.mrb[50].mxu1 }
 0x27b   :  { %v7067_v32 = vpop.f32.mrb[51].mxu1 }
 0x27c   :  { %v5632_v33 = vadd.f32 %v7065_v30, %v5592_v29 }
 0x296   :  { %v7085_v34 = vpop.f32.mrb[52].mxu0 }
 0x297   :  { %v7086_v35 = vpop.f32.mrb[53].mxu0 }
 0x298   :  { %v7107_v36 = vpop.f32.mrb[52].mxu1  ;;  %v7087_v37 = vadd.f32 %v7086_v35, %v7085_v34  ;;  %v7088_v38 = vpop.f32.mrb[54].mxu0 }
 0x299   :  { %v7108_v39 = vpop.f32.mrb[53].mxu1  ;;  %v7089_v40 = vpop.f32.mrb[55].mxu0 }
 0x29a   :  { %v5672_v42 = vadd.f32 %v7087_v37, %v5632_v33  ;;  %v7109_v43 = vadd.f32 %v7108_v39, %v7107_v36  ;;  %v7110_v44 = vpop.f32.mrb[54].mxu1 }
 0x29b   :  { %v7111_v45 = vpop.f32.mrb[55].mxu1 }
 0x29c   :  { %v5712_v46 = vadd.f32 %v7109_v43, %v5672_v42 }
 0x2b6   :  { %v7129_v47 = vpop.f32.mrb[56].mxu0 }
 0x2b7   :  { %v7130_v48 = vpop.f32.mrb[57].mxu0 }
 0x2b8   :  { %v7151_v49 = vpop.f32.mrb[56].mxu1  ;;  %v7131_v50 = vadd.f32 %v7130_v48, %v7129_v47  ;;  %v7132_v51 = vpop.f32.mrb[58].mxu0 }
 0x2b9   :  { %v7152_v52 = vpop.f32.mrb[57].mxu1  ;;  %v7133_v41 = vpop.f32.mrb[59].mxu0 }
 0x2ba   :  { %v5752_v53 = vadd.f32 %v7131_v50, %v5712_v46  ;;  %v7153_v54 = vadd.f32 %v7152_v52, %v7151_v49  ;;  %v7154_v55 = vpop.f32.mrb[58].mxu1 }
 0x2bb   :  { %v7155_v56 = vpop.f32.mrb[59].mxu1 }
 0x2bc   :  { %v5792_v57 = vadd.f32 %v7153_v54, %v5752_v53 }
 0x2d6   :  { %v7173_v58 = vpop.f32.mrb[60].mxu0 }
 0x2d7   :  { %v7174_v59 = vpop.f32.mrb[61].mxu0 }
 0x2d8   :  { %v7195_v60 = vpop.f32.mrb[60].mxu1  ;;  %v7175_v61 = vadd.f32 %v7174_v59, %v7173_v58  ;;  %v7176_v62 = vpop.f32.mrb[62].mxu0 }
 0x2d9   :  { %v7196_v63 = vpop.f32.mrb[61].mxu1  ;;  %v7177_v0 = vpop.f32.mrb[63].mxu0 }
 0x2da   :  { %v5832_v1 = vadd.f32 %v7175_v61, %v5792_v57  ;;  %v7197_v2 = vadd.f32 %v7196_v63, %v7195_v60  ;;  %v7198_v3 = vpop.f32.mrb[62].mxu1 }
 0x2db   :  { %v7199_v4 = vpop.f32.mrb[63].mxu1 }
 0x2dc   :  { %v5872_v5 = vadd.f32 %v7197_v2, %v5832_v1 }
 0x2de   :  { %v5877_v6 = vmax.f32 %v5872_v5, 0.0 }
 0x2e0   :  { %v5878_v7 = vpack.c.bf16 %v5877_v6, %v5877_v6 }
 0x2e2   :  { %7215 = vmatmul.mubr.msk.bf16.vlgmr.msra.gmra.mrb[64].mxu0 %vm5918_vm1, %v5878_v7 }
 0x3b5   :  { %v5956_v9 = vpop.f32.mrb[64].mxu0 }
 0x3b6   :  { %v5957_v10 = vadd.f32 %v6491_v8, %v5956_v9  ;;  %v7216_v11 = vpop.f32.mrb[65].mxu0 }
 0x3b7   :  { %v5959_v12 = vpop.f32.mrb[66].mxu0 }
 0x3b8   :  { %v7217_v13 = vpop.f32.mrb[67].mxu0  ;;  %5963 = vst.msk [vmem:[#allocation2] sm:$0x3] %vm5962_vm2, %v5957_v10 }
 0x3b9   :  { %7757 = shalt.err (!%p7754_p4)
}
 0x3ba   :  { %s7758_s4 = scalar_lea.hbm %s9513_s5, 32 }
 0x3bb   :  { %p7759_p5 = scmp.ne.s32.totalorder %s9513_s5, %s7758_s4  ;;  %p7762_p6 = scmp.lt.u32.totalorder %s7758_s4, %s9513_s5 }
 0x3bd   :  { %p7764_p7 = pnand %p7762_p6, %p7759_p5 }
 0x3bf   :  { %7767 = shalt.err (!%p7764_p7)
}
 0x3c0   :  { %5973 = dma.vmem_to_hbm [thread:$0]  %s5971_s20, 32, %s9513_s5, [#allocation3]  }
 0x3c1   :  { %7768 = dma.done.wait [#allocation3], 32  }
 0x3c2   :  { %7769 = vsyncadd [#allocation3], 4294967264 }
 0x3c3   :  { %5977 = vsyncpa [#allocation3], 1 }

</bundles_post_ra>
